<compile_context>
chip_gen: v7x
topology: tpu7x:2x2x1
jax: 0.10.0
libtpu: 0.0.40
codegen_flags: <defaults>
</compile_context>

<pallas_src>
import jax
import jax.numpy as jnp
import numpy as np
from jax.experimental import pallas as pl
from jax.experimental.pallas import tpu as pltpu

# ----------------------------- model sizes ---------------------------------
T = 8             # sequence length
B = 8             # batch
N_IN = 3          # LSTM input size (velocity inputs)
NH_LSTM = 128     # nh_lstm
NH_BN = 256       # nh_bottleneck
N_PC = 256        # target_ensembles[0].n_cells
N_HD = 12         # target_ensembles[1].n_cells
INIT_SIZE = 268   # init_conds_size (= 256 + 12)
N_HEAD_PAD = 384  # fused pc|hd head width, padded to 3*128 lanes


# ------------------------------ Pallas kernel -------------------------------
def grid_lstm_kernel(
    # inputs (all full VMEM blocks)
    x2_ref,      # (T*B, 3)     all timesteps, time-major rows, f32
    init_ref,    # (B, 268)     f32
    wsece_ref,   # (268, 256)   [Wse | Wce] fused, bf16
    bsece_ref,   # (1, 256)     [bse | bce], f32
    wx_ref,      # (3, 512)     f32
    wh_ref,      # (128, 512)   bf16
    bl_ref,      # (1, 512)     f32 (forget-gate +1.0 already folded in)
    wbn_ref,     # (128, 256)   bf16
    wpchd_ref,   # (256, 384)   bf16  [Wpc | Whd | 0-pad]
    bpchd_ref,   # (1, 384)     f32   [bpc | bhd | 0-pad]
    # outputs
    pchd_ref,    # (T*B, 384)
    bn_ref,      # (T*B, 256)
    hout_ref,    # (T*B, 128)
    cout_ref,    # (T*B, 128)
):
    n_b = init_ref.shape[0]
    n_t = x2_ref.shape[0] // n_b

    # --- fused initial state/cell embedding: one (B,268)@(268,256) bf16 matmul ---
    emb = (jnp.dot(init_ref[...].astype(jnp.bfloat16), wsece_ref[...],
                   preferred_element_type=jnp.float32) + bsece_ref[...])
    h = emb[:, :NH_LSTM]                 # init_state, f32
    c = emb[:, NH_LSTM:2 * NH_LSTM]      # init_cell,  f32

    # --- input-gate contributions for ALL timesteps at once -----------------
    # K=3 projection as 3 rank-1 VPU multiply-adds (exact f32, no MXU push).
    x2 = x2_ref[...]                     # (T*B, 3)
    wx = wx_ref[...]                     # (3, 512)
    gates_x = (bl_ref[...]
               + x2[:, 0:1] * wx[0:1, :]
               + x2[:, 1:2] * wx[1:2, :]
               + x2[:, 2:3] * wx[2:3, :])            # (T*B, 512) f32

    wh = wh_ref[...]                     # (128, 512) bf16, hoisted load

    # --- serial LSTM recurrence, fully unrolled (T is small & static) -------
    for t in range(n_t):
        gates = gates_x[t * n_b:(t + 1) * n_b, :] + jnp.dot(
            h.astype(jnp.bfloat16), wh,
            preferred_element_type=jnp.float32)        # (B, 512) f32
        i = gates[:, 0 * NH_LSTM:1 * NH_LSTM]
        j = gates[:, 1 * NH_LSTM:2 * NH_LSTM]
        f = gates[:, 2 * NH_LSTM:3 * NH_LSTM]          # +1.0 folded into bias
        o = gates[:, 3 * NH_LSTM:4 * NH_LSTM]
        c = c * jax.nn.sigmoid(f) + jax.nn.sigmoid(i) * jnp.tanh(j)
        h = jnp.tanh(c) * jax.nn.sigmoid(o)
        hout_ref[t * n_b:(t + 1) * n_b, :] = h
        cout_ref[t * n_b:(t + 1) * n_b, :] = c

    # --- heads hoisted out of the loop, batched over M = T*B rows -----------
    h_all = hout_ref[...].astype(jnp.bfloat16)                 # (T*B, 128)
    bn = jnp.dot(h_all, wbn_ref[...],
                 preferred_element_type=jnp.float32)           # (T*B, 256)
    bn_ref[...] = bn
    pchd = (jnp.dot(bn.astype(jnp.bfloat16), wpchd_ref[...],
                    preferred_element_type=jnp.float32)
            + bpchd_ref[...])                                  # (T*B, 384)
    pchd_ref[...] = pchd


# ------------------------------- wrapper -------------------------------------
def grid_torch_forward(x, init, params):
    """x: (T, B, 3) f32; init: (B, 268) f32; params: dict of f32 arrays."""
    T_, B_, _ = x.shape
    x2 = x.reshape(T_ * B_, N_IN)

    # ---- parameter fusion / padding / casting (plain-JAX glue) -------------
    wsece = jnp.concatenate([params["Wse"], params["Wce"]], axis=1)   # (268, 256)
    bsece = jnp.concatenate([params["bse"], params["bce"]], axis=1)   # (1, 256)
    pad_n = N_HEAD_PAD - (N_PC + N_HD)
    wpchd = jnp.concatenate(
        [params["Wpc"], params["Whd"],
         jnp.zeros((NH_BN, pad_n), jnp.float32)], axis=1)             # (256, 384)
    bpchd = jnp.concatenate(
        [params["bpc"], params["bhd"],
         jnp.zeros((1, pad_n), jnp.float32)], axis=1)                 # (1, 384)

    # fold the forget-gate +1.0 into the f-gate bias columns
    b_lstm = params["b_lstm"].at[:, 2 * NH_LSTM:3 * NH_LSTM].add(1.0)

    # bf16 weights: recurrent Wh, fused embedding, bottleneck, fused pc|hd head
    wsece16 = wsece.astype(jnp.bfloat16)
    wh16 = params["Wh"].astype(jnp.bfloat16)
    wbn16 = params["Wbn"].astype(jnp.bfloat16)
    wpchd16 = wpchd.astype(jnp.bfloat16)

    operands = (x2, init, wsece16, bsece,
                params["Wx"], wh16, b_lstm,
                wbn16, wpchd16, bpchd)

    full = lambda a: pl.BlockSpec(a.shape, lambda *_: (0,) * a.ndim)

    out_shape = [
        jax.ShapeDtypeStruct((T_ * B_, N_HEAD_PAD), jnp.float32),  # fused pc|hd
        jax.ShapeDtypeStruct((T_ * B_, NH_BN), jnp.float32),       # bottleneck
        jax.ShapeDtypeStruct((T_ * B_, NH_LSTM), jnp.float32),     # h
        jax.ShapeDtypeStruct((T_ * B_, NH_LSTM), jnp.float32),     # c
    ]
    out_specs = [pl.BlockSpec(s.shape, lambda *_: (0, 0)) for s in out_shape]

    pchd, bn, hflat, cflat = pl.pallas_call(
        grid_lstm_kernel,
        grid=(1,),                       # single invocation; recurrence in-kernel
        in_specs=[full(a) for a in operands],
        out_specs=out_specs,
        out_shape=out_shape,
        compiler_params=pltpu.CompilerParams(
            dimension_semantics=("arbitrary",),
        ),
    )(*operands)

    pchd = pchd.reshape(T_, B_, N_HEAD_PAD)
    hd = pchd[:, :, N_PC:N_PC + N_HD]
    pc = pchd[:, :, :N_PC]
    bn = bn.reshape(T_, B_, NH_BN)
    h = hflat.reshape(T_, B_, NH_LSTM)
    c = cflat.reshape(T_, B_, NH_LSTM)
    return hd, pc, bn, h, c


# --------------------------- pure-JAX reference ------------------------------
def reference_forward(x, init, p):
    h = init @ p["Wse"] + p["bse"]
    c = init @ p["Wce"] + p["bce"]
    hds, pcs, bns, hs, cs = [], [], [], [], []
    for t in range(x.shape[0]):
        gates = x[t] @ p["Wx"] + h @ p["Wh"] + p["b_lstm"]
        i, j, f, o = jnp.split(gates, 4, axis=1)
        g = jnp.tanh(j)
        c = c * jax.nn.sigmoid(f + 1.0) + jax.nn.sigmoid(i) * g
        h = jnp.tanh(c) * jax.nn.sigmoid(o)
        bn = h @ p["Wbn"]
        pc = bn @ p["Wpc"] + p["bpc"]
        hd = bn @ p["Whd"] + p["bhd"]
        hds.append(hd); pcs.append(pc); bns.append(bn); hs.append(h); cs.append(c)
    return (jnp.stack(hds), jnp.stack(pcs), jnp.stack(bns),
            jnp.stack(hs), jnp.stack(cs))


# -------------------------------- main ---------------------------------------
if __name__ == "__main__":
    key = jax.random.PRNGKey(0)
    keys = jax.random.split(key, 16)

    def normal(k, shape, scale):
        return (scale * jax.random.normal(k, shape)).astype(jnp.float32)

    # Deterministic synthetic parameters (shapes match GridTorch.__init__;
    # PyTorch Linear weights are (out, in) — stored here pre-transposed).
    params = {
        "Wse": normal(keys[0], (INIT_SIZE, NH_LSTM), 1.0 / np.sqrt(128)),
        "bse": jnp.zeros((1, NH_LSTM), jnp.float32),
        "Wce": normal(keys[1], (INIT_SIZE, NH_LSTM), 1.0 / np.sqrt(128)),
        "bce": jnp.zeros((1, NH_LSTM), jnp.float32),
        # TFLSTMCell weight is (n_units + n_inputs, 4*n_units); split rows into
        # the x-part (first n_inputs) and h-part (last n_units) for the kernel.
        "Wx": normal(keys[2], (N_IN, 4 * NH_LSTM), 1.0 / np.sqrt(NH_LSTM + N_IN)),
        "Wh": normal(keys[3], (NH_LSTM, 4 * NH_LSTM), 1.0 / np.sqrt(NH_LSTM + N_IN)),
        "b_lstm": jnp.zeros((1, 4 * NH_LSTM), jnp.float32),
        "Wbn": normal(keys[4], (NH_LSTM, NH_BN), 1.0 / np.sqrt(256)),   # no bias
        "Wpc": normal(keys[5], (NH_BN, N_PC), 1.0 / np.sqrt(256)),
        "bpc": jnp.zeros((1, N_PC), jnp.float32),
        "Whd": normal(keys[6], (NH_BN, N_HD), 1.0 / np.sqrt(12)),
        "bhd": jnp.zeros((1, N_HD), jnp.float32),
    }

    # Inputs: x (T, B, 3), initial_conds = (pc_init (B,256), hd_init (B,12))
    x = normal(keys[7], (T, B, N_IN), 1.0)
    init_pc = normal(keys[8], (B, N_PC), 1.0)
    init_hd = normal(keys[9], (B, N_HD), 1.0)
    init = jnp.concatenate([init_pc, init_hd], axis=1)  # (B, 268)

    outs = jax.block_until_ready(grid_torch_forward(x, init, params))
    refs = reference_forward(x, init, params)
    # bf16 is now used on the recurrent h@Wh matmul (compounding over T=8 steps)
    # as well as the embedding and head matmuls, so tolerance is sized for bf16
    # rounding; the 1/sqrt(12)-scaled hd head amplifies bottleneck error ~4-5x,
    # hence 5e-2.  This still catches any structural/semantic bug.
    for o, r in zip(outs, refs):
        assert o.shape == r.shape, (o.shape, r.shape)
        np.testing.assert_allclose(np.asarray(o), np.asarray(r),
                                   rtol=5e-2, atol=5e-2)

    print("KERNEL_OK")
</pallas_src>

<mosaic_0001>
module attributes {stable_mosaic.version = 11 : i64} {
  func.func @grid_lstm_kernel(%arg0: i32, %arg1: memref<64x3xf32, #tpu.memory_space<vmem>>, %arg2: memref<8x268xf32, #tpu.memory_space<vmem>>, %arg3: memref<268x256xbf16, #tpu.memory_space<vmem>>, %arg4: memref<1x256xf32, #tpu.memory_space<vmem>>, %arg5: memref<3x512xf32, #tpu.memory_space<vmem>>, %arg6: memref<128x512xbf16, #tpu.memory_space<vmem>>, %arg7: memref<1x512xf32, #tpu.memory_space<vmem>>, %arg8: memref<128x256xbf16, #tpu.memory_space<vmem>>, %arg9: memref<256x384xbf16, #tpu.memory_space<vmem>>, %arg10: memref<1x384xf32, #tpu.memory_space<vmem>>, %arg11: memref<64x384xf32, #tpu.memory_space<vmem>>, %arg12: memref<64x256xf32, #tpu.memory_space<vmem>>, %arg13: memref<64x128xf32, #tpu.memory_space<vmem>>, %arg14: memref<64x128xf32, #tpu.memory_space<vmem>>) attributes {dimension_semantics = [#tpu.dimension_semantics<arbitrary>], iteration_bounds = array<i64: 1>, scalar_prefetch = 0 : i64, scratch_operands = 0 : i64, tpu.core_type = #tpu.core_type<tc>, window_params = [{pipeline_mode = #tpu.pipeline_mode<synchronous>, transform_indices = @transform_0, window_bounds = array<i64: 64, 3>}, {pipeline_mode = #tpu.pipeline_mode<synchronous>, transform_indices = @transform_1, window_bounds = array<i64: 8, 268>}, {pipeline_mode = #tpu.pipeline_mode<synchronous>, transform_indices = @transform_2, window_bounds = array<i64: 268, 256>}, {pipeline_mode = #tpu.pipeline_mode<synchronous>, transform_indices = @transform_3, window_bounds = array<i64: 1, 256>}, {pipeline_mode = #tpu.pipeline_mode<synchronous>, transform_indices = @transform_4, window_bounds = array<i64: 3, 512>}, {pipeline_mode = #tpu.pipeline_mode<synchronous>, transform_indices = @transform_5, window_bounds = array<i64: 128, 512>}, {pipeline_mode = #tpu.pipeline_mode<synchronous>, transform_indices = @transform_6, window_bounds = array<i64: 1, 512>}, {pipeline_mode = #tpu.pipeline_mode<synchronous>, transform_indices = @transform_7, window_bounds = array<i64: 128, 256>}, {pipeline_mode = #tpu.pipeline_mode<synchronous>, transform_indices = @transform_8, window_bounds = array<i64: 256, 384>}, {pipeline_mode = #tpu.pipeline_mode<synchronous>, transform_indices = @transform_9, window_bounds = array<i64: 1, 384>}, {pipeline_mode = #tpu.pipeline_mode<synchronous>, transform_indices = @transform_10, window_bounds = array<i64: 64, 384>}, {pipeline_mode = #tpu.pipeline_mode<synchronous>, transform_indices = @transform_11, window_bounds = array<i64: 64, 256>}, {pipeline_mode = #tpu.pipeline_mode<synchronous>, transform_indices = @transform_12, window_bounds = array<i64: 64, 128>}, {pipeline_mode = #tpu.pipeline_mode<synchronous>, transform_indices = @transform_13, window_bounds = array<i64: 64, 128>}]} {
    %c0 = arith.constant 0 : index
    %c0_0 = arith.constant 0 : index
    %0 = vector.load %arg2[%c0, %c0_0] : memref<8x268xf32, #tpu.memory_space<vmem>>, vector<8x268xf32>
    %1 = arith.truncf %0 : vector<8x268xf32> to vector<8x268xbf16>
    %c0_1 = arith.constant 0 : index
    %c0_2 = arith.constant 0 : index
    %2 = vector.load %arg3[%c0_1, %c0_2] : memref<268x256xbf16, #tpu.memory_space<vmem>>, vector<268x256xbf16>
    %cst = arith.constant dense<0.000000e+00> : vector<8x256xf32>
    %3 = tpu.matmul %1, %2, %cst {dimension_numbers = #tpu.dot_dimension_numbers<[1], [0], [0], [1], [0, 0, 1, 1], [], []>} : vector<8x268xbf16>, vector<268x256xbf16>, vector<8x256xf32> -> vector<8x256xf32>
    %c0_3 = arith.constant 0 : index
    %c0_4 = arith.constant 0 : index
    %4 = vector.load %arg4[%c0_3, %c0_4] : memref<1x256xf32, #tpu.memory_space<vmem>>, vector<1x256xf32>
    %5 = vector.broadcast %4 : vector<1x256xf32> to vector<8x256xf32>
    %6 = arith.addf %3, %5 : vector<8x256xf32>
    %7 = vector.extract_strided_slice %6 {offsets = [0, 0], sizes = [8, 128], strides = [1, 1]} : vector<8x256xf32> to vector<8x128xf32>
    %8 = vector.extract_strided_slice %6 {offsets = [0, 128], sizes = [8, 128], strides = [1, 1]} : vector<8x256xf32> to vector<8x128xf32>
    %c0_5 = arith.constant 0 : index
    %c0_6 = arith.constant 0 : index
    %9 = vector.load %arg1[%c0_5, %c0_6] : memref<64x3xf32, #tpu.memory_space<vmem>>, vector<64x3xf32>
    %c0_7 = arith.constant 0 : index
    %c0_8 = arith.constant 0 : index
    %10 = vector.load %arg5[%c0_7, %c0_8] : memref<3x512xf32, #tpu.memory_space<vmem>>, vector<3x512xf32>
    %c0_9 = arith.constant 0 : index
    %c0_10 = arith.constant 0 : index
    %11 = vector.load %arg7[%c0_9, %c0_10] : memref<1x512xf32, #tpu.memory_space<vmem>>, vector<1x512xf32>
    %12 = vector.extract_strided_slice %9 {offsets = [0, 0], sizes = [64, 1], strides = [1, 1]} : vector<64x3xf32> to vector<64x1xf32>
    %13 = vector.extract_strided_slice %10 {offsets = [0, 0], sizes = [1, 512], strides = [1, 1]} : vector<3x512xf32> to vector<1x512xf32>
    %14 = vector.broadcast %12 : vector<64x1xf32> to vector<64x512xf32>
    %15 = vector.broadcast %13 : vector<1x512xf32> to vector<64x512xf32>
    %16 = arith.mulf %14, %15 : vector<64x512xf32>
    %17 = vector.broadcast %11 : vector<1x512xf32> to vector<64x512xf32>
    %18 = arith.addf %17, %16 : vector<64x512xf32>
    %19 = vector.extract_strided_slice %9 {offsets = [0, 1], sizes = [64, 1], strides = [1, 1]} : vector<64x3xf32> to vector<64x1xf32>
    %20 = vector.extract_strided_slice %10 {offsets = [1, 0], sizes = [1, 512], strides = [1, 1]} : vector<3x512xf32> to vector<1x512xf32>
    %21 = vector.broadcast %19 : vector<64x1xf32> to vector<64x512xf32>
    %22 = vector.broadcast %20 : vector<1x512xf32> to vector<64x512xf32>
    %23 = arith.mulf %21, %22 : vector<64x512xf32>
    %24 = arith.addf %18, %23 : vector<64x512xf32>
    %25 = vector.extract_strided_slice %9 {offsets = [0, 2], sizes = [64, 1], strides = [1, 1]} : vector<64x3xf32> to vector<64x1xf32>
    %26 = vector.extract_strided_slice %10 {offsets = [2, 0], sizes = [1, 512], strides = [1, 1]} : vector<3x512xf32> to vector<1x512xf32>
    %27 = vector.broadcast %25 : vector<64x1xf32> to vector<64x512xf32>
    %28 = vector.broadcast %26 : vector<1x512xf32> to vector<64x512xf32>
    %29 = arith.mulf %27, %28 : vector<64x512xf32>
    %30 = arith.addf %24, %29 : vector<64x512xf32>
    %c0_11 = arith.constant 0 : index
    %c0_12 = arith.constant 0 : index
    %31 = vector.load %arg6[%c0_11, %c0_12] : memref<128x512xbf16, #tpu.memory_space<vmem>>, vector<128x512xbf16>
    %32 = vector.extract_strided_slice %30 {offsets = [0, 0], sizes = [8, 512], strides = [1, 1]} : vector<64x512xf32> to vector<8x512xf32>
    %33 = arith.truncf %7 : vector<8x128xf32> to vector<8x128xbf16>
    %cst_13 = arith.constant dense<0.000000e+00> : vector<8x512xf32>
    %34 = tpu.matmul %33, %31, %cst_13 {dimension_numbers = #tpu.dot_dimension_numbers<[1], [0], [0], [1], [0, 0, 1, 1], [], []>} : vector<8x128xbf16>, vector<128x512xbf16>, vector<8x512xf32> -> vector<8x512xf32>
    %35 = arith.addf %32, %34 : vector<8x512xf32>
    %36 = vector.extract_strided_slice %35 {offsets = [0, 0], sizes = [8, 128], strides = [1, 1]} : vector<8x512xf32> to vector<8x128xf32>
    %37 = vector.extract_strided_slice %35 {offsets = [0, 128], sizes = [8, 128], strides = [1, 1]} : vector<8x512xf32> to vector<8x128xf32>
    %38 = vector.extract_strided_slice %35 {offsets = [0, 256], sizes = [8, 128], strides = [1, 1]} : vector<8x512xf32> to vector<8x128xf32>
    %39 = vector.extract_strided_slice %35 {offsets = [0, 384], sizes = [8, 128], strides = [1, 1]} : vector<8x512xf32> to vector<8x128xf32>
    %40 = arith.negf %38 : vector<8x128xf32>
    %41 = math.exp %40 : vector<8x128xf32>
    %cst_14 = arith.constant 1.000000e+00 : f32
    %42 = vector.broadcast %cst_14 : f32 to vector<8x128xf32>
    %43 = arith.addf %42, %41 : vector<8x128xf32>
    %44 = arith.divf %42, %43 : vector<8x128xf32>
    %45 = arith.mulf %8, %44 : vector<8x128xf32>
    %46 = arith.negf %36 : vector<8x128xf32>
    %47 = math.exp %46 : vector<8x128xf32>
    %cst_15 = arith.constant 1.000000e+00 : f32
    %48 = vector.broadcast %cst_15 : f32 to vector<8x128xf32>
    %49 = arith.addf %48, %47 : vector<8x128xf32>
    %50 = arith.divf %48, %49 : vector<8x128xf32>
    %51 = math.tanh %37 : vector<8x128xf32>
    %52 = arith.mulf %50, %51 : vector<8x128xf32>
    %53 = arith.addf %45, %52 : vector<8x128xf32>
    %54 = math.tanh %53 : vector<8x128xf32>
    %55 = arith.negf %39 : vector<8x128xf32>
    %56 = math.exp %55 : vector<8x128xf32>
    %cst_16 = arith.constant 1.000000e+00 : f32
    %57 = vector.broadcast %cst_16 : f32 to vector<8x128xf32>
    %58 = arith.addf %57, %56 : vector<8x128xf32>
    %59 = arith.divf %57, %58 : vector<8x128xf32>
    %60 = arith.mulf %54, %59 : vector<8x128xf32>
    %c0_17 = arith.constant 0 : index
    %c0_18 = arith.constant 0 : index
    %61 = vector.load %arg13[%c0_17, %c0_18] : memref<64x128xf32, #tpu.memory_space<vmem>>, vector<8x128xf32>
    tpu.vector_store %arg13[%c0_17, %c0_18], %60 {strides = array<i32>} : memref<64x128xf32, #tpu.memory_space<vmem>>, vector<8x128xf32>,
    %c0_19 = arith.constant 0 : index
    %c0_20 = arith.constant 0 : index
    %62 = vector.load %arg14[%c0_19, %c0_20] : memref<64x128xf32, #tpu.memory_space<vmem>>, vector<8x128xf32>
    tpu.vector_store %arg14[%c0_19, %c0_20], %53 {strides = array<i32>} : memref<64x128xf32, #tpu.memory_space<vmem>>, vector<8x128xf32>,
    %63 = vector.extract_strided_slice %30 {offsets = [8, 0], sizes = [8, 512], strides = [1, 1]} : vector<64x512xf32> to vector<8x512xf32>
    %64 = arith.truncf %60 : vector<8x128xf32> to vector<8x128xbf16>
    %cst_21 = arith.constant dense<0.000000e+00> : vector<8x512xf32>
    %65 = tpu.matmul %64, %31, %cst_21 {dimension_numbers = #tpu.dot_dimension_numbers<[1], [0], [0], [1], [0, 0, 1, 1], [], []>} : vector<8x128xbf16>, vector<128x512xbf16>, vector<8x512xf32> -> vector<8x512xf32>
    %66 = arith.addf %63, %65 : vector<8x512xf32>
    %67 = vector.extract_strided_slice %66 {offsets = [0, 0], sizes = [8, 128], strides = [1, 1]} : vector<8x512xf32> to vector<8x128xf32>
    %68 = vector.extract_strided_slice %66 {offsets = [0, 128], sizes = [8, 128], strides = [1, 1]} : vector<8x512xf32> to vector<8x128xf32>
    %69 = vector.extract_strided_slice %66 {offsets = [0, 256], sizes = [8, 128], strides = [1, 1]} : vector<8x512xf32> to vector<8x128xf32>
    %70 = vector.extract_strided_slice %66 {offsets = [0, 384], sizes = [8, 128], strides = [1, 1]} : vector<8x512xf32> to vector<8x128xf32>
    %71 = arith.negf %69 : vector<8x128xf32>
    %72 = math.exp %71 : vector<8x128xf32>
    %cst_22 = arith.constant 1.000000e+00 : f32
    %73 = vector.broadcast %cst_22 : f32 to vector<8x128xf32>
    %74 = arith.addf %73, %72 : vector<8x128xf32>
    %75 = arith.divf %73, %74 : vector<8x128xf32>
    %76 = arith.mulf %53, %75 : vector<8x128xf32>
    %77 = arith.negf %67 : vector<8x128xf32>
    %78 = math.exp %77 : vector<8x128xf32>
    %cst_23 = arith.constant 1.000000e+00 : f32
    %79 = vector.broadcast %cst_23 : f32 to vector<8x128xf32>
    %80 = arith.addf %79, %78 : vector<8x128xf32>
    %81 = arith.divf %79, %80 : vector<8x128xf32>
    %82 = math.tanh %68 : vector<8x128xf32>
    %83 = arith.mulf %81, %82 : vector<8x128xf32>
    %84 = arith.addf %76, %83 : vector<8x128xf32>
    %85 = math.tanh %84 : vector<8x128xf32>
    %86 = arith.negf %70 : vector<8x128xf32>
    %87 = math.exp %86 : vector<8x128xf32>
    %cst_24 = arith.constant 1.000000e+00 : f32
    %88 = vector.broadcast %cst_24 : f32 to vector<8x128xf32>
    %89 = arith.addf %88, %87 : vector<8x128xf32>
    %90 = arith.divf %88, %89 : vector<8x128xf32>
    %91 = arith.mulf %85, %90 : vector<8x128xf32>
    %c8 = arith.constant 8 : index
    %c0_25 = arith.constant 0 : index
    %92 = vector.load %arg13[%c8, %c0_25] : memref<64x128xf32, #tpu.memory_space<vmem>>, vector<8x128xf32>
    tpu.vector_store %arg13[%c8, %c0_25], %91 {strides = array<i32>} : memref<64x128xf32, #tpu.memory_space<vmem>>, vector<8x128xf32>,
    %c8_26 = arith.constant 8 : index
    %c0_27 = arith.constant 0 : index
    %93 = vector.load %arg14[%c8_26, %c0_27] : memref<64x128xf32, #tpu.memory_space<vmem>>, vector<8x128xf32>
    tpu.vector_store %arg14[%c8_26, %c0_27], %84 {strides = array<i32>} : memref<64x128xf32, #tpu.memory_space<vmem>>, vector<8x128xf32>,
    %94 = vector.extract_strided_slice %30 {offsets = [16, 0], sizes = [8, 512], strides = [1, 1]} : vector<64x512xf32> to vector<8x512xf32>
    %95 = arith.truncf %91 : vector<8x128xf32> to vector<8x128xbf16>
    %cst_28 = arith.constant dense<0.000000e+00> : vector<8x512xf32>
    %96 = tpu.matmul %95, %31, %cst_28 {dimension_numbers = #tpu.dot_dimension_numbers<[1], [0], [0], [1], [0, 0, 1, 1], [], []>} : vector<8x128xbf16>, vector<128x512xbf16>, vector<8x512xf32> -> vector<8x512xf32>
    %97 = arith.addf %94, %96 : vector<8x512xf32>
    %98 = vector.extract_strided_slice %97 {offsets = [0, 0], sizes = [8, 128], strides = [1, 1]} : vector<8x512xf32> to vector<8x128xf32>
    %99 = vector.extract_strided_slice %97 {offsets = [0, 128], sizes = [8, 128], strides = [1, 1]} : vector<8x512xf32> to vector<8x128xf32>
    %100 = vector.extract_strided_slice %97 {offsets = [0, 256], sizes = [8, 128], strides = [1, 1]} : vector<8x512xf32> to vector<8x128xf32>
    %101 = vector.extract_strided_slice %97 {offsets = [0, 384], sizes = [8, 128], strides = [1, 1]} : vector<8x512xf32> to vector<8x128xf32>
    %102 = arith.negf %100 : vector<8x128xf32>
    %103 = math.exp %102 : vector<8x128xf32>
    %cst_29 = arith.constant 1.000000e+00 : f32
    %104 = vector.broadcast %cst_29 : f32 to vector<8x128xf32>
    %105 = arith.addf %104, %103 : vector<8x128xf32>
    %106 = arith.divf %104, %105 : vector<8x128xf32>
    %107 = arith.mulf %84, %106 : vector<8x128xf32>
    %108 = arith.negf %98 : vector<8x128xf32>
    %109 = math.exp %108 : vector<8x128xf32>
    %cst_30 = arith.constant 1.000000e+00 : f32
    %110 = vector.broadcast %cst_30 : f32 to vector<8x128xf32>
    %111 = arith.addf %110, %109 : vector<8x128xf32>
    %112 = arith.divf %110, %111 : vector<8x128xf32>
    %113 = math.tanh %99 : vector<8x128xf32>
    %114 = arith.mulf %112, %113 : vector<8x128xf32>
    %115 = arith.addf %107, %114 : vector<8x128xf32>
    %116 = math.tanh %115 : vector<8x128xf32>
    %117 = arith.negf %101 : vector<8x128xf32>
    %118 = math.exp %117 : vector<8x128xf32>
    %cst_31 = arith.constant 1.000000e+00 : f32
    %119 = vector.broadcast %cst_31 : f32 to vector<8x128xf32>
    %120 = arith.addf %119, %118 : vector<8x128xf32>
    %121 = arith.divf %119, %120 : vector<8x128xf32>
    %122 = arith.mulf %116, %121 : vector<8x128xf32>
    %c16 = arith.constant 16 : index
    %c0_32 = arith.constant 0 : index
    %123 = vector.load %arg13[%c16, %c0_32] : memref<64x128xf32, #tpu.memory_space<vmem>>, vector<8x128xf32>
    tpu.vector_store %arg13[%c16, %c0_32], %122 {strides = array<i32>} : memref<64x128xf32, #tpu.memory_space<vmem>>, vector<8x128xf32>,
    %c16_33 = arith.constant 16 : index
    %c0_34 = arith.constant 0 : index
    %124 = vector.load %arg14[%c16_33, %c0_34] : memref<64x128xf32, #tpu.memory_space<vmem>>, vector<8x128xf32>
    tpu.vector_store %arg14[%c16_33, %c0_34], %115 {strides = array<i32>} : memref<64x128xf32, #tpu.memory_space<vmem>>, vector<8x128xf32>,
    %125 = vector.extract_strided_slice %30 {offsets = [24, 0], sizes = [8, 512], strides = [1, 1]} : vector<64x512xf32> to vector<8x512xf32>
    %126 = arith.truncf %122 : vector<8x128xf32> to vector<8x128xbf16>
    %cst_35 = arith.constant dense<0.000000e+00> : vector<8x512xf32>
    %127 = tpu.matmul %126, %31, %cst_35 {dimension_numbers = #tpu.dot_dimension_numbers<[1], [0], [0], [1], [0, 0, 1, 1], [], []>} : vector<8x128xbf16>, vector<128x512xbf16>, vector<8x512xf32> -> vector<8x512xf32>
    %128 = arith.addf %125, %127 : vector<8x512xf32>
    %129 = vector.extract_strided_slice %128 {offsets = [0, 0], sizes = [8, 128], strides = [1, 1]} : vector<8x512xf32> to vector<8x128xf32>
    %130 = vector.extract_strided_slice %128 {offsets = [0, 128], sizes = [8, 128], strides = [1, 1]} : vector<8x512xf32> to vector<8x128xf32>
    %131 = vector.extract_strided_slice %128 {offsets = [0, 256], sizes = [8, 128], strides = [1, 1]} : vector<8x512xf32> to vector<8x128xf32>
    %132 = vector.extract_strided_slice %128 {offsets = [0, 384], sizes = [8, 128], strides = [1, 1]} : vector<8x512xf32> to vector<8x128xf32>
    %133 = arith.negf %131 : vector<8x128xf32>
    %134 = math.exp %133 : vector<8x128xf32>
    %cst_36 = arith.constant 1.000000e+00 : f32
    %135 = vector.broadcast %cst_36 : f32 to vector<8x128xf32>
    %136 = arith.addf %135, %134 : vector<8x128xf32>
    %137 = arith.divf %135, %136 : vector<8x128xf32>
    %138 = arith.mulf %115, %137 : vector<8x128xf32>
    %139 = arith.negf %129 : vector<8x128xf32>
    %140 = math.exp %139 : vector<8x128xf32>
    %cst_37 = arith.constant 1.000000e+00 : f32
    %141 = vector.broadcast %cst_37 : f32 to vector<8x128xf32>
    %142 = arith.addf %141, %140 : vector<8x128xf32>
    %143 = arith.divf %141, %142 : vector<8x128xf32>
    %144 = math.tanh %130 : vector<8x128xf32>
    %145 = arith.mulf %143, %144 : vector<8x128xf32>
    %146 = arith.addf %138, %145 : vector<8x128xf32>
    %147 = math.tanh %146 : vector<8x128xf32>
    %148 = arith.negf %132 : vector<8x128xf32>
    %149 = math.exp %148 : vector<8x128xf32>
    %cst_38 = arith.constant 1.000000e+00 : f32
    %150 = vector.broadcast %cst_38 : f32 to vector<8x128xf32>
    %151 = arith.addf %150, %149 : vector<8x128xf32>
    %152 = arith.divf %150, %151 : vector<8x128xf32>
    %153 = arith.mulf %147, %152 : vector<8x128xf32>
    %c24 = arith.constant 24 : index
    %c0_39 = arith.constant 0 : index
    %154 = vector.load %arg13[%c24, %c0_39] : memref<64x128xf32, #tpu.memory_space<vmem>>, vector<8x128xf32>
    tpu.vector_store %arg13[%c24, %c0_39], %153 {strides = array<i32>} : memref<64x128xf32, #tpu.memory_space<vmem>>, vector<8x128xf32>,
    %c24_40 = arith.constant 24 : index
    %c0_41 = arith.constant 0 : index
    %155 = vector.load %arg14[%c24_40, %c0_41] : memref<64x128xf32, #tpu.memory_space<vmem>>, vector<8x128xf32>
    tpu.vector_store %arg14[%c24_40, %c0_41], %146 {strides = array<i32>} : memref<64x128xf32, #tpu.memory_space<vmem>>, vector<8x128xf32>,
    %156 = vector.extract_strided_slice %30 {offsets = [32, 0], sizes = [8, 512], strides = [1, 1]} : vector<64x512xf32> to vector<8x512xf32>
    %157 = arith.truncf %153 : vector<8x128xf32> to vector<8x128xbf16>
    %cst_42 = arith.constant dense<0.000000e+00> : vector<8x512xf32>
    %158 = tpu.matmul %157, %31, %cst_42 {dimension_numbers = #tpu.dot_dimension_numbers<[1], [0], [0], [1], [0, 0, 1, 1], [], []>} : vector<8x128xbf16>, vector<128x512xbf16>, vector<8x512xf32> -> vector<8x512xf32>
    %159 = arith.addf %156, %158 : vector<8x512xf32>
    %160 = vector.extract_strided_slice %159 {offsets = [0, 0], sizes = [8, 128], strides = [1, 1]} : vector<8x512xf32> to vector<8x128xf32>
    %161 = vector.extract_strided_slice %159 {offsets = [0, 128], sizes = [8, 128], strides = [1, 1]} : vector<8x512xf32> to vector<8x128xf32>
    %162 = vector.extract_strided_slice %159 {offsets = [0, 256], sizes = [8, 128], strides = [1, 1]} : vector<8x512xf32> to vector<8x128xf32>
    %163 = vector.extract_strided_slice %159 {offsets = [0, 384], sizes = [8, 128], strides = [1, 1]} : vector<8x512xf32> to vector<8x128xf32>
    %164 = arith.negf %162 : vector<8x128xf32>
    %165 = math.exp %164 : vector<8x128xf32>
    %cst_43 = arith.constant 1.000000e+00 : f32
    %166 = vector.broadcast %cst_43 : f32 to vector<8x128xf32>
    %167 = arith.addf %166, %165 : vector<8x128xf32>
    %168 = arith.divf %166, %167 : vector<8x128xf32>
    %169 = arith.mulf %146, %168 : vector<8x128xf32>
    %170 = arith.negf %160 : vector<8x128xf32>
    %171 = math.exp %170 : vector<8x128xf32>
    %cst_44 = arith.constant 1.000000e+00 : f32
    %172 = vector.broadcast %cst_44 : f32 to vector<8x128xf32>
    %173 = arith.addf %172, %171 : vector<8x128xf32>
    %174 = arith.divf %172, %173 : vector<8x128xf32>
    %175 = math.tanh %161 : vector<8x128xf32>
    %176 = arith.mulf %174, %175 : vector<8x128xf32>
    %177 = arith.addf %169, %176 : vector<8x128xf32>
    %178 = math.tanh %177 : vector<8x128xf32>
    %179 = arith.negf %163 : vector<8x128xf32>
    %180 = math.exp %179 : vector<8x128xf32>
    %cst_45 = arith.constant 1.000000e+00 : f32
    %181 = vector.broadcast %cst_45 : f32 to vector<8x128xf32>
    %182 = arith.addf %181, %180 : vector<8x128xf32>
    %183 = arith.divf %181, %182 : vector<8x128xf32>
    %184 = arith.mulf %178, %183 : vector<8x128xf32>
    %c32 = arith.constant 32 : index
    %c0_46 = arith.constant 0 : index
    %185 = vector.load %arg13[%c32, %c0_46] : memref<64x128xf32, #tpu.memory_space<vmem>>, vector<8x128xf32>
    tpu.vector_store %arg13[%c32, %c0_46], %184 {strides = array<i32>} : memref<64x128xf32, #tpu.memory_space<vmem>>, vector<8x128xf32>,
    %c32_47 = arith.constant 32 : index
    %c0_48 = arith.constant 0 : index
    %186 = vector.load %arg14[%c32_47, %c0_48] : memref<64x128xf32, #tpu.memory_space<vmem>>, vector<8x128xf32>
    tpu.vector_store %arg14[%c32_47, %c0_48], %177 {strides = array<i32>} : memref<64x128xf32, #tpu.memory_space<vmem>>, vector<8x128xf32>,
    %187 = vector.extract_strided_slice %30 {offsets = [40, 0], sizes = [8, 512], strides = [1, 1]} : vector<64x512xf32> to vector<8x512xf32>
    %188 = arith.truncf %184 : vector<8x128xf32> to vector<8x128xbf16>
    %cst_49 = arith.constant dense<0.000000e+00> : vector<8x512xf32>
    %189 = tpu.matmul %188, %31, %cst_49 {dimension_numbers = #tpu.dot_dimension_numbers<[1], [0], [0], [1], [0, 0, 1, 1], [], []>} : vector<8x128xbf16>, vector<128x512xbf16>, vector<8x512xf32> -> vector<8x512xf32>
    %190 = arith.addf %187, %189 : vector<8x512xf32>
    %191 = vector.extract_strided_slice %190 {offsets = [0, 0], sizes = [8, 128], strides = [1, 1]} : vector<8x512xf32> to vector<8x128xf32>
    %192 = vector.extract_strided_slice %190 {offsets = [0, 128], sizes = [8, 128], strides = [1, 1]} : vector<8x512xf32> to vector<8x128xf32>
    %193 = vector.extract_strided_slice %190 {offsets = [0, 256], sizes = [8, 128], strides = [1, 1]} : vector<8x512xf32> to vector<8x128xf32>
    %194 = vector.extract_strided_slice %190 {offsets = [0, 384], sizes = [8, 128], strides = [1, 1]} : vector<8x512xf32> to vector<8x128xf32>
    %195 = arith.negf %193 : vector<8x128xf32>
    %196 = math.exp %195 : vector<8x128xf32>
    %cst_50 = arith.constant 1.000000e+00 : f32
    %197 = vector.broadcast %cst_50 : f32 to vector<8x128xf32>
    %198 = arith.addf %197, %196 : vector<8x128xf32>
    %199 = arith.divf %197, %198 : vector<8x128xf32>
    %200 = arith.mulf %177, %199 : vector<8x128xf32>
    %201 = arith.negf %191 : vector<8x128xf32>
    %202 = math.exp %201 : vector<8x128xf32>
    %cst_51 = arith.constant 1.000000e+00 : f32
    %203 = vector.broadcast %cst_51 : f32 to vector<8x128xf32>
    %204 = arith.addf %203, %202 : vector<8x128xf32>
    %205 = arith.divf %203, %204 : vector<8x128xf32>
    %206 = math.tanh %192 : vector<8x128xf32>
    %207 = arith.mulf %205, %206 : vector<8x128xf32>
    %208 = arith.addf %200, %207 : vector<8x128xf32>
    %209 = math.tanh %208 : vector<8x128xf32>
    %210 = arith.negf %194 : vector<8x128xf32>
    %211 = math.exp %210 : vector<8x128xf32>
    %cst_52 = arith.constant 1.000000e+00 : f32
    %212 = vector.broadcast %cst_52 : f32 to vector<8x128xf32>
    %213 = arith.addf %212, %211 : vector<8x128xf32>
    %214 = arith.divf %212, %213 : vector<8x128xf32>
    %215 = arith.mulf %209, %214 : vector<8x128xf32>
    %c40 = arith.constant 40 : index
    %c0_53 = arith.constant 0 : index
    %216 = vector.load %arg13[%c40, %c0_53] : memref<64x128xf32, #tpu.memory_space<vmem>>, vector<8x128xf32>
    tpu.vector_store %arg13[%c40, %c0_53], %215 {strides = array<i32>} : memref<64x128xf32, #tpu.memory_space<vmem>>, vector<8x128xf32>,
    %c40_54 = arith.constant 40 : index
    %c0_55 = arith.constant 0 : index
    %217 = vector.load %arg14[%c40_54, %c0_55] : memref<64x128xf32, #tpu.memory_space<vmem>>, vector<8x128xf32>
    tpu.vector_store %arg14[%c40_54, %c0_55], %208 {strides = array<i32>} : memref<64x128xf32, #tpu.memory_space<vmem>>, vector<8x128xf32>,
    %218 = vector.extract_strided_slice %30 {offsets = [48, 0], sizes = [8, 512], strides = [1, 1]} : vector<64x512xf32> to vector<8x512xf32>
    %219 = arith.truncf %215 : vector<8x128xf32> to vector<8x128xbf16>
    %cst_56 = arith.constant dense<0.000000e+00> : vector<8x512xf32>
    %220 = tpu.matmul %219, %31, %cst_56 {dimension_numbers = #tpu.dot_dimension_numbers<[1], [0], [0], [1], [0, 0, 1, 1], [], []>} : vector<8x128xbf16>, vector<128x512xbf16>, vector<8x512xf32> -> vector<8x512xf32>
    %221 = arith.addf %218, %220 : vector<8x512xf32>
    %222 = vector.extract_strided_slice %221 {offsets = [0, 0], sizes = [8, 128], strides = [1, 1]} : vector<8x512xf32> to vector<8x128xf32>
    %223 = vector.extract_strided_slice %221 {offsets = [0, 128], sizes = [8, 128], strides = [1, 1]} : vector<8x512xf32> to vector<8x128xf32>
    %224 = vector.extract_strided_slice %221 {offsets = [0, 256], sizes = [8, 128], strides = [1, 1]} : vector<8x512xf32> to vector<8x128xf32>
    %225 = vector.extract_strided_slice %221 {offsets = [0, 384], sizes = [8, 128], strides = [1, 1]} : vector<8x512xf32> to vector<8x128xf32>
    %226 = arith.negf %224 : vector<8x128xf32>
    %227 = math.exp %226 : vector<8x128xf32>
    %cst_57 = arith.constant 1.000000e+00 : f32
    %228 = vector.broadcast %cst_57 : f32 to vector<8x128xf32>
    %229 = arith.addf %228, %227 : vector<8x128xf32>
    %230 = arith.divf %228, %229 : vector<8x128xf32>
    %231 = arith.mulf %208, %230 : vector<8x128xf32>
    %232 = arith.negf %222 : vector<8x128xf32>
    %233 = math.exp %232 : vector<8x128xf32>
    %cst_58 = arith.constant 1.000000e+00 : f32
    %234 = vector.broadcast %cst_58 : f32 to vector<8x128xf32>
    %235 = arith.addf %234, %233 : vector<8x128xf32>
    %236 = arith.divf %234, %235 : vector<8x128xf32>
    %237 = math.tanh %223 : vector<8x128xf32>
    %238 = arith.mulf %236, %237 : vector<8x128xf32>
    %239 = arith.addf %231, %238 : vector<8x128xf32>
    %240 = math.tanh %239 : vector<8x128xf32>
    %241 = arith.negf %225 : vector<8x128xf32>
    %242 = math.exp %241 : vector<8x128xf32>
    %cst_59 = arith.constant 1.000000e+00 : f32
    %243 = vector.broadcast %cst_59 : f32 to vector<8x128xf32>
    %244 = arith.addf %243, %242 : vector<8x128xf32>
    %245 = arith.divf %243, %244 : vector<8x128xf32>
    %246 = arith.mulf %240, %245 : vector<8x128xf32>
    %c48 = arith.constant 48 : index
    %c0_60 = arith.constant 0 : index
    %247 = vector.load %arg13[%c48, %c0_60] : memref<64x128xf32, #tpu.memory_space<vmem>>, vector<8x128xf32>
    tpu.vector_store %arg13[%c48, %c0_60], %246 {strides = array<i32>} : memref<64x128xf32, #tpu.memory_space<vmem>>, vector<8x128xf32>,
    %c48_61 = arith.constant 48 : index
    %c0_62 = arith.constant 0 : index
    %248 = vector.load %arg14[%c48_61, %c0_62] : memref<64x128xf32, #tpu.memory_space<vmem>>, vector<8x128xf32>
    tpu.vector_store %arg14[%c48_61, %c0_62], %239 {strides = array<i32>} : memref<64x128xf32, #tpu.memory_space<vmem>>, vector<8x128xf32>,
    %249 = vector.extract_strided_slice %30 {offsets = [56, 0], sizes = [8, 512], strides = [1, 1]} : vector<64x512xf32> to vector<8x512xf32>
    %250 = arith.truncf %246 : vector<8x128xf32> to vector<8x128xbf16>
    %cst_63 = arith.constant dense<0.000000e+00> : vector<8x512xf32>
    %251 = tpu.matmul %250, %31, %cst_63 {dimension_numbers = #tpu.dot_dimension_numbers<[1], [0], [0], [1], [0, 0, 1, 1], [], []>} : vector<8x128xbf16>, vector<128x512xbf16>, vector<8x512xf32> -> vector<8x512xf32>
    %252 = arith.addf %249, %251 : vector<8x512xf32>
    %253 = vector.extract_strided_slice %252 {offsets = [0, 0], sizes = [8, 128], strides = [1, 1]} : vector<8x512xf32> to vector<8x128xf32>
    %254 = vector.extract_strided_slice %252 {offsets = [0, 128], sizes = [8, 128], strides = [1, 1]} : vector<8x512xf32> to vector<8x128xf32>
    %255 = vector.extract_strided_slice %252 {offsets = [0, 256], sizes = [8, 128], strides = [1, 1]} : vector<8x512xf32> to vector<8x128xf32>
    %256 = vector.extract_strided_slice %252 {offsets = [0, 384], sizes = [8, 128], strides = [1, 1]} : vector<8x512xf32> to vector<8x128xf32>
    %257 = arith.negf %255 : vector<8x128xf32>
    %258 = math.exp %257 : vector<8x128xf32>
    %cst_64 = arith.constant 1.000000e+00 : f32
    %259 = vector.broadcast %cst_64 : f32 to vector<8x128xf32>
    %260 = arith.addf %259, %258 : vector<8x128xf32>
    %261 = arith.divf %259, %260 : vector<8x128xf32>
    %262 = arith.mulf %239, %261 : vector<8x128xf32>
    %263 = arith.negf %253 : vector<8x128xf32>
    %264 = math.exp %263 : vector<8x128xf32>
    %cst_65 = arith.constant 1.000000e+00 : f32
    %265 = vector.broadcast %cst_65 : f32 to vector<8x128xf32>
    %266 = arith.addf %265, %264 : vector<8x128xf32>
    %267 = arith.divf %265, %266 : vector<8x128xf32>
    %268 = math.tanh %254 : vector<8x128xf32>
    %269 = arith.mulf %267, %268 : vector<8x128xf32>
    %270 = arith.addf %262, %269 : vector<8x128xf32>
    %271 = math.tanh %270 : vector<8x128xf32>
    %272 = arith.negf %256 : vector<8x128xf32>
    %273 = math.exp %272 : vector<8x128xf32>
    %cst_66 = arith.constant 1.000000e+00 : f32
    %274 = vector.broadcast %cst_66 : f32 to vector<8x128xf32>
    %275 = arith.addf %274, %273 : vector<8x128xf32>
    %276 = arith.divf %274, %275 : vector<8x128xf32>
    %277 = arith.mulf %271, %276 : vector<8x128xf32>
    %c56 = arith.constant 56 : index
    %c0_67 = arith.constant 0 : index
    %278 = vector.load %arg13[%c56, %c0_67] : memref<64x128xf32, #tpu.memory_space<vmem>>, vector<8x128xf32>
    tpu.vector_store %arg13[%c56, %c0_67], %277 {strides = array<i32>} : memref<64x128xf32, #tpu.memory_space<vmem>>, vector<8x128xf32>,
    %c56_68 = arith.constant 56 : index
    %c0_69 = arith.constant 0 : index
    %279 = vector.load %arg14[%c56_68, %c0_69] : memref<64x128xf32, #tpu.memory_space<vmem>>, vector<8x128xf32>
    tpu.vector_store %arg14[%c56_68, %c0_69], %270 {strides = array<i32>} : memref<64x128xf32, #tpu.memory_space<vmem>>, vector<8x128xf32>,
    %c0_70 = arith.constant 0 : index
    %c0_71 = arith.constant 0 : index
    %280 = vector.load %arg13[%c0_70, %c0_71] : memref<64x128xf32, #tpu.memory_space<vmem>>, vector<64x128xf32>
    %281 = arith.truncf %280 : vector<64x128xf32> to vector<64x128xbf16>
    %c0_72 = arith.constant 0 : index
    %c0_73 = arith.constant 0 : index
    %282 = vector.load %arg8[%c0_72, %c0_73] : memref<128x256xbf16, #tpu.memory_space<vmem>>, vector<128x256xbf16>
    %cst_74 = arith.constant dense<0.000000e+00> : vector<64x256xf32>
    %283 = tpu.matmul %281, %282, %cst_74 {dimension_numbers = #tpu.dot_dimension_numbers<[1], [0], [0], [1], [0, 0, 1, 1], [], []>} : vector<64x128xbf16>, vector<128x256xbf16>, vector<64x256xf32> -> vector<64x256xf32>
    %c0_75 = arith.constant 0 : index
    %c0_76 = arith.constant 0 : index
    %284 = vector.load %arg12[%c0_75, %c0_76] : memref<64x256xf32, #tpu.memory_space<vmem>>, vector<64x256xf32>
    tpu.vector_store %arg12[%c0_75, %c0_76], %283 {strides = array<i32>} : memref<64x256xf32, #tpu.memory_space<vmem>>, vector<64x256xf32>,
    %285 = arith.truncf %283 : vector<64x256xf32> to vector<64x256xbf16>
    %c0_77 = arith.constant 0 : index
    %c0_78 = arith.constant 0 : index
    %286 = vector.load %arg9[%c0_77, %c0_78] : memref<256x384xbf16, #tpu.memory_space<vmem>>, vector<256x384xbf16>
    %cst_79 = arith.constant dense<0.000000e+00> : vector<64x384xf32>
    %287 = tpu.matmul %285, %286, %cst_79 {dimension_numbers = #tpu.dot_dimension_numbers<[1], [0], [0], [1], [0, 0, 1, 1], [], []>} : vector<64x256xbf16>, vector<256x384xbf16>, vector<64x384xf32> -> vector<64x384xf32>
    %c0_80 = arith.constant 0 : index
    %c0_81 = arith.constant 0 : index
    %288 = vector.load %arg10[%c0_80, %c0_81] : memref<1x384xf32, #tpu.memory_space<vmem>>, vector<1x384xf32>
    %289 = vector.broadcast %288 : vector<1x384xf32> to vector<64x384xf32>
    %290 = arith.addf %287, %289 : vector<64x384xf32>
    %c0_82 = arith.constant 0 : index
    %c0_83 = arith.constant 0 : index
    %291 = vector.load %arg11[%c0_82, %c0_83] : memref<64x384xf32, #tpu.memory_space<vmem>>, vector<64x384xf32>
    tpu.vector_store %arg11[%c0_82, %c0_83], %290 {strides = array<i32>} : memref<64x384xf32, #tpu.memory_space<vmem>>, vector<64x384xf32>,
    return
  }
  func.func @transform_0(%arg0: i32) -> (i32, i32) {
    %c0_i32 = arith.constant 0 : i32
    %c0_i32_0 = arith.constant 0 : i32
    %c0_i32_1 = arith.constant 0 : i32
    return %c0_i32, %c0_i32_0 : i32, i32
  }
  func.func @transform_1(%arg0: i32) -> (i32, i32) {
    %c0_i32 = arith.constant 0 : i32
    %c0_i32_0 = arith.constant 0 : i32
    %c0_i32_1 = arith.constant 0 : i32
    return %c0_i32, %c0_i32_0 : i32, i32
  }
  func.func @transform_2(%arg0: i32) -> (i32, i32) {
    %c0_i32 = arith.constant 0 : i32
    %c0_i32_0 = arith.constant 0 : i32
    %c0_i32_1 = arith.constant 0 : i32
    return %c0_i32, %c0_i32_0 : i32, i32
  }
  func.func @transform_3(%arg0: i32) -> (i32, i32) {
    %c0_i32 = arith.constant 0 : i32
    %c0_i32_0 = arith.constant 0 : i32
    %c0_i32_1 = arith.constant 0 : i32
    return %c0_i32, %c0_i32_0 : i32, i32
  }
  func.func @transform_4(%arg0: i32) -> (i32, i32) {
    %c0_i32 = arith.constant 0 : i32
    %c0_i32_0 = arith.constant 0 : i32
    %c0_i32_1 = arith.constant 0 : i32
    return %c0_i32, %c0_i32_0 : i32, i32
  }
  func.func @transform_5(%arg0: i32) -> (i32, i32) {
    %c0_i32 = arith.constant 0 : i32
    %c0_i32_0 = arith.constant 0 : i32
    %c0_i32_1 = arith.constant 0 : i32
    return %c0_i32, %c0_i32_0 : i32, i32
  }
  func.func @transform_6(%arg0: i32) -> (i32, i32) {
    %c0_i32 = arith.constant 0 : i32
    %c0_i32_0 = arith.constant 0 : i32
    %c0_i32_1 = arith.constant 0 : i32
    return %c0_i32, %c0_i32_0 : i32, i32
  }
  func.func @transform_7(%arg0: i32) -> (i32, i32) {
    %c0_i32 = arith.constant 0 : i32
    %c0_i32_0 = arith.constant 0 : i32
    %c0_i32_1 = arith.constant 0 : i32
    return %c0_i32, %c0_i32_0 : i32, i32
  }
  func.func @transform_8(%arg0: i32) -> (i32, i32) {
    %c0_i32 = arith.constant 0 : i32
    %c0_i32_0 = arith.constant 0 : i32
    %c0_i32_1 = arith.constant 0 : i32
    return %c0_i32, %c0_i32_0 : i32, i32
  }
  func.func @transform_9(%arg0: i32) -> (i32, i32) {
    %c0_i32 = arith.constant 0 : i32
    %c0_i32_0 = arith.constant 0 : i32
    %c0_i32_1 = arith.constant 0 : i32
    return %c0_i32, %c0_i32_0 : i32, i32
  }
  func.func @transform_10(%arg0: i32) -> (i32, i32) {
    %c0_i32 = arith.constant 0 : i32
    %c0_i32_0 = arith.constant 0 : i32
    %c0_i32_1 = arith.constant 0 : i32
    return %c0_i32, %c0_i32_0 : i32, i32
  }
  func.func @transform_11(%arg0: i32) -> (i32, i32) {
    %c0_i32 = arith.constant 0 : i32
    %c0_i32_0 = arith.constant 0 : i32
    %c0_i32_1 = arith.constant 0 : i32
    return %c0_i32, %c0_i32_0 : i32, i32
  }
  func.func @transform_12(%arg0: i32) -> (i32, i32) {
    %c0_i32 = arith.constant 0 : i32
    %c0_i32_0 = arith.constant 0 : i32
    %c0_i32_1 = arith.constant 0 : i32
    return %c0_i32, %c0_i32_0 : i32, i32
  }
  func.func @transform_13(%arg0: i32) -> (i32, i32) {
    %c0_i32 = arith.constant 0 : i32
    %c0_i32_0 = arith.constant 0 : i32
    %c0_i32_1 = arith.constant 0 : i32
    return %c0_i32, %c0_i32_0 : i32, i32
  }
}

</mosaic_0001>

<bundles_post_ra>
// kernel: tpu_custom_call.1
= control target key start
LH: loop header
LB: loop body
LE: loop exit
PB: predicated region body
PF: predicated region fallthrough
CT: control target
= control target key end

     0   :  { %19 = vsyncpa [#allocation3], 0  ;;  %s4471_s0 = inlined_call_operand.vmem [shape: f32[64,3], index: 0, kind: input, shape index: {}]   ;;  %s4472_s1 = inlined_call_operand.vmem [shape: f32[8,268], index: 1, kind: input, shape index: {}]   ;;  %s4473_s2 = inlined_call_operand.hbm [shape: bf16[268,256], index: 2, kind: input, shape index: {}]   ;;  %s4474_s3 = inlined_call_operand.vmem [shape: f32[1,256], index: 3, kind: input, shape index: {}]   ;;  %s4475_s4 = inlined_call_operand.vmem [shape: f32[3,512], index: 4, kind: input, shape index: {}]   ;;  %s4476_s5 = inlined_call_operand.hbm [shape: bf16[128,512], index: 5, kind: input, shape index: {}]   ;;  %s4477_s6 = inlined_call_operand.vmem [shape: f32[1,512], index: 6, kind: input, shape index: {}]   ;;  %s4478_s7 = inlined_call_operand.hbm [shape: bf16[128,256], index: 7, kind: input, shape index: {}]   ;;  %s4479_s8 = inlined_call_operand.hbm [shape: bf16[256,384], index: 8, kind: input, shape index: {}]   ;;  %s4480_s9 = inlined_call_operand.vmem [shape: f32[1,384], index: 9, kind: input, shape index: {}]   ;;  %s4481_s10 = inlined_call_operand.hbm [shape: f32[64,384], index: 10, kind: output, shape index: {0}]   ;;  %s4482_s11 = inlined_call_operand.hbm [shape: f32[64,256], index: 11, kind: output, shape index: {1}]   ;;  %s4483_s12 = inlined_call_operand.hbm [shape: f32[64,128], index: 12, kind: output, shape index: {2}]   ;;  %s4484_s13 = inlined_call_operand.hbm [shape: f32[64,128], index: 13, kind: output, shape index: {3}]  }
   0x1   :  { %20 = vsyncpa [#allocation6], 0 }
   0x2   :  { %21 = vsyncpa [#allocation9], 0 }
   0x3   :  { %22 = vsyncpa [#allocation4], 0 }
   0x4   :  { %23 = vsyncpa [#allocation12], 0 }
   0x5   :  { %24 = vsyncpa [#allocation15], 0  ;;  %s3489_s25 = smov [#allocation5]   ;;  %s3301_s29 = scalar_lea.hbm %s4476_s5, 4096 }
   0x6   :  { %s50_s26 = sshll.u32 %s3489_s25, 4  ;;  %p3302_p0 = scmp.ne.s32.totalorder %s4476_s5, %s3301_s29  ;;  %s51_s26 = int_to_ptr.vmem [resolvable:$true] %s50_s26 }
   0x7   :  { %p3305_p1 = scmp.lt.u32.totalorder %s3301_s29, %s4476_s5 }
   0x9   :  { %p3307_p2 = pnand %p3305_p1, %p3302_p0 }
   0xb   :  { %3310 = shalt.err (!%p3307_p2)
}
   0xc   :  { %s3311_s17 = scalar_lea.vmem %s51_s26, 4096  ;;  %p3316_p4 = scmp.lt.s32.totalorder %s51_s26, %s51_s26 }
   0xd   :  { %p3312_p3 = scmp.ne.s32.totalorder %s51_s26, %s3311_s17  ;;  %p3317_p5 = scmp.lt.s32.totalorder %s3311_s17, %s3311_s17 }
   0xf   :  { %p3318_p6 = por %p3317_p5, %p3316_p4 }
  0x11   :  { %p3319_p7 = pnand %p3318_p6, %p3312_p3 }
  0x13   :  { %3322 = shalt.err (!%p3319_p7)
}
  0x14   :  { %s3490_s18 = smov 256   ;;  %s3491_s19 = smov 16  }
  0x15   :  { %56 = dma.hbm_to_vmem [thread:$0]  %s4476_s5, 4096, %s51_s26, [#allocation6], %s3490_s18, %s3490_s18, %s3491_s19  }
  0x16   :  { %s3492_s22 = smov [#allocation2]   ;;  %s3323_s27 = scalar_lea.hbm %s4473_s2, 4352 }
  0x17   :  { %s34_s23 = sshll.u32 %s3492_s22, 4  ;;  %p3324_p8 = scmp.ne.s32.totalorder %s4473_s2, %s3323_s27  ;;  %s35_s23 = int_to_ptr.vmem [resolvable:$true] %s34_s23 }
  0x18   :  { %p3327_p9 = scmp.lt.u32.totalorder %s3323_s27, %s4473_s2 }
  0x1a   :  { %p3329_p10 = pnand %p3327_p9, %p3324_p8 }
  0x1c   :  { %3332 = shalt.err (!%p3329_p10)
}
  0x1d   :  { %s3333_s15 = scalar_lea.vmem %s35_s23, 4352  ;;  %p3338_p12 = scmp.lt.s32.totalorder %s35_s23, %s35_s23 }
  0x1e   :  { %p3334_p11 = scmp.ne.s32.totalorder %s35_s23, %s3333_s15  ;;  %p3339_p13 = scmp.lt.s32.totalorder %s3333_s15, %s3333_s15 }
  0x20   :  { %p3340_p0 = por %p3339_p13, %p3338_p12 }
  0x22   :  { %p3341_p1 = pnand %p3340_p0, %p3334_p11 }
  0x24   :  { %3344 = shalt.err (!%p3341_p1)
}
  0x25   :  { %s3493_s5 = smov 128   ;;  %s3494_s26 = smov 8  }
  0x26   :  { %40 = dma.hbm_to_vmem [thread:$0]  %s4473_s2, 4352, %s35_s23, [#allocation3], %s3493_s5, %s3493_s5, %s3494_s26  }
  0x27   :  { %s3495_s20 = smov [#allocation7]   ;;  %s3496_s22 = smov [#allocation8]  }
  0x28   :  { %s64_s21 = sshll.u32 %s3495_s20, 4  ;;  %s76_s24 = sshll.u32 %s3496_s22, 4  ;;  %s65_s21 = int_to_ptr.vmem [resolvable:$true] %s64_s21  ;;  %s3608_s24 = int_to_ptr.vmem [resolvable:$true] %s76_s24 }
  0x29   :  { %s3345_s28 = scalar_lea.hbm %s4478_s7, 2048 }
  0x2a   :  { %p3346_p2 = scmp.ne.s32.totalorder %s4478_s7, %s3345_s28  ;;  %p3349_p3 = scmp.lt.u32.totalorder %s3345_s28, %s4478_s7 }
  0x2c   :  { %p3351_p4 = pnand %p3349_p3, %p3346_p2 }
  0x2e   :  { %3354 = shalt.err (!%p3351_p4)
}
  0x2f   :  { %s3355_s2 = scalar_lea.vmem %s65_s21, 2048  ;;  %p3360_p6 = scmp.lt.s32.totalorder %s65_s21, %s65_s21 }
  0x30   :  { %p3356_p5 = scmp.ne.s32.totalorder %s65_s21, %s3355_s2  ;;  %p3361_p7 = scmp.lt.s32.totalorder %s3355_s2, %s3355_s2 }
  0x32   :  { %p3362_p8 = por %p3361_p7, %p3360_p6 }
  0x34   :  { %p3363_p9 = pnand %p3362_p8, %p3356_p5 }
  0x36   :  { %3366 = shalt.err (!%p3363_p9)
}
  0x37   :  { %70 = dma.hbm_to_vmem [thread:$0]  %s4478_s7, 2048, %s65_s21, [#allocation6], %s3493_s5, %s3493_s5, %s3494_s26  }
  0x38   :  { %s3367_s22 = scalar_lea.hbm %s4479_s8, 6144 }
  0x39   :  { %p3368_p10 = scmp.ne.s32.totalorder %s4479_s8, %s3367_s22  ;;  %p3371_p11 = scmp.lt.u32.totalorder %s3367_s22, %s4479_s8 }
  0x3b   :  { %p3373_p12 = pnand %p3371_p11, %p3368_p10 }
  0x3d   :  { %3376 = shalt.err (!%p3373_p12)
}
  0x3e   :  { %s3377_s30 = scalar_lea.vmem %s3608_s24, 6144  ;;  %p3382_p0 = scmp.lt.s32.totalorder %s3608_s24, %s3608_s24 }
  0x3f   :  { %p3378_p13 = scmp.ne.s32.totalorder %s3608_s24, %s3377_s30  ;;  %p3383_p1 = scmp.lt.s32.totalorder %s3377_s30, %s3377_s30 }
  0x41   :  { %p3384_p2 = por %p3383_p1, %p3382_p0 }
  0x43   :  { %p3385_p3 = pnand %p3384_p2, %p3378_p13 }
  0x45   :  { %3388 = shalt.err (!%p3385_p3)
}
  0x46   :  { %s3497_s7 = smov 192   ;;  %s3498_s21 = smov 12  }
  0x47   :  { %82 = dma.hbm_to_vmem [thread:$0]  %s4479_s8, 6144, %s3608_s24, [#allocation9], %s3497_s7, %s3497_s7, %s3498_s21  }
  0x48   :  { %3477 = dma.done.wait [#allocation3], 4352  }
  0x49   :  { %3478 = vsyncadd [#allocation3], 4294962944 }
  0x4a   :  { %3479 = dma.done.wait [#allocation6], 6144  }
  0x4b   :  { %3480 = vsyncadd [#allocation6], 4294961152 }
  0x4c   :  { %3481 = dma.done.wait [#allocation9], 6144  }
  0x4d   :  { %3482 = vsyncadd [#allocation9], 4294961152  ;;  %v4489_v0 = vmov 0   ;;  %v2954_v1 = vld [vmem:[#allocation2 + $0x4] ss:$8 sps:$4 sm:$0xff]   ;;  %vm322_vm0 = vcmask 1045504  }
  0x4e   :  { %402 = vmatprep.mubr.bf16.mxu1 %v4489_v0  ;;  %2934 = vset.pattern.permute.xlu0 %v4489_v0  ;;  %v2956_v2 = vld [vmem:[#allocation2] ss:$8 sps:$4 sm:$0xff]   ;;  %v2957_v3 = vld [vmem:[#allocation2 + $0x14] ss:$8 sps:$4 sm:$0xff]   ;;  %v2959_v4 = vld [vmem:[#allocation2 + $0x10] ss:$8 sps:$4 sm:$0xff]  }
  0x4f   :  { %329 = vmatprep.subr.bf16.mxu0 %v2954_v1  ;;  %v2960_v5 = vld [vmem:[#allocation2 + $0x24] ss:$8 sps:$4 sm:$0xff]   ;;  %v2962_v6 = vld [vmem:[#allocation2 + $0x20] ss:$8 sps:$4 sm:$0xff]   ;;  %v2963_v7 = vld [vmem:[#allocation2 + $0x34] ss:$8 sps:$4 sm:$0xff]  }
  0x50   :  { %330 = vmatpush1.bf16.msra.mxu0 %v2956_v2  ;;  %v2965_v8 = vld [vmem:[#allocation2 + $0x30] ss:$8 sps:$4 sm:$0xff]   ;;  %v2966_v9 = vld [vmem:[#allocation2 + $0x44] ss:$8 sps:$4 sm:$0xff]   ;;  %v2968_v10 = vld [vmem:[#allocation2 + $0x40] ss:$8 sps:$4 sm:$0xff]  }
  0x51   :  { %331 = vmatprep.subr.bf16.mxu0 %v2957_v3  ;;  %v2969_v11 = vld [vmem:[#allocation2 + $0x54] ss:$8 sps:$4 sm:$0xff]   ;;  %v2971_v12 = vld [vmem:[#allocation2 + $0x50] ss:$8 sps:$4 sm:$0xff]   ;;  %v2972_v13 = vld [vmem:[#allocation2 + $0x64] ss:$8 sps:$4 sm:$0xff]  }
  0x52   :  { %v2999_v14 = vld [vmem:[#allocation2 + $0x104] ss:$8 sps:$4 sm:$0x3f]   ;;  %v3003_v15 = vld [vmem:[#allocation2 + $0x100] ss:$8 sps:$4 sm:$0x3f]  }
  0x53   :  { %2749 = vmatprep.subr.msk.bf16.mxu1 %vm322_vm0, %v2999_v14  ;;  %v99_v16 = vld [vmem:[%s4472_s1 + $0x8] sm:$0xff]  ;;  %v2974_v17 = vld [vmem:[#allocation2 + $0x60] ss:$8 sps:$4 sm:$0xff]   ;;  %v324_v21 = vsel %vm322_vm0, %v3003_v15, 0  ;;  %v3650_v23 = vld [vmem:[#allocation5 + $0x4] ss:$16 sps:$4 sm:$0xff]  }
  0x54   :  { %332 = vmatpush1.bf16.msra.mxu0 %v2959_v4  ;;  %v102_v18 = vpack.c.bf16 %v99_v16, %v99_v16  ;;  %v100_v19 = vld [vmem:[%s4472_s1 + $0x10] sm:$0xff]  ;;  %v2975_v20 = vld [vmem:[#allocation2 + $0x74] ss:$8 sps:$4 sm:$0xff]   ;;  %371 = vmatpush1.bf16.msra.mxu1 %v324_v21  ;;  %vm318_vm1 = vcmask 97280   ;;  %v2977_v26 = vld [vmem:[#allocation2 + $0x70] ss:$8 sps:$4 sm:$0xff]  }
  0x55   :  { %333 = vmatprep.subr.bf16.mxu0 %v2960_v5  ;;  %v103_v22 = vpack.c.bf16 %v100_v19, %v100_v19  ;;  %v3652_v24 = vld [vmem:[#allocation5] ss:$16 sps:$4 sm:$0xff]   ;;  %1042 = vmatprep.subr.bf16.mxu1 %v3650_v23  ;;  %v3655_v25 = vld [vmem:[#allocation5 + $0x24] ss:$16 sps:$4 sm:$0xff]   ;;  %v3703_v58 = vld [vmem:[#allocation5 + $0xc] ss:$16 sps:$4 sm:$0xff]  }
  0x56   :  { %361 = vmatprep.mubr.bf16.mxu0 %v102_v18  ;;  %v2978_v27 = vld [vmem:[#allocation2 + $0x84] ss:$8 sps:$4 sm:$0xff]   ;;  %v2980_v28 = vld [vmem:[#allocation2 + $0x80] ss:$8 sps:$4 sm:$0xff]   ;;  %v2981_v31 = vld [vmem:[#allocation2 + $0x94] ss:$8 sps:$4 sm:$0xff]   ;;  %v140_v18 = vlaneseq }
  0x57   :  { %2750 = vmatmul.mubr.msk.bf16.vlgmr.msra.gmra.mrb[0].mxu1 %vm318_vm1, %v103_v22  ;;  %v3658_v29 = vld [vmem:[#allocation5 + $0x20] ss:$16 sps:$4 sm:$0xff]   ;;  %v3662_v30 = vld [vmem:[#allocation5 + $0x44] ss:$16 sps:$4 sm:$0xff]   ;;  %v3705_v59 = vld [vmem:[#allocation5 + $0x8] ss:$16 sps:$4 sm:$0xff]  }
  0x58   :  { %334 = vmatpush1.bf16.msra.mxu0 %v2962_v6  ;;  %1043 = vmatpush1.bf16.msra.mxu1 %v3652_v24  ;;  %v3664_v32 = vld [vmem:[#allocation5 + $0x40] ss:$16 sps:$4 sm:$0xff]   ;;  %v3666_v33 = vld [vmem:[#allocation5 + $0x64] ss:$16 sps:$4 sm:$0xff]   ;;  %v3710_v60 = vld [vmem:[#allocation5 + $0x2c] ss:$16 sps:$4 sm:$0xff]  }
  0x59   :  { %335 = vmatprep.subr.bf16.mxu0 %v2963_v7  ;;  %1074 = vmatprep.mubr.bf16.mxu1 %v4489_v0  ;;  %v2983_v34 = vld [vmem:[#allocation2 + $0x90] ss:$8 sps:$4 sm:$0xff]   ;;  %v2984_v35 = vld [vmem:[#allocation2 + $0xa4] ss:$8 sps:$4 sm:$0xff]   ;;  %v2986_v38 = vld [vmem:[#allocation2 + $0xa0] ss:$8 sps:$4 sm:$0xff]  }
  0x5a   :  { %1044 = vmatprep.subr.bf16.mxu1 %v3655_v25  ;;  %v3670_v36 = vld [vmem:[#allocation5 + $0x60] ss:$16 sps:$4 sm:$0xff]   ;;  %v3672_v37 = vld [vmem:[#allocation5 + $0x84] ss:$16 sps:$4 sm:$0xff]   ;;  %v3712_v61 = vld [vmem:[#allocation5 + $0x28] ss:$16 sps:$4 sm:$0xff]  }
  0x5b   :  { %v2987_v39 = vld [vmem:[#allocation2 + $0xb4] ss:$8 sps:$4 sm:$0xff]   ;;  %v3676_v40 = vld [vmem:[#allocation5 + $0x80] ss:$16 sps:$4 sm:$0xff]   ;;  %v2990_v43 = vld [vmem:[#allocation2 + $0xc4] ss:$8 sps:$4 sm:$0xff]  }
  0x5c   :  { %336 = vmatpush1.bf16.msra.mxu0 %v2965_v8  ;;  %1045 = vmatpush1.bf16.msra.mxu1 %v3658_v29  ;;  %v3678_v41 = vld [vmem:[#allocation5 + $0xa4] ss:$16 sps:$4 sm:$0xff]   ;;  %v2989_v42 = vld [vmem:[#allocation2 + $0xb0] ss:$8 sps:$4 sm:$0xff]   ;;  %v2992_v46 = vld [vmem:[#allocation2 + $0xc0] ss:$8 sps:$4 sm:$0xff]  }
  0x5d   :  { %337 = vmatprep.subr.bf16.mxu0 %v2966_v9  ;;  %1046 = vmatprep.subr.bf16.mxu1 %v3662_v30  ;;  %v3682_v44 = vld [vmem:[#allocation5 + $0xa0] ss:$16 sps:$4 sm:$0xff]   ;;  %v3684_v45 = vld [vmem:[#allocation5 + $0xc4] ss:$16 sps:$4 sm:$0xff]   ;;  %v3716_v62 = vld [vmem:[#allocation5 + $0x4c] ss:$16 sps:$4 sm:$0xff]  }
  0x5e   :  { %v2993_v47 = vld [vmem:[#allocation2 + $0xd4] ss:$8 sps:$4 sm:$0xff]   ;;  %v2995_v48 = vld [vmem:[#allocation2 + $0xd0] ss:$8 sps:$4 sm:$0xff]   ;;  %v2996_v49 = vld [vmem:[#allocation2 + $0xe4] ss:$8 sps:$4 sm:$0xff]  }
  0x5f   :  { %v2998_v50 = vld [vmem:[#allocation2 + $0xe0] ss:$8 sps:$4 sm:$0xff]   ;;  %v3001_v51 = vld [vmem:[#allocation2 + $0xf4] ss:$8 sps:$4 sm:$0xff]   ;;  %v3004_v52 = vld [vmem:[#allocation2 + $0xf0] ss:$8 sps:$4 sm:$0xff]  }
  0x60   :  { %338 = vmatpush1.bf16.msra.mxu0 %v2968_v10  ;;  %1047 = vmatpush1.bf16.msra.mxu1 %v3664_v32  ;;  %v98_v53 = vld [vmem:[%s4472_s1] sm:$0xff]  ;;  %v3718_v63 = vld [vmem:[#allocation5 + $0x48] ss:$16 sps:$4 sm:$0xff]   ;;  %v3722_v1 = vld [vmem:[#allocation5 + $0x6c] ss:$16 sps:$4 sm:$0xff]   ;;  %v3760_v19 = vshrl.u32 %v140_v18, 7 }
  0x61   :  { %339 = vmatprep.subr.bf16.mxu0 %v2969_v11  ;;  %1048 = vmatprep.subr.bf16.mxu1 %v3666_v33  ;;  %v101_v54 = vpack.c.bf16 %v98_v53, %v98_v53  ;;  %v3694_v55 = vld [vmem:[#allocation5 + $0xc0] ss:$16 sps:$4 sm:$0xff]   ;;  %v3697_v56 = vld [vmem:[#allocation5 + $0xe4] ss:$16 sps:$4 sm:$0xff]   ;;  %v3724_v2 = vld [vmem:[#allocation5 + $0x68] ss:$16 sps:$4 sm:$0xff]  }
  0x62   :  { %v3699_v57 = vld [vmem:[#allocation5 + $0xe0] ss:$16 sps:$4 sm:$0xff]   ;;  %v3728_v3 = vld [vmem:[#allocation5 + $0x8c] ss:$16 sps:$4 sm:$0xff]   ;;  %v3730_v4 = vld [vmem:[#allocation5 + $0x88] ss:$16 sps:$4 sm:$0xff]  }
  0x63   :  { %v3734_v5 = vld [vmem:[#allocation5 + $0xac] ss:$16 sps:$4 sm:$0xff]   ;;  %v3736_v6 = vld [vmem:[#allocation5 + $0xa8] ss:$16 sps:$4 sm:$0xff]   ;;  %v411_v11 = vld [vmem:[%s4471_s0] sm:$0xff]  ;;  %v3769_v22 = vsub.s32 1, %v3760_v19 }
  0x64   :  { %340 = vmatpush1.bf16.msra.mxu0 %v2971_v12  ;;  %1049 = vmatpush1.bf16.msra.mxu1 %v3670_v36  ;;  %v3740_v7 = vld [vmem:[#allocation5 + $0xcc] ss:$16 sps:$4 sm:$0xff]   ;;  %v3742_v8 = vld [vmem:[#allocation5 + $0xc8] ss:$16 sps:$4 sm:$0xff]   ;;  %v4487_v12 = vmov 2  }
  0x65   :  { %341 = vmatprep.subr.bf16.mxu0 %v2972_v13  ;;  %1050 = vmatprep.subr.bf16.mxu1 %v3672_v37  ;;  %v3746_v9 = vld [vmem:[#allocation5 + $0xec] ss:$16 sps:$4 sm:$0xff]   ;;  %v3748_v10 = vld [vmem:[#allocation5 + $0xe8] ss:$16 sps:$4 sm:$0xff]   ;;  %v4485_v13 = vmov 1   ;;  %4540 = vst [vmem:[#allocation23_spill] sm:$0xff] %v3769_v22 }
  0x66   :  { %424 = vperm.xlu0 %2934, %v411_v11   ;;  %2936 = vset.pattern.permute.xlu1 %v4487_v12  ;;  %v138_v21 = vld [vmem:[%s4474_s3] sm:$0x3] }
  0x67   :  { %718 = vperm.xlu1 %2936, %v411_v11  }
  0x68   :  { %342 = vmatpush1.bf16.msra.mxu0 %v2974_v17  ;;  %1051 = vmatpush1.bf16.msra.mxu1 %v3676_v40 }
  0x69   :  { %343 = vmatprep.subr.bf16.mxu0 %v2975_v20  ;;  %1052 = vmatprep.subr.bf16.mxu1 %v3678_v41  ;;  %v3763_v20 = vsub.s32 0, %v3760_v19 }
  0x6a   :  { %2935 = vset.pattern.permute.xlu0 %v4485_v13 }
  0x6b   :  { %586 = vperm.xlu0 %2935, %v411_v11   ;;  %2937 = vset.pattern.permute.xlu1 %v4489_v0  ;;  %4539 = vst [vmem:[#allocation22_spill] sm:$0xff] %v3763_v20  ;;  %v421_v11 = vld [vmem:[%s4477_s6] sm:$0xf] }
  0x6c   :  { %344 = vmatpush1.bf16.msra.mxu0 %v2977_v26  ;;  %1053 = vmatpush1.bf16.msra.mxu1 %v3682_v44  ;;  %v143_v26 = vrot.slane %v138_v21, %v3763_v20 }
  0x6d   :  { %345 = vmatprep.subr.bf16.mxu0 %v2978_v27  ;;  %1054 = vmatprep.subr.bf16.mxu1 %v3684_v45  ;;  %v147_v27 = vrot.slane %v138_v21, %v3769_v22 }
  0x6f   :  { %2939 = vset.pattern.permute.xlu0 %v4487_v12 }
  0x70   :  { %346 = vmatpush1.bf16.msra.mxu0 %v2980_v28  ;;  %1055 = vmatpush1.bf16.msra.mxu1 %v3694_v55 }
  0x71   :  { %347 = vmatprep.subr.bf16.mxu0 %v2981_v31  ;;  %1056 = vmatprep.subr.bf16.mxu1 %v3697_v56 }
  0x74   :  { %348 = vmatpush1.bf16.msra.mxu0 %v2983_v34  ;;  %1057 = vmatpush1.bf16.msra.mxu1 %v3699_v57 }
  0x75   :  { %349 = vmatprep.subr.bf16.mxu0 %v2984_v35  ;;  %1083 = vmatprep.subr.bf16.mxu1 %v3703_v58 }
  0x78   :  { %350 = vmatpush1.bf16.msra.mxu0 %v2986_v38 }
  0x79   :  { %351 = vmatprep.subr.bf16.mxu0 %v2987_v39 }
  0x7c   :  { %352 = vmatpush1.bf16.msra.mxu0 %v2989_v42 }
  0x7d   :  { %353 = vmatprep.subr.bf16.mxu0 %v2990_v43 }
  0x80   :  { %354 = vmatpush1.bf16.msra.mxu0 %v2992_v46 }
  0x81   :  { %355 = vmatprep.subr.bf16.mxu0 %v2993_v47  ;;  %v412_v47 = vld [vmem:[%s4471_s0 + $0x8] sm:$0xff] }
  0x82   :  { %429 = vperm.xlu1 %2937, %v412_v47   ;;  %722 = vperm.xlu0 %2939, %v412_v47  }
  0x84   :  { %356 = vmatpush1.bf16.msra.mxu0 %v2995_v48  ;;  %v413_v48 = vld [vmem:[%s4471_s0 + $0x10] sm:$0xff] }
  0x85   :  { %357 = vmatprep.subr.bf16.mxu0 %v2996_v49  ;;  %v419_v49 = vld [vmem:[%s4475_s4] sm:$0x77] }
  0x86   :  { %2938 = vset.pattern.permute.xlu1 %v4485_v13  ;;  %726 = vperm.xlu0 %2939, %v413_v48   ;;  %v620_v53 = vrot.slane %v419_v49, %v3769_v22 }
  0x87   :  { %590 = vperm.xlu1 %2938, %v412_v47   ;;  %v755_v47 = vsub.s32 6, %v3760_v19 }
  0x88   :  { %358 = vmatpush1.bf16.msra.mxu0 %v2998_v50  ;;  %v467_v50 = vrot.slane %v419_v49, %v3763_v20 }
  0x89   :  { %359 = vmatprep.subr.bf16.mxu0 %v3001_v51 }
  0x8a   :  { %2943 = vset.pattern.permute.xlu0 %v4485_v13 }
  0x8b   :  { %2940 = vset.pattern.permute.xlu1 %v4489_v0 }
  0x8c   :  { %360 = vmatpush1.bf16.msra.mxu0 %v3004_v52  ;;  %434 = vperm.xlu1 %2940, %v413_v48   ;;  %v3825_v52 = vrot.slane %v467_v50, %v3763_v20 }
  0x8d   :  { %1196 = vmatprep.subr.bf16.mxu0 %v3703_v58 }
  0x8e   :  { %4541 = vst [vmem:[#allocation24_spill] sm:$0xff] %v3825_v52 }
  0x8f   :  { %362 = vmatmul.mubr.bf16.vlgmr.msra.gmra.mrb[0].mxu0 %v101_v54  ;;  %v3829_v54 = vsub.s32 2, %v3760_v19 }
  0x90   :  { %1228 = vmatprep.mubr.bf16.mxu0 %v4489_v0  ;;  %1197 = vmatpush1.bf16.msra.mxu0 %v3705_v59 }
  0x91   :  { %1198 = vmatprep.subr.bf16.mxu0 %v3710_v60  ;;  %2941 = vset.pattern.permute.xlu1 %v4485_v13  ;;  %4542 = vst [vmem:[#allocation25_spill] sm:$0xff] %v3829_v54  ;;  %v752_v18 = vrot.slane %v419_v49, %v3829_v54 }
  0x92   :  { %594 = vperm.xlu1 %2941, %v413_v48  }
  0x94   :  { %1199 = vmatpush1.bf16.msra.mxu0 %v3712_v61 }
  0x95   :  { %1200 = vmatprep.subr.bf16.mxu0 %v3716_v62 }
  0x96   :  { %2942 = vset.pattern.permute.xlu1 %v4489_v0 }
  0x98   :  { %1201 = vmatpush1.bf16.msra.mxu0 %v3718_v63 }
  0x99   :  { %1202 = vmatprep.subr.bf16.mxu0 %v3722_v1 }
  0x9c   :  { %1203 = vmatpush1.bf16.msra.mxu0 %v3724_v2 }
  0x9d   :  { %1204 = vmatprep.subr.bf16.mxu0 %v3728_v3 }
  0xa0   :  { %1205 = vmatpush1.bf16.msra.mxu0 %v3730_v4 }
  0xa1   :  { %1206 = vmatprep.subr.bf16.mxu0 %v3734_v5 }
  0xa4   :  { %1207 = vmatpush1.bf16.msra.mxu0 %v3736_v6 }
  0xa5   :  { %1208 = vmatprep.subr.bf16.mxu0 %v3740_v7 }
  0xa8   :  { %1209 = vmatpush1.bf16.msra.mxu0 %v3742_v8 }
  0xa9   :  { %1210 = vmatprep.subr.bf16.mxu0 %v3746_v9 }
  0xac   :  { %1211 = vmatpush1.bf16.msra.mxu0 %v3748_v10 }
  0xad   :  { %1309 = vmatprep.subr.bf16.mxu0 %v3703_v58 }
  0xe5   :  { %v425_v51 = vpop.permute.xlu0 %424 }
  0xea   :  { %v587_v21 = vpop.permute.xlu0 %586 }
 0x12a   :  { %v404_v14 = vpop.f32.mrb[0].mxu1 }
 0x12b   :  { %v406_v15 = vpop.f32.mrb[1].mxu1 }
 0x12c   :  { %v408_v16 = vpop.f32.mrb[2].mxu1 }
 0x12d   :  { %v409_v17 = vpop.f32.mrb[3].mxu1  ;;  %v3837_v16 = vrot.slane %v620_v53, %v3769_v22 }
 0x12e   :  { %v3840_v17 = vrot.slane %v421_v11, %v3763_v20 }
 0x12f   :  { %4543 = vst [vmem:[#allocation26_spill] sm:$0xff] %v3837_v16 }
 0x130   :  { %4544 = vst [vmem:[#allocation27_spill] sm:$0xff] %v3840_v17 }
 0x162   :  { %v363_v28 = vpop.f32.mrb[0].mxu0 }
 0x163   :  { %v364_v31 = vadd.f32 %v363_v28, %v143_v26  ;;  %v365_v34 = vpop.f32.mrb[1].mxu0  ;;  %v623_v26 = vsub.s32 5, %v3760_v19  ;;  %v653_v28 = vmul.f32 %v3837_v16, %v587_v21 }
 0x164   :  { %v366_v35 = vadd.f32 %v365_v34, %v147_v27  ;;  %v367_v38 = vpop.f32.mrb[2].mxu0  ;;  %v3847_v34 = vrot.slane %v752_v18, %v3829_v54  ;;  %v756_v18 = vrot.slane %v419_v49, %v755_v47 }
 0x165   :  { %v405_v39 = vadd.f32 %v404_v14, %v364_v31  ;;  %v368_v42 = vpop.f32.mrb[3].mxu0  ;;  %v470_v14 = vsub.s32 4, %v3760_v19  ;;  %v624_v38 = vrot.slane %v419_v49, %v623_v26 }
 0x166   :  { %v3773_v43 = vadd.f32 %v406_v15, %v366_v35  ;;  %v500_v15 = vmul.f32 %v3825_v52, %v425_v51  ;;  %4545 = vst [vmem:[#allocation28_spill] sm:$0xff] %v3847_v34  ;;  %v719_v35 = vpop.permute.xlu1 %718 }
 0x167   :  { %v881_v46 = vpack.c.bf16 %v405_v39, %v405_v39  ;;  %v471_v27 = vrot.slane %v419_v49, %v470_v14  ;;  %v3855_v48 = vrot.slane %v624_v38, %v3769_v22  ;;  %v420_v49 = vld [vmem:[%s4475_s4 + $0x8] sm:$0x77] }
 0x168   :  { %v553_v31 = vadd.f32 %v3840_v17, %v500_v15  ;;  %v3859_v15 = vrot.slane %v421_v11, %v3769_v22 }
 0x169   :  { %1075 = vmatmul.mubr.bf16.vlgmr.msra.gmra.mrb[4].mxu1 %v881_v46  ;;  %v3850_v39 = vrot.slane %v471_v27, %v3763_v20  ;;  %4547 = vst [vmem:[#allocation30_spill] sm:$0xff] %v3855_v48  ;;  %v654_v12 = vmul.f32 %v3855_v48, %v587_v21 }
 0x16a   :  { %1084 = vmatpush1.bf16.msra.mxu1 %v3705_v59  ;;  %1115 = vmatprep.mubr.bf16.mxu1 %v4489_v0  ;;  %v685_v42 = vadd.f32 %v653_v28, %v553_v31  ;;  %4548 = vst [vmem:[#allocation31_spill] sm:$0xff] %v3859_v15  ;;  %v3864_v31 = vrot.slane %v756_v18, %v3829_v54 }
 0x16b   :  { %1085 = vmatprep.subr.bf16.mxu1 %v3710_v60  ;;  %4546 = vst [vmem:[#allocation29_spill] sm:$0xff] %v3850_v39  ;;  %v501_v50 = vmul.f32 %v3850_v39, %v425_v51 }
 0x16c   :  { %4549 = vst [vmem:[#allocation32_spill] sm:$0xff] %v3864_v31 }
 0x16d   :  { %v554_v28 = vadd.f32 %v3859_v15, %v501_v50 }
 0x16e   :  { %1086 = vmatpush1.bf16.msra.mxu1 %v3712_v61 }
 0x16f   :  { %1087 = vmatprep.subr.bf16.mxu1 %v3716_v62  ;;  %v686_v39 = vadd.f32 %v654_v12, %v554_v28 }
 0x172   :  { %1088 = vmatpush1.bf16.msra.mxu1 %v3718_v63 }
 0x173   :  { %1089 = vmatprep.subr.bf16.mxu1 %v3722_v1 }
 0x176   :  { %1090 = vmatpush1.bf16.msra.mxu1 %v3724_v2 }
 0x177   :  { %1091 = vmatprep.subr.bf16.mxu1 %v3728_v3 }
 0x17a   :  { %1092 = vmatpush1.bf16.msra.mxu1 %v3730_v4 }
 0x17b   :  { %1093 = vmatprep.subr.bf16.mxu1 %v3734_v5 }
 0x17e   :  { %1094 = vmatpush1.bf16.msra.mxu1 %v3736_v6 }
 0x17f   :  { %1095 = vmatprep.subr.bf16.mxu1 %v3740_v7 }
 0x182   :  { %1096 = vmatpush1.bf16.msra.mxu1 %v3742_v8 }
 0x183   :  { %1097 = vmatprep.subr.bf16.mxu1 %v3746_v9 }
 0x186   :  { %1098 = vmatpush1.bf16.msra.mxu1 %v3748_v10 }
 0x187   :  { %1155 = vmatprep.subr.bf16.mxu1 %v3650_v23 }
 0x189   :  { %1116 = vmatmul.mubr.bf16.vlgmr.msra.gmra.mrb[8].mxu1 %v881_v46  ;;  %v785_v46 = vmul.f32 %v3847_v34, %v719_v35 }
 0x18a   :  { %1156 = vmatpush1.bf16.msra.mxu1 %v3652_v24  ;;  %1187 = vmatprep.mubr.bf16.mxu1 %v4489_v0 }
 0x18b   :  { %1157 = vmatprep.subr.bf16.mxu1 %v3655_v25  ;;  %v817_v53 = vadd.f32 %v785_v46, %v685_v42  ;;  %v786_v42 = vmul.f32 %v3864_v31, %v719_v35  ;;  %v764_v31 = vrot.slane %v420_v49, %v755_v47 }
 0x18d   :  { %v818_v46 = vadd.f32 %v786_v42, %v686_v39  ;;  %v3880_v39 = vrot.slane %v421_v11, %v3829_v54  ;;  %v632_v42 = vrot.slane %v420_v49, %v623_v26 }
 0x18e   :  { %1158 = vmatpush1.bf16.msra.mxu1 %v3658_v29 }
 0x18f   :  { %1159 = vmatprep.subr.bf16.mxu1 %v3662_v30  ;;  %4552 = vst [vmem:[#allocation35_spill] sm:$0xff] %v3880_v39 }
 0x192   :  { %1160 = vmatpush1.bf16.msra.mxu1 %v3664_v32 }
 0x193   :  { %1161 = vmatprep.subr.bf16.mxu1 %v3666_v33 }
 0x196   :  { %1162 = vmatpush1.bf16.msra.mxu1 %v3670_v36 }
 0x197   :  { %1163 = vmatprep.subr.bf16.mxu1 %v3672_v37 }
 0x19a   :  { %1164 = vmatpush1.bf16.msra.mxu1 %v3676_v40 }
 0x19b   :  { %1165 = vmatprep.subr.bf16.mxu1 %v3678_v41 }
 0x19e   :  { %1166 = vmatpush1.bf16.msra.mxu1 %v3682_v44 }
 0x19f   :  { %1167 = vmatprep.subr.bf16.mxu1 %v3684_v45 }
 0x1a2   :  { %1168 = vmatpush1.bf16.msra.mxu1 %v3694_v55 }
 0x1a3   :  { %1169 = vmatprep.subr.bf16.mxu1 %v3697_v56 }
 0x1a6   :  { %1170 = vmatpush1.bf16.msra.mxu1 %v3699_v57 }
 0x1a7   :  { %1268 = vmatprep.subr.bf16.mxu1 %v3650_v23 }
 0x23c   :  { %v1076_v13 = vpop.f32.mrb[4].mxu1 }
 0x23d   :  { %v1124_v27 = vadd.f32 %v1076_v13, %v817_v53  ;;  %v1078_v0 = vpop.f32.mrb[5].mxu1  ;;  %v475_v13 = vrot.slane %v420_v49, %v3763_v20 }
 0x23e   :  { %v1080_v34 = vpop.f32.mrb[6].mxu1  ;;  %v1125_v53 = vadd.f32 %v1078_v0, %v818_v46  ;;  %v760_v0 = vrot.slane %v420_v49, %v3829_v54  ;;  %v547_v46 = vsub.s32 3, %v3760_v19 }
 0x23f   :  { %v2784_v38 = vmul.f32 -1.442695, %v1124_v27  ;;  %v1081_v17 = vpop.f32.mrb[7].mxu1  ;;  %v3872_v18 = vrot.slane %v475_v13, %v3763_v20  ;;  %v628_v34 = vrot.slane %v420_v49, %v3769_v22 }
 0x240   :  { %v479_v17 = vrot.slane %v420_v49, %v470_v14 }
 0x241   :  { %3141 = vpow2.f32 %v2784_v38  ;;  %4550 = vst [vmem:[#allocation33_spill] sm:$0xff] %v3872_v18  ;;  %v502_v12 = vmul.f32 %v3872_v18, %v425_v51  ;;  %v3877_v28 = vrot.slane %v628_v34, %v3769_v22  ;;  %v3894_v34 = vrot.slane %v632_v42, %v3769_v22 }
 0x242   :  { %3143 = vtanh.f32 %v1125_v53  ;;  %v3884_v38 = vrot.slane %v479_v17, %v3763_v20  ;;  %v3890_v53 = vrot.slane %v760_v0, %v3829_v54  ;;  %v3902_v0 = vrot.slane %v764_v31, %v3829_v54 }
 0x243   :  { %4551 = vst [vmem:[#allocation34_spill] sm:$0xff] %v3877_v28  ;;  %v655_v14 = vmul.f32 %v3877_v28, %v587_v21  ;;  %v555_v13 = vadd.f32 %v3880_v39, %v502_v12  ;;  %4555 = vst [vmem:[#allocation38_spill] sm:$0xff] %v3894_v34  ;;  %v656_v15 = vmul.f32 %v3894_v34, %v587_v21 }
 0x244   :  { %4553 = vst [vmem:[#allocation36_spill] sm:$0xff] %v3884_v38  ;;  %4554 = vst [vmem:[#allocation37_spill] sm:$0xff] %v3890_v53  ;;  %v787_v26 = vmul.f32 %v3890_v53, %v719_v35 }
 0x245   :  { %v687_v20 = vadd.f32 %v655_v14, %v555_v13 }
 0x24b   :  { %v3142_v50 = vpop.eup %3141 }
 0x24c   :  { %v1138_v27 = vadd.f32 1.0, %v3142_v50  ;;  %v503_v50 = vmul.f32 %v3884_v38, %v425_v51  ;;  %v3144_v17 = vpop.eup %3143  ;;  %v819_v51 = vadd.f32 %v787_v26, %v687_v20 }
 0x24e   :  { %3145 = vrcp.f32 %v1138_v27  ;;  %v3896_v27 = vrot.slane %v421_v11, %v547_v46  ;;  %v788_v11 = vmul.f32 %v3902_v0, %v719_v35 }
 0x250   :  { %4556 = vst [vmem:[#allocation39_spill] sm:$0xff] %v3896_v27  ;;  %v556_v12 = vadd.f32 %v3896_v27, %v503_v50 }
 0x252   :  { %v688_v22 = vadd.f32 %v656_v15, %v556_v12 }
 0x254   :  { %v820_v13 = vadd.f32 %v788_v11, %v688_v22 }
 0x258   :  { %v3146_v19 = vpop.eup %3145 }
 0x259   :  { %v1142_v48 = vmul.f32 %v3146_v19, %v3144_v17 }
 0x25c   :  { %v1117_v38 = vpop.f32.mrb[8].mxu1 }
 0x25d   :  { %v1126_v42 = vadd.f32 %v1117_v38, %v819_v51  ;;  %v1119_v47 = vpop.f32.mrb[9].mxu1 }
 0x25e   :  { %v1121_v49 = vpop.f32.mrb[10].mxu1  ;;  %v1127_v53 = vadd.f32 %v1119_v47, %v820_v13  ;;  %v723_v13 = vpop.permute.xlu0 %722 }
 0x25f   :  { %v2783_v46 = vmul.f32 -1.442695, %v1126_v42  ;;  %v1122_v14 = vpop.f32.mrb[11].mxu1  ;;  %v4558_v49 = vld [vmem:[#allocation27_spill] sm:$0xff] }
 0x260   :  { %v2785_v21 = vmul.f32 -1.442695, %v1127_v53 }
 0x261   :  { %3147 = vpow2.f32 %v2783_v46 }
 0x262   :  { %3149 = vpow2.f32 %v2785_v21  ;;  %v4559_v21 = vld [vmem:[#allocation36_spill] sm:$0xff] }
 0x26b   :  { %v3148_v17 = vpop.eup %3147 }
 0x26c   :  { %v1131_v50 = vadd.f32 1.0, %v3148_v17  ;;  %v3150_v31 = vpop.eup %3149 }
 0x26d   :  { %v1148_v20 = vadd.f32 1.0, %v3150_v31 }
 0x26e   :  { %3151 = vrcp.f32 %v1131_v50  ;;  %v4560_v50 = vld [vmem:[#allocation28_spill] sm:$0xff] }
 0x26f   :  { %3153 = vrcp.f32 %v1148_v20  ;;  %v789_v31 = vmul.f32 %v4560_v50, %v723_v13  ;;  %v4561_v20 = vld [vmem:[#allocation37_spill] sm:$0xff] }
 0x278   :  { %v3152_v19 = vpop.eup %3151 }
 0x279   :  { %v1134_v38 = vmul.f32 %v3152_v19, %v3773_v43  ;;  %v3154_v35 = vpop.eup %3153  ;;  %v4557_v43 = vmov 0  }
 0x27b   :  { %v3906_v15 = vadd.f32 %v1142_v48, %v1134_v38  ;;  %v430_v48 = vpop.permute.xlu1 %429  ;;  %v791_v38 = vmul.f32 %v4561_v20, %v723_v13  ;;  %v4563_v20 = vld [vmem:[#allocation30_spill] sm:$0xff] }
 0x27c   :  { %v504_v12 = vmul.f32 %v3825_v52, %v430_v48  ;;  %v506_v51 = vmul.f32 %v3872_v18, %v430_v48  ;;  %v507_v17 = vmul.f32 %v4559_v21, %v430_v48 }
 0x27d   :  { %1153 = vst [vmem:[#allocation14] sm:$0xff] %v3906_v15  ;;  %3155 = vtanh.f32 %v3906_v15 }
 0x27e   :  { %v557_v46 = vadd.f32 %v4558_v49, %v504_v12  ;;  %v559_v14 = vadd.f32 %v3880_v39, %v506_v51 }
 0x27f   :  { %v591_v42 = vpop.permute.xlu1 %590 }
 0x280   :  { %v657_v11 = vmul.f32 %v3837_v16, %v591_v42  ;;  %v659_v47 = vmul.f32 %v3877_v28, %v591_v42  ;;  %v658_v50 = vmul.f32 %v4563_v20, %v591_v42 }
 0x282   :  { %v691_v19 = vadd.f32 %v659_v47, %v559_v14 }
 0x284   :  { %v823_v28 = vadd.f32 %v791_v38, %v691_v19 }
 0x287   :  { %v3156_v22 = vpop.eup %3155 }
 0x288   :  { %v1151_v26 = vmul.f32 %v3156_v22, %v3154_v35  ;;  %v660_v35 = vmul.f32 %v3894_v34, %v591_v42  ;;  %v560_v22 = vadd.f32 %v3896_v27, %v507_v17  ;;  %v4564_v17 = vld [vmem:[#allocation31_spill] sm:$0xff] }
 0x28a   :  { %1152 = vst [vmem:[#allocation13] sm:$0xff] %v1151_v26  ;;  %v1154_v53 = vpack.c.bf16 %v1151_v26, %v1151_v26  ;;  %v4562_v26 = vld [vmem:[#allocation29_spill] sm:$0xff] }
 0x28c   :  { %1188 = vmatmul.mubr.bf16.vlgmr.msra.gmra.mrb[12].mxu1 %v1154_v53  ;;  %1229 = vmatmul.mubr.bf16.vlgmr.msra.gmra.mrb[4].mxu0 %v1154_v53  ;;  %v505_v53 = vmul.f32 %v4562_v26, %v430_v48 }
 0x28d   :  { %1269 = vmatpush1.bf16.msra.mxu1 %v3652_v24  ;;  %1310 = vmatpush1.bf16.msra.mxu0 %v3705_v59 }
 0x28e   :  { %1270 = vmatprep.subr.bf16.mxu1 %v3655_v25  ;;  %1311 = vmatprep.subr.bf16.mxu0 %v3710_v60  ;;  %v558_v27 = vadd.f32 %v4564_v17, %v505_v53 }
 0x28f   :  { %1300 = vmatprep.mubr.bf16.mxu1 %v4557_v43  ;;  %1341 = vmatprep.mubr.bf16.mxu0 %v4557_v43 }
 0x291   :  { %1271 = vmatpush1.bf16.msra.mxu1 %v3658_v29  ;;  %1312 = vmatpush1.bf16.msra.mxu0 %v3712_v61 }
 0x292   :  { %1272 = vmatprep.subr.bf16.mxu1 %v3662_v30  ;;  %1313 = vmatprep.subr.bf16.mxu0 %v3716_v62 }
 0x295   :  { %1273 = vmatpush1.bf16.msra.mxu1 %v3664_v32  ;;  %1314 = vmatpush1.bf16.msra.mxu0 %v3718_v63 }
 0x296   :  { %1274 = vmatprep.subr.bf16.mxu1 %v3666_v33  ;;  %1315 = vmatprep.subr.bf16.mxu0 %v3722_v1 }
 0x299   :  { %1275 = vmatpush1.bf16.msra.mxu1 %v3670_v36  ;;  %1316 = vmatpush1.bf16.msra.mxu0 %v3724_v2 }
 0x29a   :  { %1276 = vmatprep.subr.bf16.mxu1 %v3672_v37  ;;  %1317 = vmatprep.subr.bf16.mxu0 %v3728_v3 }
 0x29d   :  { %1277 = vmatpush1.bf16.msra.mxu1 %v3676_v40  ;;  %1318 = vmatpush1.bf16.msra.mxu0 %v3730_v4 }
 0x29e   :  { %1278 = vmatprep.subr.bf16.mxu1 %v3678_v41  ;;  %1319 = vmatprep.subr.bf16.mxu0 %v3734_v5 }
 0x2a1   :  { %1279 = vmatpush1.bf16.msra.mxu1 %v3682_v44  ;;  %1320 = vmatpush1.bf16.msra.mxu0 %v3736_v6 }
 0x2a2   :  { %1280 = vmatprep.subr.bf16.mxu1 %v3684_v45  ;;  %1321 = vmatprep.subr.bf16.mxu0 %v3740_v7 }
 0x2a5   :  { %1281 = vmatpush1.bf16.msra.mxu1 %v3694_v55  ;;  %1322 = vmatpush1.bf16.msra.mxu0 %v3742_v8 }
 0x2a6   :  { %1282 = vmatprep.subr.bf16.mxu1 %v3697_v56  ;;  %1323 = vmatprep.subr.bf16.mxu0 %v3746_v9 }
 0x2a9   :  { %1283 = vmatpush1.bf16.msra.mxu1 %v3699_v57  ;;  %1324 = vmatpush1.bf16.msra.mxu0 %v3748_v10 }
 0x2aa   :  { %1381 = vmatprep.subr.bf16.mxu1 %v3650_v23  ;;  %1422 = vmatprep.subr.bf16.mxu0 %v3703_v58  ;;  %v689_v23 = vadd.f32 %v657_v11, %v557_v46  ;;  %v692_v11 = vadd.f32 %v660_v35, %v560_v22  ;;  %v792_v46 = vmul.f32 %v3902_v0, %v723_v13 }
 0x2ac   :  { %v821_v54 = vadd.f32 %v789_v31, %v689_v23  ;;  %v824_v31 = vadd.f32 %v792_v46, %v692_v11 }
 0x35f   :  { %v1189_v12 = vpop.f32.mrb[12].mxu1  ;;  %v1230_v49 = vpop.f32.mrb[4].mxu0 }
 0x360   :  { %v1237_v51 = vadd.f32 %v1189_v12, %v821_v54  ;;  %v1239_v39 = vadd.f32 %v1230_v49, %v823_v28  ;;  %v1191_v16 = vpop.f32.mrb[13].mxu1  ;;  %v1232_v21 = vpop.f32.mrb[5].mxu0  ;;  %v690_v54 = vadd.f32 %v658_v50, %v558_v27  ;;  %v4565_v28 = vld [vmem:[#allocation32_spill] sm:$0xff] }
 0x361   :  { %v1193_v47 = vpop.f32.mrb[14].mxu1  ;;  %v1234_v14 = vpop.f32.mrb[6].mxu0  ;;  %v790_v49 = vmul.f32 %v4565_v28, %v723_v13  ;;  %v1240_v19 = vadd.f32 %v1232_v21, %v824_v31 }
 0x362   :  { %v2787_v34 = vmul.f32 -1.442695, %v1237_v51  ;;  %v2786_v18 = vmul.f32 -1.442695, %v1239_v39  ;;  %v1194_v48 = vpop.f32.mrb[15].mxu1  ;;  %v1235_v23 = vpop.f32.mrb[7].mxu0 }
 0x363   :  { %v822_v38 = vadd.f32 %v790_v49, %v690_v54  ;;  %v2788_v35 = vmul.f32 -1.442695, %v1240_v19  ;;  %v4572_v23 = vld [vmem:[#allocation27_spill] sm:$0xff]  ;;  %v727_v19 = vpop.permute.xlu0 %726 }
 0x364   :  { %3157 = vpow2.f32 %v2787_v34  ;;  %v4573_v54 = vld [vmem:[#allocation35_spill] sm:$0xff] }
 0x365   :  { %3159 = vpow2.f32 %v2786_v18  ;;  %v1238_v22 = vadd.f32 %v1191_v16, %v822_v38  ;;  %v4574_v38 = vld [vmem:[#allocation36_spill] sm:$0xff] }
 0x366   :  { %3161 = vpow2.f32 %v2788_v35 }
 0x367   :  { %3163 = vtanh.f32 %v1238_v22 }
 0x36e   :  { %v3158_v12 = vpop.eup %3157 }
 0x36f   :  { %v3160_v47 = vpop.eup %3159  ;;  %v1251_v14 = vadd.f32 1.0, %v3158_v12  ;;  %v4575_v12 = vld [vmem:[#allocation28_spill] sm:$0xff] }
 0x370   :  { %v1244_v42 = vadd.f32 1.0, %v3160_v47  ;;  %v3162_v39 = vpop.eup %3161  ;;  %v793_v47 = vmul.f32 %v4575_v12, %v727_v19 }
 0x371   :  { %3165 = vrcp.f32 %v1251_v14  ;;  %v3164_v53 = vpop.eup %3163  ;;  %v1261_v27 = vadd.f32 1.0, %v3162_v39 }
 0x372   :  { %3167 = vrcp.f32 %v1244_v42  ;;  %v4576_v42 = vld [vmem:[#allocation37_spill] sm:$0xff] }
 0x373   :  { %3169 = vrcp.f32 %v1261_v27  ;;  %v795_v39 = vmul.f32 %v4576_v42, %v727_v19 }
 0x37b   :  { %v3166_v34 = vpop.eup %3165 }
 0x37c   :  { %v3168_v18 = vpop.eup %3167  ;;  %v1255_v51 = vmul.f32 %v3166_v34, %v3164_v53  ;;  %v4577_v53 = vld [vmem:[#allocation38_spill] sm:$0xff] }
 0x37d   :  { %v1247_v13 = vmul.f32 %v3168_v18, %v3906_v15  ;;  %v3170_v16 = vpop.eup %3169  ;;  %v4571_v15 = vld [vmem:[#allocation34_spill] sm:$0xff]  ;;  %v4578_v18 = vld [vmem:[#allocation39_spill] sm:$0xff] }
 0x37f   :  { %v3961_v21 = vadd.f32 %v1255_v51, %v1247_v13 }
 0x381   :  { %3171 = vtanh.f32 %v3961_v21  ;;  %1266 = vst [vmem:[#allocation14 + $0x8] sm:$0xff] %v3961_v21 }
 0x38b   :  { %v3172_v50 = vpop.eup %3171 }
 0x38c   :  { %v1264_v11 = vmul.f32 %v3172_v50, %v3170_v16 }
 0x38e   :  { %1265 = vst [vmem:[#allocation13 + $0x8] sm:$0xff] %v1264_v11  ;;  %v1267_v46 = vpack.c.bf16 %v1264_v11, %v1264_v11 }
 0x390   :  { %1301 = vmatmul.mubr.bf16.vlgmr.msra.gmra.mrb[16].mxu1 %v1267_v46  ;;  %1342 = vmatmul.mubr.bf16.vlgmr.msra.gmra.mrb[8].mxu0 %v1267_v46 }
 0x391   :  { %1382 = vmatpush1.bf16.msra.mxu1 %v3652_v24  ;;  %1423 = vmatpush1.bf16.msra.mxu0 %v3705_v59  ;;  %v3997_v24 = vld [vmem:[#allocation5 + $0x4] ss:$16 sps:$4 sm:$0xff]  }
 0x392   :  { %1383 = vmatprep.subr.bf16.mxu1 %v3655_v25  ;;  %1424 = vmatprep.subr.bf16.mxu0 %v3710_v60  ;;  %4566 = vst [vmem:[#allocation29_spill] sm:$0xff] %v3997_v24  ;;  %v414_v25 = vld [vmem:[%s4471_s0 + $0x18] sm:$0xff] }
 0x393   :  { %1413 = vmatprep.mubr.bf16.mxu1 %v4557_v43  ;;  %1454 = vmatprep.mubr.bf16.mxu0 %v4557_v43 }
 0x394   :  { %439 = vperm.xlu1 %2942, %v414_v25   ;;  %598 = vperm.xlu0 %2943, %v414_v25  }
 0x395   :  { %1384 = vmatpush1.bf16.msra.mxu1 %v3658_v29  ;;  %1425 = vmatpush1.bf16.msra.mxu0 %v3712_v61  ;;  %v415_v29 = vld [vmem:[%s4471_s0 + $0x20] sm:$0xff] }
 0x396   :  { %1385 = vmatprep.subr.bf16.mxu1 %v3662_v30  ;;  %1426 = vmatprep.subr.bf16.mxu0 %v3716_v62  ;;  %v4567_v30 = vmov 2  }
 0x398   :  { %2944 = vset.pattern.permute.xlu1 %v4567_v30  ;;  %602 = vperm.xlu0 %2943, %v415_v29  }
 0x399   :  { %1386 = vmatpush1.bf16.msra.mxu1 %v3664_v32  ;;  %1427 = vmatpush1.bf16.msra.mxu0 %v3718_v63  ;;  %v4568_v32 = vmov 1  }
 0x39a   :  { %1387 = vmatprep.subr.bf16.mxu1 %v3666_v33  ;;  %1428 = vmatprep.subr.bf16.mxu0 %v3722_v1  ;;  %v435_v33 = vpop.permute.xlu1 %434 }
 0x39b   :  { %730 = vperm.xlu1 %2944, %v414_v25   ;;  %v511_v35 = vmul.f32 %v4574_v38, %v435_v33  ;;  %v509_v27 = vmul.f32 %v4562_v26, %v435_v33 }
 0x39c   :  { %2947 = vset.pattern.permute.xlu0 %v4557_v43 }
 0x39d   :  { %1388 = vmatpush1.bf16.msra.mxu1 %v3670_v36  ;;  %1429 = vmatpush1.bf16.msra.mxu0 %v3724_v2  ;;  %v508_v36 = vmul.f32 %v3825_v52, %v435_v33  ;;  %v564_v51 = vadd.f32 %v4578_v18, %v511_v35  ;;  %v562_v35 = vadd.f32 %v4564_v17, %v509_v27 }
 0x39e   :  { %1389 = vmatprep.subr.bf16.mxu1 %v3672_v37  ;;  %1430 = vmatprep.subr.bf16.mxu0 %v3728_v3  ;;  %v4569_v37 = vld [vmem:[#allocation33_spill] sm:$0xff] }
 0x39f   :  { %2945 = vset.pattern.permute.xlu1 %v4557_v43  ;;  %v561_v31 = vadd.f32 %v4572_v23, %v508_v36 }
 0x3a0   :  { %444 = vperm.xlu1 %2945, %v415_v29  }
 0x3a1   :  { %1390 = vmatpush1.bf16.msra.mxu1 %v3676_v40  ;;  %1431 = vmatpush1.bf16.msra.mxu0 %v3730_v4  ;;  %v510_v40 = vmul.f32 %v4569_v37, %v435_v33 }
 0x3a2   :  { %1391 = vmatprep.subr.bf16.mxu1 %v3678_v41  ;;  %1432 = vmatprep.subr.bf16.mxu0 %v3734_v5  ;;  %v595_v41 = vpop.permute.xlu1 %594 }
 0x3a3   :  { %v663_v48 = vmul.f32 %v4571_v15, %v595_v41  ;;  %v563_v49 = vadd.f32 %v4573_v54, %v510_v40  ;;  %v664_v34 = vmul.f32 %v4577_v53, %v595_v41 }
 0x3a4   :  { %2946 = vset.pattern.permute.xlu1 %v4567_v30 }
 0x3a5   :  { %1392 = vmatpush1.bf16.msra.mxu1 %v3682_v44  ;;  %1433 = vmatpush1.bf16.msra.mxu0 %v3736_v6  ;;  %v4570_v44 = vld [vmem:[#allocation26_spill] sm:$0xff]  ;;  %v695_v14 = vadd.f32 %v663_v48, %v563_v49  ;;  %v696_v40 = vadd.f32 %v664_v34, %v564_v51  ;;  %v662_v49 = vmul.f32 %v4563_v20, %v595_v41 }
 0x3a6   :  { %1393 = vmatprep.subr.bf16.mxu1 %v3684_v45  ;;  %1434 = vmatprep.subr.bf16.mxu0 %v3740_v7  ;;  %v661_v45 = vmul.f32 %v4570_v44, %v595_v41 }
 0x3a7   :  { %734 = vperm.xlu1 %2946, %v415_v29   ;;  %v827_v16 = vadd.f32 %v795_v39, %v695_v14  ;;  %v694_v14 = vadd.f32 %v662_v49, %v562_v35  ;;  %v794_v39 = vmul.f32 %v4565_v28, %v727_v19  ;;  %v4038_v35 = vld [vmem:[#allocation5] ss:$16 sps:$4 sm:$0xff]  }
 0x3a8   :  { %v693_v22 = vadd.f32 %v661_v45, %v561_v31  ;;  %v796_v45 = vmul.f32 %v3902_v0, %v727_v19 }
 0x3a9   :  { %1394 = vmatpush1.bf16.msra.mxu1 %v3694_v55  ;;  %1435 = vmatpush1.bf16.msra.mxu0 %v3742_v8  ;;  %v826_v34 = vadd.f32 %v794_v39, %v694_v14 }
 0x3aa   :  { %1395 = vmatprep.subr.bf16.mxu1 %v3697_v56  ;;  %1436 = vmatprep.subr.bf16.mxu0 %v3746_v9  ;;  %v825_v13 = vadd.f32 %v793_v47, %v693_v22  ;;  %v828_v47 = vadd.f32 %v796_v45, %v696_v40 }
 0x3ab   :  { %2948 = vset.pattern.permute.xlu1 %v4568_v32 }
 0x3ad   :  { %1396 = vmatpush1.bf16.msra.mxu1 %v3699_v57  ;;  %1437 = vmatpush1.bf16.msra.mxu0 %v3748_v10 }
 0x3ae   :  { %1494 = vmatprep.subr.bf16.mxu1 %v3997_v24  ;;  %1535 = vmatprep.subr.bf16.mxu0 %v3703_v58 }
 0x463   :  { %v1302_v50 = vpop.f32.mrb[16].mxu1  ;;  %v1343_v11 = vpop.f32.mrb[8].mxu0 }
 0x464   :  { %v1350_v46 = vadd.f32 %v1302_v50, %v825_v13  ;;  %v1352_v25 = vadd.f32 %v1343_v11, %v827_v16  ;;  %v1304_v29 = vpop.f32.mrb[17].mxu1  ;;  %v1345_v36 = vpop.f32.mrb[9].mxu0 }
 0x465   :  { %v1306_v48 = vpop.f32.mrb[18].mxu1  ;;  %v1347_v31 = vpop.f32.mrb[10].mxu0  ;;  %v1353_v13 = vadd.f32 %v1345_v36, %v828_v47  ;;  %v1351_v16 = vadd.f32 %v1304_v29, %v826_v34  ;;  %v4064_v47 = vld [vmem:[#allocation5 + $0x60] ss:$16 sps:$4 sm:$0xff]  }
 0x466   :  { %v2790_v32 = vmul.f32 -1.442695, %v1350_v46  ;;  %v2789_v30 = vmul.f32 -1.442695, %v1352_v25  ;;  %v1307_v33 = vpop.f32.mrb[19].mxu1  ;;  %v1348_v22 = vpop.f32.mrb[11].mxu0 }
 0x467   :  { %v2791_v51 = vmul.f32 -1.442695, %v1353_v13  ;;  %v4048_v33 = vld [vmem:[#allocation5 + $0x20] ss:$16 sps:$4 sm:$0xff]   ;;  %v4052_v22 = vld [vmem:[#allocation5 + $0x44] ss:$16 sps:$4 sm:$0xff]  }
 0x468   :  { %3173 = vpow2.f32 %v2790_v32 }
 0x469   :  { %3175 = vpow2.f32 %v2789_v30 }
 0x46a   :  { %3177 = vpow2.f32 %v2791_v51 }
 0x46b   :  { %3179 = vtanh.f32 %v1351_v16 }
 0x472   :  { %v3174_v50 = vpop.eup %3173 }
 0x473   :  { %v3176_v11 = vpop.eup %3175  ;;  %v1364_v48 = vadd.f32 1.0, %v3174_v50 }
 0x474   :  { %v1357_v41 = vadd.f32 1.0, %v3176_v11  ;;  %v3178_v27 = vpop.eup %3177 }
 0x475   :  { %3181 = vrcp.f32 %v1364_v48  ;;  %v3180_v46 = vpop.eup %3179  ;;  %v1374_v40 = vadd.f32 1.0, %v3178_v27 }
 0x476   :  { %3183 = vrcp.f32 %v1357_v41 }
 0x477   :  { %3185 = vrcp.f32 %v1374_v40 }
 0x47f   :  { %v3182_v32 = vpop.eup %3181 }
 0x480   :  { %v3184_v30 = vpop.eup %3183  ;;  %v1368_v25 = vmul.f32 %v3182_v32, %v3180_v46 }
 0x481   :  { %v1360_v19 = vmul.f32 %v3184_v30, %v3961_v21  ;;  %v3186_v29 = vpop.eup %3185  ;;  %v4042_v21 = vld [vmem:[#allocation5 + $0x24] ss:$16 sps:$4 sm:$0xff]  }
 0x483   :  { %v4029_v36 = vadd.f32 %v1368_v25, %v1360_v19 }
 0x485   :  { %3187 = vtanh.f32 %v4029_v36  ;;  %1379 = vst [vmem:[#allocation14 + $0x10] sm:$0xff] %v4029_v36 }
 0x48f   :  { %v3188_v45 = vpop.eup %3187 }
 0x490   :  { %v4033_v31 = vmul.f32 %v3188_v45, %v3186_v29 }
 0x492   :  { %4579 = vst [vmem:[#allocation30_spill] sm:$0xff] %v4033_v31  ;;  %1378 = vst [vmem:[#allocation13 + $0x10] sm:$0xff] %v4033_v31  ;;  %v1380_v49 = vpack.c.bf16 %v4033_v31, %v4033_v31 }
 0x494   :  { %1414 = vmatmul.mubr.bf16.vlgmr.msra.gmra.mrb[20].mxu1 %v1380_v49  ;;  %1455 = vmatmul.mubr.bf16.vlgmr.msra.gmra.mrb[12].mxu0 %v1380_v49 }
 0x495   :  { %1495 = vmatpush1.bf16.msra.mxu1 %v4038_v35  ;;  %1536 = vmatpush1.bf16.msra.mxu0 %v3705_v59  ;;  %v4056_v59 = vld [vmem:[#allocation5 + $0x40] ss:$16 sps:$4 sm:$0xff]  }
 0x496   :  { %1496 = vmatprep.subr.bf16.mxu1 %v4042_v21  ;;  %1537 = vmatprep.subr.bf16.mxu0 %v3710_v60  ;;  %v4060_v60 = vld [vmem:[#allocation5 + $0x64] ss:$16 sps:$4 sm:$0xff]  }
 0x497   :  { %1526 = vmatprep.mubr.bf16.mxu1 %v4557_v43  ;;  %1567 = vmatprep.mubr.bf16.mxu0 %v4557_v43 }
 0x499   :  { %1497 = vmatpush1.bf16.msra.mxu1 %v4048_v33  ;;  %1538 = vmatpush1.bf16.msra.mxu0 %v3712_v61  ;;  %v4068_v61 = vld [vmem:[#allocation5 + $0x84] ss:$16 sps:$4 sm:$0xff]  }
 0x49a   :  { %1498 = vmatprep.subr.bf16.mxu1 %v4052_v22  ;;  %1539 = vmatprep.subr.bf16.mxu0 %v3716_v62  ;;  %v4072_v62 = vld [vmem:[#allocation5 + $0x80] ss:$16 sps:$4 sm:$0xff]  }
 0x49d   :  { %1499 = vmatpush1.bf16.msra.mxu1 %v4056_v59  ;;  %1540 = vmatpush1.bf16.msra.mxu0 %v3718_v63  ;;  %v4076_v63 = vld [vmem:[#allocation5 + $0xa4] ss:$16 sps:$4 sm:$0xff]  }
 0x49e   :  { %1500 = vmatprep.subr.bf16.mxu1 %v4060_v60  ;;  %1541 = vmatprep.subr.bf16.mxu0 %v3722_v1  ;;  %v4080_v1 = vld [vmem:[#allocation5 + $0xa0] ss:$16 sps:$4 sm:$0xff]  }
 0x4a1   :  { %1501 = vmatpush1.bf16.msra.mxu1 %v4064_v47  ;;  %1542 = vmatpush1.bf16.msra.mxu0 %v3724_v2  ;;  %v4084_v2 = vld [vmem:[#allocation5 + $0xc4] ss:$16 sps:$4 sm:$0xff]  }
 0x4a2   :  { %1502 = vmatprep.subr.bf16.mxu1 %v4068_v61  ;;  %1543 = vmatprep.subr.bf16.mxu0 %v3728_v3  ;;  %v440_v3 = vpop.permute.xlu1 %439 }
 0x4a3   :  { %v515_v39 = vmul.f32 %v4574_v38, %v440_v3  ;;  %v513_v50 = vmul.f32 %v4562_v26, %v440_v3 }
 0x4a5   :  { %1503 = vmatpush1.bf16.msra.mxu1 %v4072_v62  ;;  %1544 = vmatpush1.bf16.msra.mxu0 %v3730_v4  ;;  %v512_v4 = vmul.f32 %v3825_v52, %v440_v3  ;;  %v568_v16 = vadd.f32 %v4578_v18, %v515_v39 }
 0x4a6   :  { %1504 = vmatprep.subr.bf16.mxu1 %v4076_v63  ;;  %1545 = vmatprep.subr.bf16.mxu0 %v3734_v5  ;;  %v514_v5 = vmul.f32 %v4569_v37, %v440_v3 }
 0x4a9   :  { %1505 = vmatpush1.bf16.msra.mxu1 %v4080_v1  ;;  %1546 = vmatpush1.bf16.msra.mxu0 %v3736_v6 }
 0x4aa   :  { %1506 = vmatprep.subr.bf16.mxu1 %v4084_v2  ;;  %1547 = vmatprep.subr.bf16.mxu0 %v3740_v7  ;;  %v565_v7 = vadd.f32 %v4572_v23, %v512_v4  ;;  %v566_v4 = vadd.f32 %v4564_v17, %v513_v50 }
 0x4ad   :  { %1507 = vmatpush1.bf16.msra.mxu1 %v3694_v55  ;;  %1548 = vmatpush1.bf16.msra.mxu0 %v3742_v8  ;;  %v599_v55 = vpop.permute.xlu0 %598  ;;  %v731_v8 = vpop.permute.xlu1 %730 }
 0x4ae   :  { %1508 = vmatprep.subr.bf16.mxu1 %v3697_v56  ;;  %1549 = vmatprep.subr.bf16.mxu0 %v3746_v9  ;;  %v665_v6 = vmul.f32 %v4570_v44, %v599_v55  ;;  %v667_v56 = vmul.f32 %v4571_v15, %v599_v55  ;;  %v668_v51 = vmul.f32 %v4577_v53, %v599_v55 }
 0x4af   :  { %v800_v25 = vmul.f32 %v3902_v0, %v731_v8  ;;  %v666_v29 = vmul.f32 %v4563_v20, %v599_v55 }
 0x4b0   :  { %v697_v9 = vadd.f32 %v665_v6, %v565_v7  ;;  %v700_v30 = vadd.f32 %v668_v51, %v568_v16  ;;  %v798_v7 = vmul.f32 %v4565_v28, %v731_v8 }
 0x4b1   :  { %1509 = vmatpush1.bf16.msra.mxu1 %v3699_v57  ;;  %1550 = vmatpush1.bf16.msra.mxu0 %v3748_v10  ;;  %v567_v57 = vadd.f32 %v4573_v54, %v514_v5  ;;  %v797_v10 = vmul.f32 %v4575_v12, %v731_v8 }
 0x4b2   :  { %1607 = vmatprep.subr.bf16.mxu1 %v3997_v24  ;;  %1648 = vmatprep.subr.bf16.mxu0 %v3703_v58  ;;  %v799_v58 = vmul.f32 %v4576_v42, %v731_v8  ;;  %v832_v3 = vadd.f32 %v800_v25, %v700_v30  ;;  %v4127_v25 = vld [vmem:[#allocation5 + $0x2c] ss:$16 sps:$4 sm:$0xff]  }
 0x4b3   :  { %v699_v14 = vadd.f32 %v667_v56, %v567_v57  ;;  %v829_v13 = vadd.f32 %v797_v10, %v697_v9  ;;  %v698_v56 = vadd.f32 %v666_v29, %v566_v4  ;;  %v4141_v29 = vld [vmem:[#allocation5 + $0x48] ss:$16 sps:$4 sm:$0xff]   ;;  %v4153_v4 = vld [vmem:[#allocation5 + $0x8c] ss:$16 sps:$4 sm:$0xff]  }
 0x4b5   :  { %v831_v34 = vadd.f32 %v799_v58, %v699_v14  ;;  %v830_v9 = vadd.f32 %v798_v7, %v698_v56  ;;  %v4169_v56 = vld [vmem:[#allocation5 + $0xcc] ss:$16 sps:$4 sm:$0xff]   ;;  %v4172_v7 = vld [vmem:[#allocation5 + $0xc0] ss:$16 sps:$4 sm:$0xff]  }
 0x567   :  { %v1415_v11 = vpop.f32.mrb[20].mxu1  ;;  %v1456_v48 = vpop.f32.mrb[12].mxu0 }
 0x568   :  { %v1463_v41 = vadd.f32 %v1415_v11, %v829_v13  ;;  %v1465_v27 = vadd.f32 %v1456_v48, %v831_v34  ;;  %v1417_v46 = vpop.f32.mrb[21].mxu1  ;;  %v1458_v32 = vpop.f32.mrb[13].mxu0 }
 0x569   :  { %v1419_v40 = vpop.f32.mrb[22].mxu1  ;;  %v1460_v19 = vpop.f32.mrb[14].mxu0  ;;  %v1466_v57 = vadd.f32 %v1458_v32, %v832_v3  ;;  %v1464_v14 = vadd.f32 %v1417_v46, %v830_v9  ;;  %v4165_v3 = vld [vmem:[#allocation5 + $0xa8] ss:$16 sps:$4 sm:$0xff]   ;;  %v4178_v9 = vld [vmem:[#allocation5 + $0xe4] ss:$16 sps:$4 sm:$0xff]  }
 0x56a   :  { %v2793_v45 = vmul.f32 -1.442695, %v1463_v41  ;;  %v2792_v49 = vmul.f32 -1.442695, %v1465_v27  ;;  %v1420_v5 = vpop.f32.mrb[23].mxu1  ;;  %v1461_v6 = vpop.f32.mrb[15].mxu0 }
 0x56b   :  { %v2794_v10 = vmul.f32 -1.442695, %v1466_v57  ;;  %v4133_v40 = vld [vmem:[#allocation5 + $0x28] ss:$16 sps:$4 sm:$0xff]   ;;  %v4137_v19 = vld [vmem:[#allocation5 + $0x4c] ss:$16 sps:$4 sm:$0xff]  }
 0x56c   :  { %3189 = vpow2.f32 %v2793_v45  ;;  %v4145_v45 = vld [vmem:[#allocation5 + $0x6c] ss:$16 sps:$4 sm:$0xff]   ;;  %v4157_v5 = vld [vmem:[#allocation5 + $0x88] ss:$16 sps:$4 sm:$0xff]  }
 0x56d   :  { %3191 = vpow2.f32 %v2792_v49  ;;  %v4149_v49 = vld [vmem:[#allocation5 + $0x68] ss:$16 sps:$4 sm:$0xff]   ;;  %v4161_v6 = vld [vmem:[#allocation5 + $0xac] ss:$16 sps:$4 sm:$0xff]  }
 0x56e   :  { %3193 = vpow2.f32 %v2794_v10  ;;  %v4175_v57 = vld [vmem:[#allocation5 + $0xc8] ss:$16 sps:$4 sm:$0xff]   ;;  %v4181_v10 = vld [vmem:[#allocation5 + $0xec] ss:$16 sps:$4 sm:$0xff]  }
 0x56f   :  { %3195 = vtanh.f32 %v1464_v14  ;;  %v4184_v14 = vld [vmem:[#allocation5 + $0xe0] ss:$16 sps:$4 sm:$0xff]  }
 0x576   :  { %v3190_v58 = vpop.eup %3189 }
 0x577   :  { %v3192_v39 = vpop.eup %3191  ;;  %v1477_v13 = vadd.f32 1.0, %v3190_v58  ;;  %v4187_v58 = vld [vmem:[#allocation5 + $0xe8] ss:$16 sps:$4 sm:$0xff]  }
 0x578   :  { %v1470_v55 = vadd.f32 1.0, %v3192_v39  ;;  %v3194_v34 = vpop.eup %3193  ;;  %v4191_v39 = vld [vmem:[#allocation5 + $0xc] ss:$16 sps:$4 sm:$0xff]  }
 0x579   :  { %3197 = vrcp.f32 %v1477_v13  ;;  %v3196_v51 = vpop.eup %3195  ;;  %v1487_v48 = vadd.f32 1.0, %v3194_v34  ;;  %4581 = vst [vmem:[#allocation32_spill] sm:$0xff] %v4191_v39  ;;  %v416_v13 = vld [vmem:[%s4471_s0 + $0x28] sm:$0xff]  ;;  %v4582_v34 = vmov 2  }
 0x57a   :  { %3199 = vrcp.f32 %v1470_v55  ;;  %606 = vperm.xlu1 %2948, %v416_v13   ;;  %449 = vperm.xlu0 %2947, %v416_v13   ;;  %v417_v55 = vld [vmem:[%s4471_s0 + $0x30] sm:$0xff] }
 0x57b   :  { %3201 = vrcp.f32 %v1487_v48  ;;  %v603_v48 = vpop.permute.xlu0 %602 }
 0x57e   :  { %2949 = vset.pattern.permute.xlu1 %v4582_v34  ;;  %454 = vperm.xlu0 %2947, %v417_v55  }
 0x57f   :  { %738 = vperm.xlu1 %2949, %v416_v13  }
 0x582   :  { %2951 = vset.pattern.permute.xlu0 %v4582_v34 }
 0x583   :  { %v3198_v16 = vpop.eup %3197  ;;  %742 = vperm.xlu0 %2951, %v417_v55  }
 0x584   :  { %v3200_v50 = vpop.eup %3199  ;;  %v1481_v11 = vmul.f32 %v3198_v16, %v3196_v51  ;;  %v4583_v51 = vmov 1   ;;  %v445_v16 = vpop.permute.xlu1 %444 }
 0x585   :  { %v1473_v8 = vmul.f32 %v3200_v50, %v4029_v36  ;;  %v3202_v27 = vpop.eup %3201  ;;  %v4123_v36 = vld [vmem:[#allocation5 + $0x8] ss:$16 sps:$4 sm:$0xff]   ;;  %2950 = vset.pattern.permute.xlu1 %v4583_v51  ;;  %v516_v50 = vmul.f32 %v3825_v52, %v445_v16  ;;  %v519_v34 = vmul.f32 %v4574_v38, %v445_v16 }
 0x586   :  { %610 = vperm.xlu1 %2950, %v417_v55  }
 0x587   :  { %v4113_v41 = vadd.f32 %v1481_v11, %v1473_v8  ;;  %v518_v11 = vmul.f32 %v4569_v37, %v445_v16  ;;  %v669_v8 = vmul.f32 %v4570_v44, %v603_v48  ;;  %v672_v37 = vmul.f32 %v4577_v53, %v603_v48 }
 0x588   :  { %v735_v13 = vpop.permute.xlu1 %734  ;;  %v572_v51 = vadd.f32 %v4578_v18, %v519_v34  ;;  %v517_v44 = vmul.f32 %v4562_v26, %v445_v16 }
 0x589   :  { %3203 = vtanh.f32 %v4113_v41  ;;  %1492 = vst [vmem:[#allocation14 + $0x18] sm:$0xff] %v4113_v41  ;;  %v803_v52 = vmul.f32 %v4576_v42, %v735_v13  ;;  %v670_v42 = vmul.f32 %v4563_v20, %v603_v48 }
 0x58a   :  { %2952 = vset.pattern.permute.xlu1 %v4557_v43  ;;  %v570_v34 = vadd.f32 %v4564_v17, %v517_v44 }
 0x593   :  { %v3204_v46 = vpop.eup %3203 }
 0x594   :  { %v4117_v32 = vmul.f32 %v3204_v46, %v3202_v27  ;;  %v671_v27 = vmul.f32 %v4571_v15, %v603_v48  ;;  %v569_v46 = vadd.f32 %v4572_v23, %v516_v50 }
 0x596   :  { %4580 = vst [vmem:[#allocation31_spill] sm:$0xff] %v4117_v32  ;;  %1491 = vst [vmem:[#allocation13 + $0x18] sm:$0xff] %v4117_v32  ;;  %v1493_v30 = vpack.c.bf16 %v4117_v32, %v4117_v32  ;;  %v701_v55 = vadd.f32 %v669_v8, %v569_v46  ;;  %v801_v32 = vmul.f32 %v4575_v12, %v735_v13 }
 0x597   :  { %v704_v8 = vadd.f32 %v672_v37, %v572_v51  ;;  %v804_v46 = vmul.f32 %v3902_v0, %v735_v13 }
 0x598   :  { %1527 = vmatmul.mubr.bf16.vlgmr.msra.gmra.mrb[24].mxu1 %v1493_v30  ;;  %1568 = vmatmul.mubr.bf16.vlgmr.msra.gmra.mrb[16].mxu0 %v1493_v30  ;;  %v571_v30 = vadd.f32 %v4573_v54, %v518_v11  ;;  %v833_v15 = vadd.f32 %v801_v32, %v701_v55 }
 0x599   :  { %1608 = vmatpush1.bf16.msra.mxu1 %v4038_v35  ;;  %1649 = vmatpush1.bf16.msra.mxu0 %v4123_v36 }
 0x59a   :  { %1609 = vmatprep.subr.bf16.mxu1 %v4042_v21  ;;  %1650 = vmatprep.subr.bf16.mxu0 %v4127_v25  ;;  %v703_v31 = vadd.f32 %v671_v27, %v571_v30 }
 0x59b   :  { %1639 = vmatprep.mubr.bf16.mxu1 %v4557_v43  ;;  %1680 = vmatprep.mubr.bf16.mxu0 %v4557_v43 }
 0x59d   :  { %1610 = vmatpush1.bf16.msra.mxu1 %v4048_v33  ;;  %1651 = vmatpush1.bf16.msra.mxu0 %v4133_v40 }
 0x59e   :  { %1611 = vmatprep.subr.bf16.mxu1 %v4052_v22  ;;  %1652 = vmatprep.subr.bf16.mxu0 %v4137_v19 }
 0x5a1   :  { %1612 = vmatpush1.bf16.msra.mxu1 %v4056_v59  ;;  %1653 = vmatpush1.bf16.msra.mxu0 %v4141_v29 }
 0x5a2   :  { %1613 = vmatprep.subr.bf16.mxu1 %v4060_v60  ;;  %1654 = vmatprep.subr.bf16.mxu0 %v4145_v45 }
 0x5a5   :  { %1614 = vmatpush1.bf16.msra.mxu1 %v4064_v47  ;;  %1655 = vmatpush1.bf16.msra.mxu0 %v4149_v49 }
 0x5a6   :  { %1615 = vmatprep.subr.bf16.mxu1 %v4068_v61  ;;  %1656 = vmatprep.subr.bf16.mxu0 %v4153_v4 }
 0x5a9   :  { %1616 = vmatpush1.bf16.msra.mxu1 %v4072_v62  ;;  %1657 = vmatpush1.bf16.msra.mxu0 %v4157_v5 }
 0x5aa   :  { %1617 = vmatprep.subr.bf16.mxu1 %v4076_v63  ;;  %1658 = vmatprep.subr.bf16.mxu0 %v4161_v6 }
 0x5ad   :  { %1618 = vmatpush1.bf16.msra.mxu1 %v4080_v1  ;;  %1659 = vmatpush1.bf16.msra.mxu0 %v4165_v3 }
 0x5ae   :  { %1619 = vmatprep.subr.bf16.mxu1 %v4084_v2  ;;  %1660 = vmatprep.subr.bf16.mxu0 %v4169_v56 }
 0x5b1   :  { %1620 = vmatpush1.bf16.msra.mxu1 %v4172_v7  ;;  %1661 = vmatpush1.bf16.msra.mxu0 %v4175_v57 }
 0x5b2   :  { %1621 = vmatprep.subr.bf16.mxu1 %v4178_v9  ;;  %1662 = vmatprep.subr.bf16.mxu0 %v4181_v10 }
 0x5b5   :  { %1622 = vmatpush1.bf16.msra.mxu1 %v4184_v14  ;;  %1663 = vmatpush1.bf16.msra.mxu0 %v4187_v58 }
 0x5b6   :  { %1720 = vmatprep.subr.bf16.mxu1 %v3997_v24  ;;  %1761 = vmatprep.subr.bf16.mxu0 %v4191_v39  ;;  %v835_v39 = vadd.f32 %v803_v52, %v703_v31  ;;  %v836_v52 = vadd.f32 %v804_v46, %v704_v8 }
 0x66b   :  { %v1528_v50 = vpop.f32.mrb[24].mxu1  ;;  %v1569_v23 = vpop.f32.mrb[16].mxu0 }
 0x66c   :  { %v1576_v11 = vadd.f32 %v1528_v50, %v833_v15  ;;  %v1578_v54 = vadd.f32 %v1569_v23, %v835_v39  ;;  %v1530_v24 = vpop.f32.mrb[25].mxu1  ;;  %v1571_v38 = vpop.f32.mrb[17].mxu0  ;;  %v702_v15 = vadd.f32 %v670_v42, %v570_v34  ;;  %v802_v23 = vmul.f32 %v4565_v28, %v735_v13  ;;  %v4586_v34 = vld [vmem:[#allocation32_spill] sm:$0xff] }
 0x66d   :  { %v1532_v27 = vpop.f32.mrb[26].mxu1  ;;  %v1573_v30 = vpop.f32.mrb[18].mxu0  ;;  %v1579_v31 = vadd.f32 %v1571_v38, %v836_v52 }
 0x66e   :  { %v2796_v53 = vmul.f32 -1.442695, %v1576_v11  ;;  %v2795_v12 = vmul.f32 -1.442695, %v1578_v54  ;;  %v1533_v16 = vpop.f32.mrb[27].mxu1  ;;  %v1574_v32 = vpop.f32.mrb[19].mxu0  ;;  %v834_v37 = vadd.f32 %v802_v23, %v702_v15 }
 0x66f   :  { %v2797_v39 = vmul.f32 -1.442695, %v1579_v31  ;;  %v418_v16 = vld [vmem:[%s4471_s0 + $0x38] sm:$0xff]  ;;  %v4587_v32 = vmov 1   ;;  %v450_v52 = vpop.permute.xlu0 %449  ;;  %v4588_v15 = vld [vmem:[#allocation24_spill] sm:$0xff] }
 0x670   :  { %3205 = vpow2.f32 %v2796_v53  ;;  %v1577_v51 = vadd.f32 %v1530_v24, %v834_v37  ;;  %459 = vperm.xlu1 %2952, %v418_v16   ;;  %746 = vperm.xlu0 %2951, %v418_v16   ;;  %v520_v23 = vmul.f32 %v4588_v15, %v450_v52  ;;  %v4589_v31 = vld [vmem:[#allocation33_spill] sm:$0xff] }
 0x671   :  { %3207 = vpow2.f32 %v2795_v12  ;;  %v522_v37 = vmul.f32 %v4589_v31, %v450_v52 }
 0x672   :  { %3209 = vpow2.f32 %v2797_v39  ;;  %v607_v39 = vpop.permute.xlu1 %606 }
 0x673   :  { %3211 = vtanh.f32 %v1577_v51  ;;  %v4590_v51 = vld [vmem:[#allocation26_spill] sm:$0xff] }
 0x674   :  { %2953 = vset.pattern.permute.xlu1 %v4587_v32 }
 0x675   :  { %614 = vperm.xlu1 %2953, %v418_v16   ;;  %v4597_v16 = vld [vmem:[#allocation38_spill] sm:$0xff] }
 0x676   :  { %v676_v32 = vmul.f32 %v4597_v16, %v607_v39 }
 0x67a   :  { %v3206_v55 = vpop.eup %3205 }
 0x67b   :  { %v3208_v50 = vpop.eup %3207  ;;  %v1590_v27 = vadd.f32 1.0, %v3206_v55  ;;  %v673_v55 = vmul.f32 %v4590_v51, %v607_v39  ;;  %v521_v51 = vmul.f32 %v4562_v26, %v450_v52 }
 0x67c   :  { %v1583_v48 = vadd.f32 1.0, %v3208_v50  ;;  %v3210_v44 = vpop.eup %3209  ;;  %v4591_v50 = vld [vmem:[#allocation34_spill] sm:$0xff] }
 0x67d   :  { %3213 = vrcp.f32 %v1590_v27  ;;  %v3212_v54 = vpop.eup %3211  ;;  %v1600_v42 = vadd.f32 1.0, %v3210_v44  ;;  %v675_v27 = vmul.f32 %v4591_v50, %v607_v39 }
 0x67e   :  { %3215 = vrcp.f32 %v1583_v48  ;;  %v4592_v48 = vld [vmem:[#allocation27_spill] sm:$0xff] }
 0x67f   :  { %3217 = vrcp.f32 %v1600_v42  ;;  %v573_v44 = vadd.f32 %v4592_v48, %v520_v23  ;;  %v739_v42 = vpop.permute.xlu1 %738 }
 0x687   :  { %v3214_v53 = vpop.eup %3213 }
 0x688   :  { %v3216_v12 = vpop.eup %3215  ;;  %v1594_v11 = vmul.f32 %v3214_v53, %v3212_v54  ;;  %v4593_v54 = vld [vmem:[#allocation35_spill] sm:$0xff] }
 0x689   :  { %v1586_v13 = vmul.f32 %v3216_v12, %v4113_v41  ;;  %v3218_v24 = vpop.eup %3217  ;;  %v4585_v41 = vld [vmem:[#allocation29_spill] sm:$0xff]  ;;  %v575_v53 = vadd.f32 %v4593_v54, %v522_v37  ;;  %v4594_v12 = vld [vmem:[#allocation36_spill] sm:$0xff] }
 0x68b   :  { %v4221_v38 = vadd.f32 %v1594_v11, %v1586_v13  ;;  %v523_v11 = vmul.f32 %v4594_v12, %v450_v52  ;;  %v705_v13 = vadd.f32 %v673_v55, %v573_v44  ;;  %v808_v44 = vmul.f32 %v3902_v0, %v739_v42 }
 0x68d   :  { %3219 = vtanh.f32 %v4221_v38  ;;  %1605 = vst [vmem:[#allocation14 + $0x20] sm:$0xff] %v4221_v38 }
 0x697   :  { %v3220_v8 = vpop.eup %3219 }
 0x698   :  { %v4225_v46 = vmul.f32 %v3220_v8, %v3218_v24  ;;  %v4595_v24 = vld [vmem:[#allocation28_spill] sm:$0xff] }
 0x699   :  { %v805_v8 = vmul.f32 %v4595_v24, %v739_v42 }
 0x69a   :  { %4584 = vst [vmem:[#allocation39_spill] sm:$0xff] %v4225_v46  ;;  %1604 = vst [vmem:[#allocation13 + $0x20] sm:$0xff] %v4225_v46  ;;  %v1606_v30 = vpack.c.bf16 %v4225_v46, %v4225_v46  ;;  %v576_v46 = vadd.f32 %v4578_v18, %v523_v11  ;;  %v574_v11 = vadd.f32 %v4564_v17, %v521_v51 }
 0x69b   :  { %v837_v50 = vadd.f32 %v805_v8, %v705_v13 }
 0x69c   :  { %1640 = vmatmul.mubr.bf16.vlgmr.msra.gmra.mrb[28].mxu1 %v1606_v30  ;;  %1681 = vmatmul.mubr.bf16.vlgmr.msra.gmra.mrb[20].mxu0 %v1606_v30  ;;  %v707_v30 = vadd.f32 %v675_v27, %v575_v53  ;;  %v708_v55 = vadd.f32 %v676_v32, %v576_v46 }
 0x69d   :  { %1721 = vmatpush1.bf16.msra.mxu1 %v4038_v35  ;;  %1762 = vmatpush1.bf16.msra.mxu0 %v4123_v36 }
 0x69e   :  { %1722 = vmatprep.subr.bf16.mxu1 %v4042_v21  ;;  %1763 = vmatprep.subr.bf16.mxu0 %v4127_v25  ;;  %v840_v8 = vadd.f32 %v808_v44, %v708_v55 }
 0x69f   :  { %1752 = vmatprep.mubr.bf16.mxu1 %v4557_v43  ;;  %1793 = vmatprep.mubr.bf16.mxu0 %v4557_v43 }
 0x6a1   :  { %1723 = vmatpush1.bf16.msra.mxu1 %v4048_v33  ;;  %1764 = vmatpush1.bf16.msra.mxu0 %v4133_v40 }
 0x6a2   :  { %1724 = vmatprep.subr.bf16.mxu1 %v4052_v22  ;;  %1765 = vmatprep.subr.bf16.mxu0 %v4137_v19 }
 0x6a5   :  { %1725 = vmatpush1.bf16.msra.mxu1 %v4056_v59  ;;  %1766 = vmatpush1.bf16.msra.mxu0 %v4141_v29 }
 0x6a6   :  { %1726 = vmatprep.subr.bf16.mxu1 %v4060_v60  ;;  %1767 = vmatprep.subr.bf16.mxu0 %v4145_v45 }
 0x6a9   :  { %1727 = vmatpush1.bf16.msra.mxu1 %v4064_v47  ;;  %1768 = vmatpush1.bf16.msra.mxu0 %v4149_v49 }
 0x6aa   :  { %1728 = vmatprep.subr.bf16.mxu1 %v4068_v61  ;;  %1769 = vmatprep.subr.bf16.mxu0 %v4153_v4 }
 0x6ad   :  { %1729 = vmatpush1.bf16.msra.mxu1 %v4072_v62  ;;  %1770 = vmatpush1.bf16.msra.mxu0 %v4157_v5 }
 0x6ae   :  { %1730 = vmatprep.subr.bf16.mxu1 %v4076_v63  ;;  %1771 = vmatprep.subr.bf16.mxu0 %v4161_v6 }
 0x6b1   :  { %1731 = vmatpush1.bf16.msra.mxu1 %v4080_v1  ;;  %1772 = vmatpush1.bf16.msra.mxu0 %v4165_v3 }
 0x6b2   :  { %1732 = vmatprep.subr.bf16.mxu1 %v4084_v2  ;;  %1773 = vmatprep.subr.bf16.mxu0 %v4169_v56 }
 0x6b5   :  { %1733 = vmatpush1.bf16.msra.mxu1 %v4172_v7  ;;  %1774 = vmatpush1.bf16.msra.mxu0 %v4175_v57 }
 0x6b6   :  { %1734 = vmatprep.subr.bf16.mxu1 %v4178_v9  ;;  %1775 = vmatprep.subr.bf16.mxu0 %v4181_v10 }
 0x6b9   :  { %1735 = vmatpush1.bf16.msra.mxu1 %v4184_v14  ;;  %1776 = vmatpush1.bf16.msra.mxu0 %v4187_v58 }
 0x6ba   :  { %1833 = vmatprep.subr.bf16.mxu1 %v4585_v41  ;;  %1874 = vmatprep.subr.bf16.mxu0 %v4586_v34  ;;  %v4596_v41 = vld [vmem:[#allocation37_spill] sm:$0xff] }
 0x6bb   :  { %v807_v34 = vmul.f32 %v4596_v41, %v739_v42  ;;  %v674_v41 = vmul.f32 %v4563_v20, %v607_v39 }
 0x6bd   :  { %v839_v31 = vadd.f32 %v807_v34, %v707_v30 }
 0x76f   :  { %v1641_v23 = vpop.f32.mrb[28].mxu1  ;;  %v1682_v48 = vpop.f32.mrb[20].mxu0 }
 0x770   :  { %v1689_v37 = vadd.f32 %v1641_v23, %v837_v50  ;;  %v1691_v54 = vadd.f32 %v1682_v48, %v839_v31  ;;  %v1643_v12 = vpop.f32.mrb[29].mxu1  ;;  %v1684_v15 = vpop.f32.mrb[21].mxu0  ;;  %v706_v50 = vadd.f32 %v674_v41, %v574_v11  ;;  %v806_v31 = vmul.f32 %v4565_v28, %v739_v42 }
 0x771   :  { %v1645_v27 = vpop.f32.mrb[30].mxu1  ;;  %v1686_v53 = vpop.f32.mrb[22].mxu0  ;;  %v1692_v48 = vadd.f32 %v1684_v15, %v840_v8 }
 0x772   :  { %v2799_v16 = vmul.f32 -1.442695, %v1689_v37  ;;  %v2798_v24 = vmul.f32 -1.442695, %v1691_v54  ;;  %v1646_v52 = vpop.f32.mrb[31].mxu1  ;;  %v1687_v13 = vpop.f32.mrb[23].mxu0  ;;  %v838_v46 = vadd.f32 %v806_v31, %v706_v50 }
 0x773   :  { %v2800_v30 = vmul.f32 -1.442695, %v1692_v48 }
 0x774   :  { %3221 = vpow2.f32 %v2799_v16  ;;  %v1690_v34 = vadd.f32 %v1643_v12, %v838_v46 }
 0x775   :  { %3223 = vpow2.f32 %v2798_v24 }
 0x776   :  { %3225 = vpow2.f32 %v2800_v30 }
 0x777   :  { %3227 = vtanh.f32 %v1690_v34 }
 0x77e   :  { %v3222_v32 = vpop.eup %3221 }
 0x77f   :  { %v3224_v23 = vpop.eup %3223  ;;  %v1703_v27 = vadd.f32 1.0, %v3222_v32 }
 0x780   :  { %v1696_v39 = vadd.f32 1.0, %v3224_v23  ;;  %v3226_v51 = vpop.eup %3225 }
 0x781   :  { %3229 = vrcp.f32 %v1703_v27  ;;  %v3228_v54 = vpop.eup %3227  ;;  %v1713_v41 = vadd.f32 1.0, %v3226_v51 }
 0x782   :  { %3231 = vrcp.f32 %v1696_v39 }
 0x783   :  { %3233 = vrcp.f32 %v1713_v41 }
 0x78b   :  { %v3230_v16 = vpop.eup %3229 }
 0x78c   :  { %v3232_v24 = vpop.eup %3231  ;;  %v1707_v37 = vmul.f32 %v3230_v16, %v3228_v54 }
 0x78d   :  { %v1699_v42 = vmul.f32 %v3232_v24, %v4221_v38  ;;  %v3234_v12 = vpop.eup %3233 }
 0x78f   :  { %v4285_v15 = vadd.f32 %v1707_v37, %v1699_v42 }
 0x791   :  { %3235 = vtanh.f32 %v4285_v15  ;;  %1718 = vst [vmem:[#allocation14 + $0x28] sm:$0xff] %v4285_v15 }
 0x79b   :  { %v3236_v55 = vpop.eup %3235 }
 0x79c   :  { %v4289_v44 = vmul.f32 %v3236_v55, %v3234_v12 }
 0x79e   :  { %1717 = vst [vmem:[#allocation13 + $0x28] sm:$0xff] %v4289_v44  ;;  %v1719_v53 = vpack.c.bf16 %v4289_v44, %v4289_v44 }
 0x7a0   :  { %1753 = vmatmul.mubr.bf16.vlgmr.msra.gmra.mrb[32].mxu1 %v1719_v53  ;;  %1794 = vmatmul.mubr.bf16.vlgmr.msra.gmra.mrb[24].mxu0 %v1719_v53 }
 0x7a1   :  { %1834 = vmatpush1.bf16.msra.mxu1 %v4038_v35  ;;  %1875 = vmatpush1.bf16.msra.mxu0 %v4123_v36  ;;  %v3055_v35 = vld [vmem:[#allocation7 + $0x4] ss:$8 sps:$4 sm:$0xff]  }
 0x7a2   :  { %1835 = vmatprep.subr.bf16.mxu1 %v4042_v21  ;;  %1876 = vmatprep.subr.bf16.mxu0 %v4127_v25  ;;  %v3079_v21 = vld [vmem:[#allocation8 + $0x4] ss:$12 sps:$4 sm:$0xff]   ;;  %v4602_v36 = vld [vmem:[#allocation27_spill] sm:$0xff] }
 0x7a3   :  { %1865 = vmatprep.mubr.bf16.mxu1 %v4557_v43  ;;  %1906 = vmatprep.mubr.bf16.mxu0 %v4557_v43 }
 0x7a5   :  { %1836 = vmatpush1.bf16.msra.mxu1 %v4048_v33  ;;  %1877 = vmatpush1.bf16.msra.mxu0 %v4133_v40  ;;  %v455_v33 = vpop.permute.xlu0 %454  ;;  %v4603_v40 = vld [vmem:[#allocation35_spill] sm:$0xff] }
 0x7a6   :  { %1837 = vmatprep.subr.bf16.mxu1 %v4052_v22  ;;  %1878 = vmatprep.subr.bf16.mxu0 %v4137_v19  ;;  %v4598_v22 = vld [vmem:[#allocation24_spill] sm:$0xff] }
 0x7a9   :  { %1838 = vmatpush1.bf16.msra.mxu1 %v4056_v59  ;;  %1879 = vmatpush1.bf16.msra.mxu0 %v4141_v29  ;;  %v524_v59 = vmul.f32 %v4598_v22, %v455_v33  ;;  %v743_v29 = vpop.permute.xlu0 %742 }
 0x7aa   :  { %1839 = vmatprep.subr.bf16.mxu1 %v4060_v60  ;;  %1880 = vmatprep.subr.bf16.mxu0 %v4145_v45  ;;  %v4599_v60 = vld [vmem:[#allocation33_spill] sm:$0xff]  ;;  %v4604_v45 = vld [vmem:[#allocation36_spill] sm:$0xff]  ;;  %v812_v46 = vmul.f32 %v3902_v0, %v743_v29  ;;  %v810_v37 = vmul.f32 %v4565_v28, %v743_v29 }
 0x7ab   :  { %v577_v25 = vadd.f32 %v4602_v36, %v524_v59 }
 0x7ad   :  { %1840 = vmatpush1.bf16.msra.mxu1 %v4064_v47  ;;  %1881 = vmatpush1.bf16.msra.mxu0 %v4149_v49  ;;  %v526_v47 = vmul.f32 %v4599_v60, %v455_v33  ;;  %v527_v49 = vmul.f32 %v4604_v45, %v455_v33 }
 0x7ae   :  { %1841 = vmatprep.subr.bf16.mxu1 %v4068_v61  ;;  %1882 = vmatprep.subr.bf16.mxu0 %v4153_v4  ;;  %v611_v61 = vpop.permute.xlu1 %610 }
 0x7af   :  { %v579_v19 = vadd.f32 %v4603_v40, %v526_v47  ;;  %v678_v32 = vmul.f32 %v4563_v20, %v611_v61 }
 0x7b1   :  { %1842 = vmatpush1.bf16.msra.mxu1 %v4072_v62  ;;  %1883 = vmatpush1.bf16.msra.mxu0 %v4157_v5  ;;  %v4600_v62 = vld [vmem:[#allocation26_spill] sm:$0xff]  ;;  %v4605_v5 = vld [vmem:[#allocation28_spill] sm:$0xff] }
 0x7b2   :  { %1843 = vmatprep.subr.bf16.mxu1 %v4076_v63  ;;  %1884 = vmatprep.subr.bf16.mxu0 %v4161_v6  ;;  %v677_v63 = vmul.f32 %v4600_v62, %v611_v61  ;;  %v809_v6 = vmul.f32 %v4605_v5, %v743_v29 }
 0x7b4   :  { %v709_v4 = vadd.f32 %v677_v63, %v577_v25 }
 0x7b5   :  { %1844 = vmatpush1.bf16.msra.mxu1 %v4080_v1  ;;  %1885 = vmatpush1.bf16.msra.mxu0 %v4165_v3  ;;  %v4601_v1 = vld [vmem:[#allocation34_spill] sm:$0xff] }
 0x7b6   :  { %1845 = vmatprep.subr.bf16.mxu1 %v4084_v2  ;;  %1886 = vmatprep.subr.bf16.mxu0 %v4169_v56  ;;  %v679_v2 = vmul.f32 %v4601_v1, %v611_v61  ;;  %v4606_v56 = vld [vmem:[#allocation37_spill] sm:$0xff] }
 0x7b8   :  { %v711_v3 = vadd.f32 %v679_v2, %v579_v19 }
 0x7b9   :  { %1846 = vmatpush1.bf16.msra.mxu1 %v4172_v7  ;;  %1887 = vmatpush1.bf16.msra.mxu0 %v4175_v57  ;;  %v811_v7 = vmul.f32 %v4606_v56, %v743_v29  ;;  %v4607_v57 = vld [vmem:[#allocation38_spill] sm:$0xff] }
 0x7ba   :  { %1847 = vmatprep.subr.bf16.mxu1 %v4178_v9  ;;  %1888 = vmatprep.subr.bf16.mxu0 %v4181_v10  ;;  %v680_v9 = vmul.f32 %v4607_v57, %v611_v61  ;;  %v580_v10 = vadd.f32 %v4578_v18, %v527_v49 }
 0x7bb   :  { %v843_v38 = vadd.f32 %v811_v7, %v711_v3  ;;  %v3053_v3 = vld [vmem:[#allocation7] ss:$8 sps:$4 sm:$0xff]  }
 0x7bc   :  { %v712_v48 = vadd.f32 %v680_v9, %v580_v10  ;;  %v3058_v9 = vld [vmem:[#allocation7 + $0x14] ss:$8 sps:$4 sm:$0xff]   ;;  %v3077_v10 = vld [vmem:[#allocation8] ss:$12 sps:$4 sm:$0xff]  }
 0x7bd   :  { %1848 = vmatpush1.bf16.msra.mxu1 %v4184_v14  ;;  %1889 = vmatpush1.bf16.msra.mxu0 %v4187_v58  ;;  %v525_v14 = vmul.f32 %v4562_v26, %v455_v33  ;;  %v841_v58 = vadd.f32 %v809_v6, %v709_v4 }
 0x7be   :  { %2053 = vmatprep.subr.bf16.mxu1 %v3055_v35  ;;  %2487 = vmatprep.subr.bf16.mxu0 %v3079_v21  ;;  %v844_v16 = vadd.f32 %v812_v46, %v712_v48  ;;  %v3067_v48 = vld [vmem:[#allocation7 + $0x44] ss:$8 sps:$4 sm:$0xff]   ;;  %v3086_v46 = vld [vmem:[#allocation8 + $0x48] ss:$12 sps:$4 sm:$0xff]  }
 0x7bf   :  { %v578_v39 = vadd.f32 %v4564_v17, %v525_v14  ;;  %v3056_v14 = vld [vmem:[#allocation7 + $0x10] ss:$8 sps:$4 sm:$0xff]  }
 0x7c1   :  { %v710_v24 = vadd.f32 %v678_v32, %v578_v39  ;;  %v3070_v32 = vld [vmem:[#allocation7 + $0x54] ss:$8 sps:$4 sm:$0xff]   ;;  %v3068_v39 = vld [vmem:[#allocation7 + $0x50] ss:$8 sps:$4 sm:$0xff]  }
 0x7c3   :  { %v842_v42 = vadd.f32 %v810_v37, %v710_v24  ;;  %v3071_v24 = vld [vmem:[#allocation7 + $0x60] ss:$8 sps:$4 sm:$0xff]   ;;  %v3076_v37 = vld [vmem:[#allocation7 + $0x74] ss:$8 sps:$4 sm:$0xff]  }
 0x873   :  { %v1754_v11 = vpop.f32.mrb[32].mxu1  ;;  %v1795_v52 = vpop.f32.mrb[24].mxu0 }
 0x874   :  { %v1802_v13 = vadd.f32 %v1754_v11, %v841_v58  ;;  %v1804_v8 = vadd.f32 %v1795_v52, %v843_v38  ;;  %v1756_v50 = vpop.f32.mrb[33].mxu1  ;;  %v1797_v31 = vpop.f32.mrb[25].mxu0  ;;  %v3061_v58 = vld [vmem:[#allocation7 + $0x24] ss:$8 sps:$4 sm:$0xff]   ;;  %v3085_v11 = vld [vmem:[#allocation8 + $0x34] ss:$12 sps:$4 sm:$0xff]  }
 0x875   :  { %v1758_v30 = vpop.f32.mrb[34].mxu1  ;;  %v1799_v34 = vpop.f32.mrb[26].mxu0  ;;  %v1805_v41 = vadd.f32 %v1797_v31, %v844_v16  ;;  %v1803_v55 = vadd.f32 %v1756_v50, %v842_v42  ;;  %v3080_v38 = vld [vmem:[#allocation8 + $0x18] ss:$12 sps:$4 sm:$0xff]   ;;  %v3059_v52 = vld [vmem:[#allocation7 + $0x20] ss:$8 sps:$4 sm:$0xff]  }
 0x876   :  { %v2802_v23 = vmul.f32 -1.442695, %v1802_v13  ;;  %v2801_v27 = vmul.f32 -1.442695, %v1804_v8  ;;  %v1759_v51 = vpop.f32.mrb[35].mxu1  ;;  %v1800_v54 = vpop.f32.mrb[27].mxu0 }
 0x877   :  { %v2803_v12 = vmul.f32 -1.442695, %v1805_v41  ;;  %v3064_v13 = vld [vmem:[#allocation7 + $0x34] ss:$8 sps:$4 sm:$0xff]   ;;  %v3088_v50 = vld [vmem:[#allocation8 + $0x4c] ss:$12 sps:$4 sm:$0xff]  }
 0x878   :  { %3237 = vpow2.f32 %v2802_v23  ;;  %v3083_v8 = vld [vmem:[#allocation8 + $0x30] ss:$12 sps:$4 sm:$0xff]   ;;  %v3065_v34 = vld [vmem:[#allocation7 + $0x40] ss:$8 sps:$4 sm:$0xff]   ;;  %v3073_v51 = vld [vmem:[#allocation7 + $0x64] ss:$8 sps:$4 sm:$0xff]  }
 0x879   :  { %3239 = vpow2.f32 %v2801_v27  ;;  %v3062_v31 = vld [vmem:[#allocation7 + $0x30] ss:$8 sps:$4 sm:$0xff]   ;;  %v3089_v23 = vld [vmem:[#allocation8 + $0x60] ss:$12 sps:$4 sm:$0xff]   ;;  %v3094_v27 = vld [vmem:[#allocation8 + $0x7c] ss:$12 sps:$4 sm:$0xff]  }
 0x87a   :  { %3241 = vpow2.f32 %v2803_v12  ;;  %v3091_v30 = vld [vmem:[#allocation8 + $0x64] ss:$12 sps:$4 sm:$0xff]   ;;  %v3097_v16 = vld [vmem:[#allocation8 + $0x94] ss:$12 sps:$4 sm:$0xff]   ;;  %v1946_v12 = vld [vmem:[#allocation13 + $0x8] sm:$0xff] }
 0x87b   :  { %3243 = vtanh.f32 %v1803_v55  ;;  %v3092_v54 = vld [vmem:[#allocation8 + $0x78] ss:$12 sps:$4 sm:$0xff]   ;;  %v3095_v41 = vld [vmem:[#allocation8 + $0x90] ss:$12 sps:$4 sm:$0xff]  }
 0x87c   :  { %v3074_v42 = vld [vmem:[#allocation7 + $0x70] ss:$8 sps:$4 sm:$0xff]   ;;  %v1945_v55 = vld [vmem:[#allocation13] sm:$0xff] }
 0x882   :  { %v3238_v53 = vpop.eup %3237 }
 0x883   :  { %v3240_v35 = vpop.eup %3239  ;;  %v1816_v21 = vadd.f32 1.0, %v3238_v53  ;;  %v1953_v53 = vpack.c.bf16 %v1946_v12, %v1945_v55 }
 0x884   :  { %v1809_v33 = vadd.f32 1.0, %v3240_v35  ;;  %v3242_v59 = vpop.eup %3241  ;;  %v4608_v35 = vld [vmem:[#allocation30_spill] sm:$0xff] }
 0x885   :  { %3245 = vrcp.f32 %v1816_v21  ;;  %v3244_v47 = vpop.eup %3243  ;;  %v1826_v25 = vadd.f32 1.0, %v3242_v59  ;;  %v4609_v21 = vld [vmem:[#allocation31_spill] sm:$0xff] }
 0x886   :  { %3247 = vrcp.f32 %v1809_v33  ;;  %v1954_v33 = vpack.c.bf16 %v4609_v21, %v4608_v35  ;;  %v4610_v59 = vld [vmem:[#allocation39_spill] sm:$0xff]  ;;  %v747_v21 = vpop.permute.xlu0 %746 }
 0x887   :  { %3249 = vrcp.f32 %v1826_v25  ;;  %v3101_v25 = vld [vmem:[#allocation8 + $0xc0] ss:$12 sps:$4 sm:$0xff]  }
 0x88f   :  { %v3246_v61 = vpop.eup %3245 }
 0x890   :  { %v3248_v63 = vpop.eup %3247  ;;  %v1820_v2 = vmul.f32 %v3246_v61, %v3244_v47  ;;  %v1955_v47 = vpack.c.bf16 %v4289_v44, %v4610_v59  ;;  %v3100_v61 = vld [vmem:[#allocation8 + $0xac] ss:$12 sps:$4 sm:$0xff]   ;;  %v813_v59 = vmul.f32 %v4605_v5, %v747_v21  ;;  %v816_v5 = vmul.f32 %v3902_v0, %v747_v21 }
 0x891   :  { %v1812_v19 = vmul.f32 %v3248_v63, %v4285_v15  ;;  %v3250_v49 = vpop.eup %3249  ;;  %v3082_v15 = vld [vmem:[#allocation8 + $0x1c] ss:$12 sps:$4 sm:$0xff]   ;;  %v3112_v44 = vld [vmem:[#allocation8 + $0x10c] ss:$12 sps:$4 sm:$0xff]  }
 0x892   :  { %v3098_v63 = vld [vmem:[#allocation8 + $0xa8] ss:$12 sps:$4 sm:$0xff]  }
 0x893   :  { %v4343_v29 = vadd.f32 %v1820_v2, %v1812_v19  ;;  %v3103_v2 = vld [vmem:[#allocation8 + $0xc4] ss:$12 sps:$4 sm:$0xff]   ;;  %v3106_v19 = vld [vmem:[#allocation8 + $0xdc] ss:$12 sps:$4 sm:$0xff]  }
 0x895   :  { %3251 = vtanh.f32 %v4343_v29  ;;  %1831 = vst [vmem:[#allocation14 + $0x30] sm:$0xff] %v4343_v29 }
 0x89f   :  { %v3252_v4 = vpop.eup %3251 }
 0x8a0   :  { %v4347_v6 = vmul.f32 %v3252_v4, %v3250_v49  ;;  %v3104_v49 = vld [vmem:[#allocation8 + $0xd8] ss:$12 sps:$4 sm:$0xff]   ;;  %v3109_v4 = vld [vmem:[#allocation8 + $0xf4] ss:$12 sps:$4 sm:$0xff]  }
 0x8a2   :  { %1830 = vst [vmem:[#allocation13 + $0x30] sm:$0xff] %v4347_v6  ;;  %v1832_v7 = vpack.c.bf16 %v4347_v6, %v4347_v6 }
 0x8a4   :  { %1866 = vmatmul.mubr.bf16.vlgmr.msra.gmra.mrb[36].mxu1 %v1832_v7  ;;  %1907 = vmatmul.mubr.bf16.vlgmr.msra.gmra.mrb[28].mxu0 %v1832_v7  ;;  %v3110_v7 = vld [vmem:[#allocation8 + $0x108] ss:$12 sps:$4 sm:$0xff]  }
 0x8a5   :  { %2054 = vmatpush1.bf16.msra.mxu1 %v3053_v3  ;;  %2085 = vmatprep.mubr.bf16.mxu1 %v4557_v43  ;;  %v3107_v3 = vld [vmem:[#allocation8 + $0xf0] ss:$12 sps:$4 sm:$0xff]  }
 0x8a6   :  { %2055 = vmatprep.subr.bf16.mxu1 %v3058_v9  ;;  %2488 = vmatpush1.bf16.msra.mxu0 %v3077_v10  ;;  %v3113_v9 = vld [vmem:[#allocation8 + $0x120] ss:$12 sps:$4 sm:$0xff]   ;;  %v3122_v10 = vld [vmem:[#allocation8 + $0xc8] ss:$12 sps:$4 sm:$0xff]  }
 0x8a7   :  { %2489 = vmatprep.subr.bf16.mxu0 %v3082_v15  ;;  %v3123_v15 = vld [vmem:[#allocation8 + $0x8] ss:$12 sps:$4 sm:$0xff]  }
 0x8a9   :  { %2056 = vmatpush1.bf16.msra.mxu1 %v3056_v14  ;;  %v3118_v14 = vld [vmem:[#allocation8 + $0x13c] ss:$12 sps:$4 sm:$0xff]  }
 0x8aa   :  { %2057 = vmatprep.subr.bf16.mxu1 %v3061_v58  ;;  %2490 = vmatpush1.bf16.msra.mxu0 %v3080_v38  ;;  %v3116_v58 = vld [vmem:[#allocation8 + $0x138] ss:$12 sps:$4 sm:$0xff]   ;;  %v3127_v38 = vld [vmem:[#allocation8 + $0xe0] ss:$12 sps:$4 sm:$0xff]  }
 0x8ab   :  { %2491 = vmatprep.subr.bf16.mxu0 %v3085_v11  ;;  %v3128_v11 = vld [vmem:[#allocation8 + $0x20] ss:$12 sps:$4 sm:$0xff]  }
 0x8ad   :  { %2058 = vmatpush1.bf16.msra.mxu1 %v3059_v52  ;;  %v3121_v52 = vld [vmem:[#allocation8 + $0x154] ss:$12 sps:$4 sm:$0xff]  }
 0x8ae   :  { %2059 = vmatprep.subr.bf16.mxu1 %v3064_v13  ;;  %2492 = vmatpush1.bf16.msra.mxu0 %v3083_v8  ;;  %v3119_v13 = vld [vmem:[#allocation8 + $0x150] ss:$12 sps:$4 sm:$0xff]   ;;  %v3129_v8 = vld [vmem:[#allocation8 + $0xf8] ss:$12 sps:$4 sm:$0xff]  }
 0x8af   :  { %2493 = vmatprep.subr.bf16.mxu0 %v3088_v50  ;;  %v3130_v50 = vld [vmem:[#allocation8 + $0x38] ss:$12 sps:$4 sm:$0xff]  }
 0x8b1   :  { %2060 = vmatpush1.bf16.msra.mxu1 %v3062_v31  ;;  %v3126_v31 = vld [vmem:[#allocation8 + $0x16c] ss:$12 sps:$4 sm:$0xff]  }
 0x8b2   :  { %2061 = vmatprep.subr.bf16.mxu1 %v3067_v48  ;;  %2494 = vmatpush1.bf16.msra.mxu0 %v3086_v46  ;;  %v3124_v48 = vld [vmem:[#allocation8 + $0x168] ss:$12 sps:$4 sm:$0xff]   ;;  %v3131_v46 = vld [vmem:[#allocation8 + $0x110] ss:$12 sps:$4 sm:$0xff]  }
 0x8b3   :  { %2495 = vmatprep.subr.bf16.mxu0 %v3091_v30  ;;  %v3132_v30 = vld [vmem:[#allocation8 + $0x50] ss:$12 sps:$4 sm:$0xff]  }
 0x8b5   :  { %2062 = vmatpush1.bf16.msra.mxu1 %v3065_v34  ;;  %v3133_v34 = vld [vmem:[#allocation8 + $0x128] ss:$12 sps:$4 sm:$0xff]  }
 0x8b6   :  { %2063 = vmatprep.subr.bf16.mxu1 %v3070_v32  ;;  %2496 = vmatpush1.bf16.msra.mxu0 %v3089_v23  ;;  %v3134_v32 = vld [vmem:[#allocation8 + $0x68] ss:$12 sps:$4 sm:$0xff]   ;;  %v3135_v23 = vld [vmem:[#allocation8 + $0x140] ss:$12 sps:$4 sm:$0xff]  }
 0x8b7   :  { %2497 = vmatprep.subr.bf16.mxu0 %v3094_v27  ;;  %v3136_v27 = vld [vmem:[#allocation8 + $0x80] ss:$12 sps:$4 sm:$0xff]  }
 0x8b9   :  { %2064 = vmatpush1.bf16.msra.mxu1 %v3068_v39  ;;  %v3137_v39 = vld [vmem:[#allocation8 + $0x158] ss:$12 sps:$4 sm:$0xff]  }
 0x8ba   :  { %2065 = vmatprep.subr.bf16.mxu1 %v3073_v51  ;;  %2498 = vmatpush1.bf16.msra.mxu0 %v3092_v54  ;;  %v3138_v51 = vld [vmem:[#allocation8 + $0x98] ss:$12 sps:$4 sm:$0xff]   ;;  %v3139_v54 = vld [vmem:[#allocation8 + $0x170] ss:$12 sps:$4 sm:$0xff]  }
 0x8bb   :  { %2499 = vmatprep.subr.bf16.mxu0 %v3097_v16  ;;  %v3140_v16 = vld [vmem:[#allocation8 + $0xb0] ss:$12 sps:$4 sm:$0xff]  }
 0x8bd   :  { %2066 = vmatpush1.bf16.msra.mxu1 %v3071_v24  ;;  %v460_v24 = vpop.permute.xlu1 %459 }
 0x8be   :  { %2067 = vmatprep.subr.bf16.mxu1 %v3076_v37  ;;  %2500 = vmatpush1.bf16.msra.mxu0 %v3095_v41  ;;  %v528_v37 = vmul.f32 %v4598_v22, %v460_v24  ;;  %v530_v41 = vmul.f32 %v4599_v60, %v460_v24 }
 0x8bf   :  { %2501 = vmatprep.subr.bf16.mxu0 %v3100_v61 }
 0x8c0   :  { %v583_v35 = vadd.f32 %v4603_v40, %v530_v41 }
 0x8c1   :  { %2068 = vmatpush1.bf16.msra.mxu1 %v3074_v42  ;;  %v615_v42 = vpop.permute.xlu1 %614 }
 0x8c2   :  { %2502 = vmatpush1.bf16.msra.mxu0 %v3098_v63  ;;  %2871 = vmatprep.subr.bf16.mxu1 %v3122_v10  ;;  %v681_v12 = vmul.f32 %v4600_v62, %v615_v42  ;;  %v683_v55 = vmul.f32 %v4601_v1, %v615_v42  ;;  %v684_v60 = vmul.f32 %v4607_v57, %v615_v42 }
 0x8c3   :  { %2503 = vmatprep.subr.bf16.mxu0 %v3103_v2  ;;  %v529_v62 = vmul.f32 %v4562_v26, %v460_v24  ;;  %v814_v10 = vmul.f32 %v4565_v28, %v747_v21 }
 0x8c4   :  { %2086 = vmatmul.mubr.bf16.vlgmr.msra.gmra.mrb[40].mxu1 %v1953_v53  ;;  %v581_v53 = vadd.f32 %v4602_v36, %v528_v37  ;;  %v715_v22 = vadd.f32 %v683_v55, %v583_v35 }
 0x8c5   :  { %2095 = vmatprep.mubr.bf16.mxu1 %v4557_v43  ;;  %2872 = vmatpush3.bf16.msra.mxu1 %v3123_v15 }
 0x8c6   :  { %2504 = vmatpush1.bf16.msra.mxu0 %v3101_v25  ;;  %2873 = vmatprep.subr.bf16.mxu1 %v3127_v38  ;;  %v713_v61 = vadd.f32 %v681_v12, %v581_v53 }
 0x8c7   :  { %2505 = vmatprep.subr.bf16.mxu0 %v3106_v19 }
 0x8c8   :  { %v845_v1 = vadd.f32 %v813_v59, %v713_v61 }
 0x8c9   :  { %2874 = vmatpush3.bf16.msra.mxu1 %v3128_v11 }
 0x8ca   :  { %2506 = vmatpush1.bf16.msra.mxu0 %v3104_v49  ;;  %2875 = vmatprep.subr.bf16.mxu1 %v3129_v8 }
 0x8cb   :  { %2507 = vmatprep.subr.bf16.mxu0 %v3109_v4 }
 0x8cc   :  { %2096 = vmatmul.mubr.bf16.gmra.mrb[44].mxu1 %v1954_v33  ;;  %v531_v33 = vmul.f32 %v4604_v45, %v460_v24 }
 0x8cd   :  { %2105 = vmatprep.mubr.bf16.mxu1 %v4557_v43  ;;  %2876 = vmatpush3.bf16.msra.mxu1 %v3130_v50 }
 0x8ce   :  { %2508 = vmatpush1.bf16.msra.mxu0 %v3107_v3  ;;  %2877 = vmatprep.subr.bf16.mxu1 %v3131_v46  ;;  %v584_v63 = vadd.f32 %v4578_v18, %v531_v33  ;;  %v582_v18 = vadd.f32 %v4564_v17, %v529_v62 }
 0x8cf   :  { %2509 = vmatprep.subr.bf16.mxu0 %v3112_v44  ;;  %v682_v44 = vmul.f32 %v4563_v20, %v615_v42 }
 0x8d0   :  { %v716_v4 = vadd.f32 %v684_v60, %v584_v63  ;;  %v4612_v63 = vld [vmem:[#allocation23_spill] sm:$0xff] }
 0x8d1   :  { %2878 = vmatpush3.bf16.msra.mxu1 %v3132_v30  ;;  %v714_v15 = vadd.f32 %v682_v44, %v582_v18 }
 0x8d2   :  { %2510 = vmatpush1.bf16.msra.mxu0 %v3110_v7  ;;  %2879 = vmatprep.subr.bf16.mxu1 %v3133_v34 }
 0x8d4   :  { %2106 = vmatmul.mubr.bf16.gmra.mrb[48].mxu1 %v1955_v47  ;;  %v815_v47 = vmul.f32 %v4606_v56, %v747_v21 }
 0x8d5   :  { %2115 = vmatprep.mubr.bf16.mxu1 %v4557_v43  ;;  %v3115_v43 = vld [vmem:[#allocation8 + $0x124] ss:$12 sps:$4 sm:$0xff]   ;;  %2880 = vmatpush3.bf16.msra.mxu1 %v3134_v32 }
 0x8d6   :  { %2511 = vmatprep.subr.bf16.mxu0 %v3115_v43  ;;  %2881 = vmatprep.subr.bf16.mxu1 %v3135_v23  ;;  %v847_v2 = vadd.f32 %v815_v47, %v715_v22  ;;  %v4611_v22 = vld [vmem:[#allocation22_spill] sm:$0xff] }
 0x8d7   :  { %2512 = vmatpush1.bf16.msra.mxu0 %v3113_v9  ;;  %v848_v9 = vadd.f32 %v816_v5, %v716_v4 }
 0x8d8   :  { %2513 = vmatprep.subr.bf16.mxu0 %v3118_v14 }
 0x8d9   :  { %2882 = vmatpush3.bf16.msra.mxu1 %v3136_v27 }
 0x8da   :  { %2883 = vmatprep.subr.bf16.mxu1 %v3137_v39 }
 0x8db   :  { %2514 = vmatpush1.bf16.msra.mxu0 %v3116_v58  ;;  %v846_v58 = vadd.f32 %v814_v10, %v714_v15 }
 0x8dc   :  { %2515 = vmatprep.subr.bf16.mxu0 %v3121_v52 }
 0x8dd   :  { %2884 = vmatpush3.bf16.msra.mxu1 %v3138_v51 }
 0x8de   :  { %2885 = vmatprep.subr.bf16.mxu1 %v3139_v54 }
 0x8df   :  { %2516 = vmatpush1.bf16.msra.mxu0 %v3119_v13 }
 0x8e0   :  { %2517 = vmatprep.subr.bf16.mxu0 %v3126_v31 }
 0x8e1   :  { %2886 = vmatpush3.bf16.msra.mxu1 %v3140_v16 }
 0x8e3   :  { %2518 = vmatpush1.bf16.msra.mxu0 %v3124_v48 }
 0x977   :  { %v1867_v36 = vpop.f32.mrb[36].mxu1  ;;  %v1908_v25 = vpop.f32.mrb[28].mxu0 }
 0x978   :  { %v1915_v40 = vadd.f32 %v1867_v36, %v845_v1  ;;  %v1917_v19 = vadd.f32 %v1908_v25, %v847_v2  ;;  %v1869_v49 = vpop.f32.mrb[37].mxu1  ;;  %v1910_v45 = vpop.f32.mrb[29].mxu0 }
 0x979   :  { %v1871_v56 = vpop.f32.mrb[38].mxu1  ;;  %v1912_v3 = vpop.f32.mrb[30].mxu0  ;;  %v1918_v14 = vadd.f32 %v1910_v45, %v848_v9  ;;  %v1916_v38 = vadd.f32 %v1869_v49, %v846_v58 }
 0x97a   :  { %v2805_v57 = vmul.f32 -1.442695, %v1915_v40  ;;  %v2804_v7 = vmul.f32 -1.442695, %v1917_v19  ;;  %v1872_v26 = vpop.f32.mrb[39].mxu1  ;;  %v1913_v43 = vpop.f32.mrb[31].mxu0 }
 0x97b   :  { %v2806_v0 = vmul.f32 -1.442695, %v1918_v14 }
 0x97c   :  { %3253 = vpow2.f32 %v2805_v57 }
 0x97d   :  { %3255 = vpow2.f32 %v2804_v7 }
 0x97e   :  { %3257 = vpow2.f32 %v2806_v0 }
 0x97f   :  { %3259 = vtanh.f32 %v1916_v38 }
 0x986   :  { %v3254_v11 = vpop.eup %3253 }
 0x987   :  { %v3256_v52 = vpop.eup %3255  ;;  %v1929_v13 = vadd.f32 1.0, %v3254_v11 }
 0x988   :  { %v1922_v20 = vadd.f32 1.0, %v3256_v52  ;;  %v3258_v17 = vpop.eup %3257 }
 0x989   :  { %3261 = vrcp.f32 %v1929_v13  ;;  %v3260_v8 = vpop.eup %3259  ;;  %v1939_v46 = vadd.f32 1.0, %v3258_v17 }
 0x98a   :  { %3263 = vrcp.f32 %v1922_v20  ;;  %v4613_v20 = vld [vmem:[#allocation25_spill] sm:$0xff] }
 0x98b   :  { %3265 = vrcp.f32 %v1939_v46 }
 0x993   :  { %v3262_v50 = vpop.eup %3261 }
 0x994   :  { %v3264_v31 = vpop.eup %3263  ;;  %v1933_v48 = vmul.f32 %v3262_v50, %v3260_v8 }
 0x995   :  { %v1925_v28 = vmul.f32 %v3264_v31, %v4343_v29  ;;  %v3266_v24 = vpop.eup %3265 }
 0x997   :  { %v1934_v30 = vadd.f32 %v1933_v48, %v1925_v28  ;;  %v2087_v34 = vpop.f32.mrb[40].mxu1 }
 0x998   :  { %2126 = vst [vmem:[#allocation11] sm:$0xff] %v2087_v34  ;;  %v2089_v32 = vpop.f32.mrb[41].mxu1 }
 0x999   :  { %3267 = vtanh.f32 %v1934_v30  ;;  %1944 = vst [vmem:[#allocation14 + $0x38] sm:$0xff] %v1934_v30  ;;  %2127 = vst [vmem:[#allocation11 + $0x8] sm:$0xff] %v2089_v32  ;;  %v2091_v23 = vpop.f32.mrb[42].mxu1 }
 0x99a   :  { %2128 = vst [vmem:[#allocation11 + $0x10] sm:$0xff] %v2091_v23  ;;  %v2142_v27 = vpack.c.bf16 %v2091_v23, %v2087_v34  ;;  %v2093_v39 = vpop.f32.mrb[43].mxu1 }
 0x99b   :  { %2129 = vst [vmem:[#allocation11 + $0x18] sm:$0xff] %v2093_v39  ;;  %v2143_v51 = vpack.c.bf16 %v2093_v39, %v2089_v32 }
 0x99d   :  { %2519 = vmatprep.mubr.bf16.mxu0 %v2143_v51 }
 0x99e   :  { %2520 = vmatmul.mubr.bf16.vlgmr.msra.gmra.mrb[32].mxu0 %v2142_v27 }
 0x99f   :  { %v2097_v54 = vpop.f32.mrb[44].mxu1 }
 0x9a0   :  { %2130 = vst [vmem:[#allocation11 + $0x20] sm:$0xff] %v2097_v54  ;;  %v2099_v16 = vpop.f32.mrb[45].mxu1 }
 0x9a1   :  { %2131 = vst [vmem:[#allocation11 + $0x28] sm:$0xff] %v2099_v16  ;;  %v2101_v29 = vpop.f32.mrb[46].mxu1 }
 0x9a2   :  { %2132 = vst [vmem:[#allocation11 + $0x30] sm:$0xff] %v2101_v29  ;;  %v2144_v37 = vpack.c.bf16 %v2101_v29, %v2097_v54  ;;  %v2103_v41 = vpop.f32.mrb[47].mxu1 }
 0x9a3   :  { %v3268_v42 = vpop.eup %3267  ;;  %2133 = vst [vmem:[#allocation11 + $0x38] sm:$0xff] %v2103_v41  ;;  %v2145_v12 = vpack.c.bf16 %v2103_v41, %v2099_v16 }
 0x9a4   :  { %v1942_v55 = vmul.f32 %v3268_v42, %v3266_v24 }
 0x9a5   :  { %2529 = vmatprep.mubr.bf16.mxu0 %v2145_v12 }
 0x9a6   :  { %1943 = vst [vmem:[#allocation13 + $0x38] sm:$0xff] %v1942_v55  ;;  %2530 = vmatmul.mubr.bf16.gmra.mrb[36].mxu0 %v2144_v37  ;;  %v1956_v53 = vpack.c.bf16 %v1942_v55, %v4347_v6  ;;  %v2214_v6 = vld [vmem:[%s4480_s9] sm:$0x7]  ;;  %s3502_s9 = smov [#allocation11]  }
 0x9a7   :  { %v2107_v35 = vpop.f32.mrb[48].mxu1  ;;  %v4382_v60 = vrot.slane %v2214_v6, %v4611_v22  ;;  %v4385_v62 = vrot.slane %v2214_v6, %v4612_v63  ;;  %v4398_v17 = vrot.slane %v2214_v6, %v4613_v20  ;;  %s2666_s3 = sshll.u32 %s3502_s9, 4  ;;  %s2667_s3 = int_to_ptr.vmem [resolvable:$true] %s2666_s3 }
 0x9a8   :  { %2134 = vst [vmem:[#allocation11 + $0x40] sm:$0xff] %v2107_v35  ;;  %v2109_v21 = vpop.f32.mrb[49].mxu1  ;;  %2116 = vmatmul.mubr.bf16.gmra.mrb[52].mxu1 %v1956_v53  ;;  %s3389_s27 = scalar_lea.vmem %s2667_s3, 2048  ;;  %p3394_p5 = scmp.lt.s32.totalorder %s2667_s3, %s2667_s3 }
 0x9a9   :  { %2135 = vst [vmem:[#allocation11 + $0x48] sm:$0xff] %v2109_v21  ;;  %v2111_v33 = vpop.f32.mrb[50].mxu1  ;;  %2592 = vmatprep.mubr.bf16.mxu1 %v2143_v51  ;;  %p3390_p4 = scmp.ne.s32.totalorder %s2667_s3, %s3389_s27  ;;  %p3395_p6 = scmp.lt.s32.totalorder %s3389_s27, %s3389_s27 }
 0x9aa   :  { %2136 = vst [vmem:[#allocation11 + $0x50] sm:$0xff] %v2111_v33  ;;  %v2146_v59 = vpack.c.bf16 %v2111_v33, %v2107_v35  ;;  %v2113_v47 = vpop.f32.mrb[51].mxu1 }
 0x9ab   :  { %2137 = vst [vmem:[#allocation11 + $0x58] sm:$0xff] %v2113_v47  ;;  %v2147_v61 = vpack.c.bf16 %v2113_v47, %v2109_v21  ;;  %p3396_p7 = por %p3395_p6, %p3394_p5 }
 0x9ad   :  { %2539 = vmatprep.mubr.bf16.mxu0 %v2147_v61  ;;  %p3397_p8 = pnand %p3396_p7, %p3390_p4 }
 0x9ae   :  { %2540 = vmatmul.mubr.bf16.gmra.mrb[40].mxu0 %v2146_v59 }
 0x9b0   :  { %2593 = vmatmul.mubr.bf16.vlgmr.msra.gmra.mrb[56].mxu1 %v2142_v27 }
 0x9b1   :  { %2600 = vmatprep.mubr.bf16.mxu1 %v2145_v12 }
 0x9b8   :  { %2601 = vmatmul.mubr.bf16.gmra.mrb[60].mxu1 %v2144_v37 }
 0x9b9   :  { %2608 = vmatprep.mubr.bf16.mxu1 %v2147_v61 }
 0x9c0   :  { %2609 = vmatmul.mubr.bf16.gmra.mrb[64].mxu1 %v2146_v59 }
 0xa71   :  { %v2521_v1 = vpop.f32.mrb[32].mxu0 }
 0xa72   :  { %v2522_v2 = vadd.f32 %v2521_v1, %v4382_v60  ;;  %v2523_v36 = vpop.f32.mrb[33].mxu0 }
 0xa73   :  { %v2524_v25 = vadd.f32 %v2523_v36, %v4385_v62  ;;  %v2525_v40 = vpop.f32.mrb[34].mxu0 }
 0xa74   :  { %2625 = vst [vmem:[#allocation10] sm:$0xff] %v2522_v2  ;;  %v2526_v19 = vadd.f32 %v2525_v40, %v4382_v60  ;;  %v2527_v49 = vpop.f32.mrb[35].mxu0 }
 0xa75   :  { %2626 = vst [vmem:[#allocation10 + $0x8] sm:$0xff] %v2524_v25  ;;  %v2528_v45 = vadd.f32 %v2527_v49, %v4385_v62 }
 0xa76   :  { %2628 = vst [vmem:[#allocation10 + $0x18] sm:$0xff] %v2526_v19 }
 0xa77   :  { %2629 = vst [vmem:[#allocation10 + $0x20] sm:$0xff] %v2528_v45 }
 0xa79   :  { %v2531_v5 = vpop.f32.mrb[36].mxu0 }
 0xa7a   :  { %v2532_v4 = vadd.f32 %v2531_v5, %v4382_v60  ;;  %v2533_v56 = vpop.f32.mrb[37].mxu0 }
 0xa7b   :  { %v2534_v3 = vadd.f32 %v2533_v56, %v4385_v62  ;;  %v2535_v44 = vpop.f32.mrb[38].mxu0  ;;  %v2117_v57 = vpop.f32.mrb[52].mxu1 }
 0xa7c   :  { %2631 = vst [vmem:[#allocation10 + $0x30] sm:$0xff] %v2532_v4  ;;  %v2536_v7 = vadd.f32 %v2535_v44, %v4382_v60  ;;  %v2537_v18 = vpop.f32.mrb[39].mxu0  ;;  %2138 = vst [vmem:[#allocation11 + $0x60] sm:$0xff] %v2117_v57  ;;  %v2119_v26 = vpop.f32.mrb[53].mxu1 }
 0xa7d   :  { %2632 = vst [vmem:[#allocation10 + $0x38] sm:$0xff] %v2534_v3  ;;  %v2538_v43 = vadd.f32 %v2537_v18, %v4385_v62  ;;  %2139 = vst [vmem:[#allocation11 + $0x68] sm:$0xff] %v2119_v26  ;;  %v2121_v9 = vpop.f32.mrb[54].mxu1 }
 0xa7e   :  { %2634 = vst [vmem:[#allocation10 + $0x48] sm:$0xff] %v2536_v7  ;;  %2140 = vst [vmem:[#allocation11 + $0x70] sm:$0xff] %v2121_v9  ;;  %v2148_v10 = vpack.c.bf16 %v2121_v9, %v2117_v57  ;;  %v2123_v15 = vpop.f32.mrb[55].mxu1 }
 0xa7f   :  { %2635 = vst [vmem:[#allocation10 + $0x50] sm:$0xff] %v2538_v43  ;;  %2141 = vst [vmem:[#allocation11 + $0x78] sm:$0xff] %v2123_v15  ;;  %v2149_v14 = vpack.c.bf16 %v2123_v15, %v2119_v26 }
 0xa81   :  { %v2541_v58 = vpop.f32.mrb[40].mxu0  ;;  %2549 = vmatprep.mubr.bf16.mxu0 %v2149_v14  ;;  %2616 = vmatprep.mubr.bf16.mxu1 %v2149_v14 }
 0xa82   :  { %v2542_v0 = vadd.f32 %v2541_v58, %v4382_v60  ;;  %v2543_v38 = vpop.f32.mrb[41].mxu0  ;;  %2550 = vmatmul.mubr.bf16.gmra.mrb[44].mxu0 %v2148_v10  ;;  %2617 = vmatmul.mubr.bf16.gmra.mrb[68].mxu1 %v2148_v10 }
 0xa83   :  { %v2544_v11 = vadd.f32 %v2543_v38, %v4385_v62  ;;  %v2545_v52 = vpop.f32.mrb[42].mxu0  ;;  %v2887_v13 = vpop.f32.mrb[56].mxu1 }
 0xa84   :  { %2637 = vst [vmem:[#allocation10 + $0x60] sm:$0xff] %v2542_v0  ;;  %v2546_v8 = vadd.f32 %v2545_v52, %v4382_v60  ;;  %v2547_v50 = vpop.f32.mrb[43].mxu0  ;;  %v2888_v31 = vpop.f32.mrb[57].mxu1 }
 0xa85   :  { %2638 = vst [vmem:[#allocation10 + $0x68] sm:$0xff] %v2544_v11  ;;  %v2548_v48 = vadd.f32 %v2547_v50, %v4385_v62  ;;  %v2889_v46 = vadd.f32 %v2888_v31, %v2887_v13  ;;  %v2890_v28 = vpop.f32.mrb[58].mxu1 }
 0xa86   :  { %2640 = vst [vmem:[#allocation10 + $0x78] sm:$0xff] %v2546_v8  ;;  %v2891_v30 = vpop.f32.mrb[59].mxu1 }
 0xa87   :  { %2641 = vst [vmem:[#allocation10 + $0x80] sm:$0xff] %v2548_v48  ;;  %v2595_v34 = vadd.f32 %v2889_v46, %v4398_v17  ;;  %v2892_v32 = vadd.f32 %v2891_v30, %v2890_v28 }
 0xa89   :  { %2627 = vst [vmem:[#allocation10 + $0x10] sm:$0xff] %v2595_v34  ;;  %v2598_v23 = vadd.f32 %v2892_v32, %v4398_v17 }
 0xa8b   :  { %2630 = vst [vmem:[#allocation10 + $0x28] sm:$0xff] %v2598_v23  ;;  %v2893_v27 = vpop.f32.mrb[60].mxu1 }
 0xa8c   :  { %v2894_v39 = vpop.f32.mrb[61].mxu1 }
 0xa8d   :  { %v2895_v51 = vadd.f32 %v2894_v39, %v2893_v27  ;;  %v2896_v54 = vpop.f32.mrb[62].mxu1 }
 0xa8e   :  { %v2897_v16 = vpop.f32.mrb[63].mxu1 }
 0xa8f   :  { %v2603_v29 = vadd.f32 %v2895_v51, %v4398_v17  ;;  %v2898_v24 = vadd.f32 %v2897_v16, %v2896_v54 }
 0xa91   :  { %2633 = vst [vmem:[#allocation10 + $0x40] sm:$0xff] %v2603_v29  ;;  %v2606_v37 = vadd.f32 %v2898_v24, %v4398_v17 }
 0xa93   :  { %2636 = vst [vmem:[#allocation10 + $0x58] sm:$0xff] %v2606_v37  ;;  %v2899_v41 = vpop.f32.mrb[64].mxu1 }
 0xa94   :  { %v2900_v42 = vpop.f32.mrb[65].mxu1 }
 0xa95   :  { %v2901_v12 = vadd.f32 %v2900_v42, %v2899_v41  ;;  %v2902_v55 = vpop.f32.mrb[66].mxu1 }
 0xa96   :  { %v2903_v53 = vpop.f32.mrb[67].mxu1 }
 0xa97   :  { %v2611_v35 = vadd.f32 %v2901_v12, %v4398_v17  ;;  %v2904_v21 = vadd.f32 %v2903_v53, %v2902_v55 }
 0xa99   :  { %2639 = vst [vmem:[#allocation10 + $0x70] sm:$0xff] %v2611_v35  ;;  %v2614_v33 = vadd.f32 %v2904_v21, %v4398_v17 }
 0xa9b   :  { %2642 = vst [vmem:[#allocation10 + $0x88] sm:$0xff] %v2614_v33 }
 0xa9c   :  { %3400 = shalt.err (!%p3397_p8)
}
 0xa9d   :  { %s3401_s30 = scalar_lea.hbm %s4482_s11, 2048 }
 0xa9e   :  { %p3402_p9 = scmp.ne.s32.totalorder %s4482_s11, %s3401_s30  ;;  %p3405_p10 = scmp.lt.u32.totalorder %s3401_s30, %s4482_s11 }
 0xaa0   :  { %p3407_p11 = pnand %p3405_p10, %p3402_p9 }
 0xaa2   :  { %3410 = shalt.err (!%p3407_p11)
}
 0xaa3   :  { %2672 = dma.vmem_to_hbm [thread:$0]  %s2667_s3, 2048, %s4482_s11, [#allocation12], %s3490_s18, %s3490_s18, %s3491_s19  }
 0xaa4   :  { %s3503_s8 = smov [#allocation13]   ;;  %s3504_s2 = smov [#allocation14]  }
 0xaa5   :  { %s2678_s24 = sshll.u32 %s3503_s8, 4  ;;  %s2690_s23 = sshll.u32 %s3504_s2, 4  ;;  %s2679_s24 = int_to_ptr.vmem [resolvable:$true] %s2678_s24  ;;  %s2691_s23 = int_to_ptr.vmem [resolvable:$true] %s2690_s23 }
 0xaa6   :  { %s3411_s16 = scalar_lea.vmem %s2679_s24, 1024  ;;  %p3416_p13 = scmp.lt.s32.totalorder %s2679_s24, %s2679_s24 }
 0xaa7   :  { %p3412_p12 = scmp.ne.s32.totalorder %s2679_s24, %s3411_s16  ;;  %p3417_p0 = scmp.lt.s32.totalorder %s3411_s16, %s3411_s16 }
 0xaa9   :  { %p3418_p1 = por %p3417_p0, %p3416_p13 }
 0xaab   :  { %p3419_p2 = pnand %p3418_p1, %p3412_p12 }
 0xaad   :  { %3422 = shalt.err (!%p3419_p2)
}
 0xaae   :  { %s3423_s20 = scalar_lea.hbm %s4483_s12, 1024 }
 0xaaf   :  { %p3424_p3 = scmp.ne.s32.totalorder %s4483_s12, %s3423_s20  ;;  %p3427_p4 = scmp.lt.u32.totalorder %s3423_s20, %s4483_s12 }
 0xab1   :  { %p3429_p5 = pnand %p3427_p4, %p3424_p3 }
 0xab3   :  { %3432 = shalt.err (!%p3429_p5)
}
 0xab4   :  { %2684 = dma.vmem_to_hbm [thread:$0]  %s2679_s24, 1024, %s4483_s12, [#allocation12], %s3493_s5, %s3493_s5, %s3494_s26  }
 0xab5   :  { %s3433_s9 = scalar_lea.vmem %s2691_s23, 1024  ;;  %p3438_p7 = scmp.lt.s32.totalorder %s2691_s23, %s2691_s23 }
 0xab6   :  { %p3434_p6 = scmp.ne.s32.totalorder %s2691_s23, %s3433_s9  ;;  %p3439_p8 = scmp.lt.s32.totalorder %s3433_s9, %s3433_s9 }
 0xab8   :  { %p3440_p9 = por %p3439_p8, %p3438_p7 }
 0xaba   :  { %p3441_p10 = pnand %p3440_p9, %p3434_p6 }
 0xabc   :  { %3444 = shalt.err (!%p3441_p10)
}
 0xabd   :  { %s3445_s28 = scalar_lea.hbm %s4484_s13, 1024 }
 0xabe   :  { %p3446_p11 = scmp.ne.s32.totalorder %s4484_s13, %s3445_s28  ;;  %p3449_p12 = scmp.lt.u32.totalorder %s3445_s28, %s4484_s13 }
 0xac0   :  { %p3451_p13 = pnand %p3449_p12, %p3446_p11 }
 0xac2   :  { %3454 = shalt.err (!%p3451_p13)
}
 0xac3   :  { %2696 = dma.vmem_to_hbm [thread:$0]  %s2691_s23, 1024, %s4484_s13, [#allocation15], %s3493_s5, %s3493_s5, %s3494_s26  }
 0xac4   :  { %s3505_s6 = smov [#allocation10]  }
 0xac5   :  { %s2654_s15 = sshll.u32 %s3505_s6, 4  ;;  %s2655_s15 = int_to_ptr.vmem [resolvable:$true] %s2654_s15 }
 0xac6   :  { %s3455_s13 = scalar_lea.vmem %s2655_s15, 3072  ;;  %p3460_p1 = scmp.lt.s32.totalorder %s2655_s15, %s2655_s15 }
 0xac7   :  { %p3456_p0 = scmp.ne.s32.totalorder %s2655_s15, %s3455_s13  ;;  %p3461_p2 = scmp.lt.s32.totalorder %s3455_s13, %s3455_s13 }
 0xac9   :  { %p3462_p3 = por %p3461_p2, %p3460_p1 }
 0xacb   :  { %p3463_p4 = pnand %p3462_p3, %p3456_p0 }
 0xb55   :  { %v2551_v59 = vpop.f32.mrb[44].mxu0  ;;  %v2905_v47 = vpop.f32.mrb[68].mxu1 }
 0xb56   :  { %v2552_v61 = vadd.f32 %v2551_v59, %v4382_v60  ;;  %v2553_v6 = vpop.f32.mrb[45].mxu0  ;;  %v2906_v22 = vpop.f32.mrb[69].mxu1 }
 0xb57   :  { %v2554_v63 = vadd.f32 %v2553_v6, %v4385_v62  ;;  %v2907_v1 = vadd.f32 %v2906_v22, %v2905_v47  ;;  %v2555_v2 = vpop.f32.mrb[46].mxu0  ;;  %v2908_v36 = vpop.f32.mrb[70].mxu1 }
 0xb58   :  { %2643 = vst [vmem:[#allocation10 + $0x90] sm:$0xff] %v2552_v61  ;;  %v2556_v25 = vadd.f32 %v2555_v2, %v4382_v60  ;;  %v2557_v40 = vpop.f32.mrb[47].mxu0  ;;  %v2909_v19 = vpop.f32.mrb[71].mxu1 }
 0xb59   :  { %2644 = vst [vmem:[#allocation10 + $0x98] sm:$0xff] %v2554_v63  ;;  %v2619_v49 = vadd.f32 %v2907_v1, %v4398_v17  ;;  %v2558_v45 = vadd.f32 %v2557_v40, %v4385_v62  ;;  %v2910_v5 = vadd.f32 %v2909_v19, %v2908_v36 }
 0xb5a   :  { %2646 = vst [vmem:[#allocation10 + $0xa8] sm:$0xff] %v2556_v25 }
 0xb5b   :  { %2645 = vst [vmem:[#allocation10 + $0xa0] sm:$0xff] %v2619_v49  ;;  %2647 = vst [vmem:[#allocation10 + $0xb0] sm:$0xff] %v2558_v45  ;;  %v2622_v4 = vadd.f32 %v2910_v5, %v4398_v17 }
 0xb5d   :  { %2648 = vst [vmem:[#allocation10 + $0xb8] sm:$0xff] %v2622_v4 }
 0xb5e   :  { %3466 = shalt.err (!%p3463_p4)
}
 0xb5f   :  { %s3467_s4 = scalar_lea.hbm %s4481_s10, 3072 }
 0xb60   :  { %p3468_p5 = scmp.ne.s32.totalorder %s4481_s10, %s3467_s4  ;;  %p3471_p6 = scmp.lt.u32.totalorder %s3467_s4, %s4481_s10 }
 0xb62   :  { %p3473_p7 = pnand %p3471_p6, %p3468_p5 }
 0xb64   :  { %3476 = shalt.err (!%p3473_p7)
}
 0xb65   :  { %s3506_s16 = smov 384   ;;  %s3507_s17 = smov 24  }
 0xb66   :  { %2660 = dma.vmem_to_hbm [thread:$0]  %s2655_s15, 3072, %s4481_s10, [#allocation4], %s3506_s16, %s3506_s16, %s3507_s17  }
 0xb67   :  { %3483 = dma.done.wait [#allocation4], 3072  }
 0xb68   :  { %3484 = vsyncadd [#allocation4], 4294964224 }
 0xb69   :  { %3485 = dma.done.wait [#allocation12], 3072  }
 0xb6a   :  { %3486 = vsyncadd [#allocation12], 4294964224 }
 0xb6b   :  { %3487 = dma.done.wait [#allocation15], 1024  }
 0xb6c   :  { %3488 = vsyncadd [#allocation15], 4294966272 }
 0xb6d   :  { %2709 = vsyncpa [#allocation3], 1 }
 0xb6e   :  { %2710 = vsyncpa [#allocation6], 1 }
 0xb6f   :  { %2711 = vsyncpa [#allocation9], 1 }
 0xb70   :  { %2712 = vsyncpa [#allocation4], 1 }
 0xb71   :  { %2713 = vsyncpa [#allocation12], 1 }
 0xb72   :  { %2714 = vsyncpa [#allocation15], 1 }

</bundles_post_ra>
